<compile_context>
chip_gen: v7x
topology: tpu7x:2x2x1
jax: 0.10.0
libtpu: 0.0.40
codegen_flags: <defaults>
</compile_context>

<pallas_src>
import jax
import jax.numpy as jnp
from jax import lax
from jax.experimental import pallas as pl
from jax.experimental.pallas import tpu as pltpu  # noqa: F401

# ----------------------------- config (small) --------------------------------
D_MODEL = 128
NUM_HEADS = 2
NUM_GROUPS = NUM_HEADS              # module default: num_groups = num_heads
HEAD_DIM = D_MODEL // NUM_HEADS
D_FF = 256                          # d_ff passed explicitly
NUM_LAYERS = 2
EPS = 1e-5
BATCH = 2
SEQ = 16

# ordered names of stacked per-layer weights (kernel argument order)
WKEYS = ["ln1_g", "ln1_b", "ln2_g", "ln2_b", "qn_g", "qn_b", "kn_g", "kn_b",
         "wqkv", "wo", "wg1", "w2"]


# ------------------------------ shared math -----------------------------------
def _layernorm(x, gamma, beta, eps=EPS):
    """PyTorch nn.LayerNorm over the last dim (biased variance), f32 math."""
    x32 = x.astype(jnp.float32)
    mean = jnp.mean(x32, axis=-1, keepdims=True)
    var = jnp.mean(jnp.square(x32 - mean), axis=-1, keepdims=True)
    return (x32 - mean) * lax.rsqrt(var + eps) * gamma + beta


# ------------------------------- fused kernel ---------------------------------
def encoder_kernel(x_ref, bias_ref,
                   ln1_g, ln1_b, ln2_g, ln2_b, qn_g, qn_b, kn_g, kn_b,
                   wqkv, wo, wg1, w2, fn_g, fn_b,
                   o_ref):
    """All encoder layers + final LayerNorm for the batch-folded input."""
    x = x_ref[...].astype(jnp.float32)        # (M, D), M = B*T
    bias = bias_ref[...]                      # (M, M) block-diagonal additive bias

    scale = 1.0 / (HEAD_DIM ** 0.5)
    hpg = NUM_HEADS // NUM_GROUPS
    q_w = NUM_HEADS * HEAD_DIM
    kv_w = NUM_GROUPS * HEAD_DIM

    for l in range(NUM_LAYERS):               # static unroll (NUM_LAYERS = 2)
        # ---------------- self-attention block (pre-norm) ----------------
        h = _layernorm(x, ln1_g[l], ln1_b[l])
        # fused QKV projection: one (M, D) @ (D, 3D) bf16 matmul, f32 acc
        qkv = jnp.dot(h.astype(jnp.bfloat16), wqkv[l],
                      preferred_element_type=jnp.float32)
        q = qkv[:, :q_w]
        k = qkv[:, q_w:q_w + kv_w]
        v = qkv[:, q_w + kv_w:]

        w_o = wo[l]                            # (H, HEAD_DIM, D) bf16 value
        for hi in range(NUM_HEADS):            # static unroll (2 heads)
            gi = hi // hpg
            qh = _layernorm(q[:, hi * HEAD_DIM:(hi + 1) * HEAD_DIM],
                            qn_g[l], qn_b[l])
            kh = _layernorm(k[:, gi * HEAD_DIM:(gi + 1) * HEAD_DIM],
                            kn_g[l], kn_b[l])
            vh = v[:, gi * HEAD_DIM:(gi + 1) * HEAD_DIM]
            # contract last dims directly — no kh.T relayout
            s = lax.dot_general(qh.astype(jnp.bfloat16), kh.astype(jnp.bfloat16),
                                (((1,), (1,)), ((), ())),
                                preferred_element_type=jnp.float32) * scale + bias
            # max-stabilization kept for robustness to fully-masked padding rows
            s = s - jnp.max(s, axis=-1, keepdims=True)
            p = jnp.exp(s)
            p = p * pl.reciprocal(jnp.sum(p, axis=-1, keepdims=True), approx=True)
            head_o = jnp.dot(p.astype(jnp.bfloat16), vh.astype(jnp.bfloat16),
                             preferred_element_type=jnp.float32)   # (M, HEAD_DIM)
            # per-head output projection accumulated into residual (no concat)
            x = x + jnp.dot(head_o.astype(jnp.bfloat16), w_o[hi],
                            preferred_element_type=jnp.float32)

        # ---------------- GLU feed-forward block (pre-norm) ----------------
        h2 = _layernorm(x, ln2_g[l], ln2_b[l])
        # fused gate|up projection: one (M, D) @ (D, 2*D_FF) bf16 matmul
        gu = jnp.dot(h2.astype(jnp.bfloat16), wg1[l],
                     preferred_element_type=jnp.float32)
        gate = gu[:, :D_FF]
        up = gu[:, D_FF:]
        gate = gate * jax.nn.sigmoid(gate)            # SiLU, f32
        x = x + jnp.dot((gate * up).astype(jnp.bfloat16), w2[l],
                        preferred_element_type=jnp.float32)

    # ---------------- final LayerNorm (fused into the same kernel) ----------
    o_ref[...] = _layernorm(x, fn_g[...], fn_b[...]).astype(o_ref.dtype)


# ------------------------------- wrapper ---------------------------------------
def _stack_params(layer_params):
    """Stack per-layer weights (leading layer axis); fuse QKV / GLU mats; bf16 weights."""
    def st(key, dtype=jnp.float32):
        return jnp.stack([lp[key] for lp in layer_params]).astype(dtype)
    return {
        "ln1_g": st("ln1_g"), "ln1_b": st("ln1_b"),
        "ln2_g": st("ln2_g"), "ln2_b": st("ln2_b"),
        "qn_g": st("qn_g"), "qn_b": st("qn_b"),
        "kn_g": st("kn_g"), "kn_b": st("kn_b"),
        "wqkv": jnp.stack([jnp.concatenate([lp["wq"], lp["wk"], lp["wv"]], axis=1)
                           for lp in layer_params]).astype(jnp.bfloat16),
        # output projection split per head: (L, H, HEAD_DIM, D)
        "wo": jnp.stack([lp["wo"].reshape(NUM_HEADS, HEAD_DIM, D_MODEL)
                         for lp in layer_params]).astype(jnp.bfloat16),
        "wg1": jnp.stack([jnp.concatenate([lp["wg"], lp["w1"]], axis=1)
                          for lp in layer_params]).astype(jnp.bfloat16),
        "w2": st("w2", jnp.bfloat16),
    }


@jax.jit
def transformer_encoder(x, attn_mask, layer_params, final_g, final_b):
    """x: (B, T, D) float32; attn_mask: (B, T, T) bool (True = attend)."""
    B, T, D = x.shape
    M = B * T
    # Fold batch into the matmul M dimension; cross-batch attention is blocked
    # by a block-diagonal additive bias (off-diagonal blocks = -1e30).
    x2d = x.reshape(M, D)
    per_batch_bias = jnp.where(attn_mask, 0.0, -1e30).astype(jnp.float32)
    bias = jnp.full((M, M), -1e30, jnp.float32)
    for b in range(B):                     # static python loop (B is small)
        bias = lax.dynamic_update_slice(bias, per_batch_bias[b], (b * T, b * T))

    sp = _stack_params(layer_params)
    weights = [sp[k] for k in WKEYS] + [final_g, final_b]

    out2d = pl.pallas_call(
        encoder_kernel,
        out_shape=jax.ShapeDtypeStruct((M, D), x.dtype),
    )(x2d, bias, *weights)
    return out2d.reshape(B, T, D)


# --------------------------- pure-JAX reference ---------------------------------
def reference_forward(x, attn_mask, layer_params, final_g, final_b):
    mask_bias = jnp.where(attn_mask, 0.0, -1e30).astype(jnp.float32)
    scale = 1.0 / (HEAD_DIM ** 0.5)
    hpg = NUM_HEADS // NUM_GROUPS
    for lp in layer_params:
        h = _layernorm(x, lp["ln1_g"][0], lp["ln1_b"][0])
        q = h @ lp["wq"]
        k = h @ lp["wk"]
        v = h @ lp["wv"]
        heads = []
        for hi in range(NUM_HEADS):
            gi = hi // hpg
            qh = _layernorm(q[..., hi * HEAD_DIM:(hi + 1) * HEAD_DIM],
                            lp["qn_g"][0], lp["qn_b"][0])
            kh = _layernorm(k[..., gi * HEAD_DIM:(gi + 1) * HEAD_DIM],
                            lp["kn_g"][0], lp["kn_b"][0])
            vh = v[..., gi * HEAD_DIM:(gi + 1) * HEAD_DIM]
            s = jnp.einsum("btd,bsd->bts", qh, kh) * scale + mask_bias
            p = jax.nn.softmax(s, axis=-1)
            heads.append(jnp.einsum("bts,bsd->btd", p, vh))
        x = x + jnp.concatenate(heads, axis=-1) @ lp["wo"]
        h2 = _layernorm(x, lp["ln2_g"][0], lp["ln2_b"][0])
        gate = h2 @ lp["wg"]
        gate = gate * jax.nn.sigmoid(gate)
        x = x + (gate * (h2 @ lp["w1"])) @ lp["w2"]
    return _layernorm(x, final_g[0], final_b[0])


# ------------------------------ parameter init ----------------------------------
def init_params(key):
    def lin(k, fan_in, fan_out):
        return (jax.random.normal(k, (fan_in, fan_out), jnp.float32)
                / jnp.sqrt(jnp.float32(fan_in)))

    def norm_params(k, dim):
        kg, kb = jax.random.split(k)
        g = 1.0 + 0.1 * jax.random.normal(kg, (1, dim), jnp.float32)
        b = 0.1 * jax.random.normal(kb, (1, dim), jnp.float32)
        return g, b

    layer_params = []
    for _ in range(NUM_LAYERS):
        key, *ks = jax.random.split(key, 11)
        ln1_g, ln1_b = norm_params(ks[0], D_MODEL)
        ln2_g, ln2_b = norm_params(ks[1], D_MODEL)
        qn_g, qn_b = norm_params(ks[2], HEAD_DIM)
        kn_g, kn_b = norm_params(ks[3], HEAD_DIM)
        layer_params.append({
            "ln1_g": ln1_g, "ln1_b": ln1_b,
            "wq": lin(ks[4], D_MODEL, D_MODEL),
            "wk": lin(ks[5], D_MODEL, NUM_GROUPS * HEAD_DIM),
            "wv": lin(ks[6], D_MODEL, NUM_GROUPS * HEAD_DIM),
            "qn_g": qn_g, "qn_b": qn_b, "kn_g": kn_g, "kn_b": kn_b,
            "wo": lin(ks[7], D_MODEL, D_MODEL),
            "ln2_g": ln2_g, "ln2_b": ln2_b,
            "wg": lin(ks[8], D_MODEL, D_FF),
            "w1": lin(ks[9], D_MODEL, D_FF),
            "w2": lin(key, D_FF, D_MODEL),
        })
    key, kf = jax.random.split(key)
    final_g = 1.0 + 0.1 * jax.random.normal(kf, (1, D_MODEL), jnp.float32)
    key, kb = jax.random.split(key)
    final_b = 0.1 * jax.random.normal(kb, (1, D_MODEL), jnp.float32)
    return layer_params, final_g, final_b, key


# ----------------------------------- main ----------------------------------------
if __name__ == "__main__":
    root = jax.random.PRNGKey(0)
    layer_params, final_g, final_b, root = init_params(root)

    root, kx = jax.random.split(root)
    x = jax.random.normal(kx, (BATCH, SEQ, D_MODEL), jnp.float32)
    # causal attention mask (True = attend), exercises the mask path
    attn_mask = jnp.tril(jnp.ones((SEQ, SEQ), jnp.bool_))[None].repeat(BATCH, axis=0)

    out = transformer_encoder(x, attn_mask, layer_params, final_g, final_b)
    out = jax.block_until_ready(out)

    ref = reference_forward(x, attn_mask, layer_params, final_g, final_b)
    err = float(jnp.max(jnp.abs(out - ref)))
    assert out.shape == (BATCH, SEQ, D_MODEL)
    # Tolerance covers bf16 MXU operands + approx reciprocal; the f32 reference
    # is exact.  Structural bugs produce O(1) errors, far above this bound.
    assert err < 8e-2, f"mismatch vs reference, max abs err = {err}"

    print("KERNEL_OK")
</pallas_src>

<mosaic_0001>
module attributes {stable_mosaic.version = 11 : i64} {
  func.func @encoder_kernel(%arg0: memref<32x128xf32, #tpu.memory_space<vmem>>, %arg1: memref<32x32xf32, #tpu.memory_space<vmem>>, %arg2: memref<2x1x128xf32, #tpu.memory_space<vmem>>, %arg3: memref<2x1x128xf32, #tpu.memory_space<vmem>>, %arg4: memref<2x1x128xf32, #tpu.memory_space<vmem>>, %arg5: memref<2x1x128xf32, #tpu.memory_space<vmem>>, %arg6: memref<2x1x64xf32, #tpu.memory_space<vmem>>, %arg7: memref<2x1x64xf32, #tpu.memory_space<vmem>>, %arg8: memref<2x1x64xf32, #tpu.memory_space<vmem>>, %arg9: memref<2x1x64xf32, #tpu.memory_space<vmem>>, %arg10: memref<2x128x384xbf16, #tpu.memory_space<vmem>>, %arg11: memref<2x2x64x128xbf16, #tpu.memory_space<vmem>>, %arg12: memref<2x128x512xbf16, #tpu.memory_space<vmem>>, %arg13: memref<2x256x128xbf16, #tpu.memory_space<vmem>>, %arg14: memref<1x128xf32, #tpu.memory_space<vmem>>, %arg15: memref<1x128xf32, #tpu.memory_space<vmem>>, %arg16: memref<32x128xf32, #tpu.memory_space<vmem>>) attributes {dimension_semantics = [], scalar_prefetch = 0 : i64, scratch_operands = 0 : i64, tpu.core_type = #tpu.core_type<tc>} {
    %c0 = arith.constant 0 : index
    %c0_0 = arith.constant 0 : index
    %0 = vector.load %arg0[%c0, %c0_0] : memref<32x128xf32, #tpu.memory_space<vmem>>, vector<32x128xf32>
    %c0_1 = arith.constant 0 : index
    %c0_2 = arith.constant 0 : index
    %1 = vector.load %arg1[%c0_1, %c0_2] : memref<32x32xf32, #tpu.memory_space<vmem>>, vector<32x32xf32>
    %c0_3 = arith.constant 0 : index
    %c0_4 = arith.constant 0 : index
    %c0_5 = arith.constant 0 : index
    %2 = vector.load %arg2[%c0_3, %c0_4, %c0_5] : memref<2x1x128xf32, #tpu.memory_space<vmem>>, vector<1x1x128xf32>
    %3 = vector.shape_cast %2 : vector<1x1x128xf32> to vector<1x128xf32>
    %c0_6 = arith.constant 0 : index
    %c0_7 = arith.constant 0 : index
    %c0_8 = arith.constant 0 : index
    %4 = vector.load %arg3[%c0_6, %c0_7, %c0_8] : memref<2x1x128xf32, #tpu.memory_space<vmem>>, vector<1x1x128xf32>
    %5 = vector.shape_cast %4 : vector<1x1x128xf32> to vector<1x128xf32>
    %cst = arith.constant dense<0.000000e+00> : vector<32xf32>
    %6 = vector.multi_reduction <add>, %0, %cst [1] : vector<32x128xf32> to vector<32xf32>
    %7 = vector.shape_cast %6 : vector<32xf32> to vector<32x1xf32>
    %cst_9 = arith.constant 1.280000e+02 : f32
    %8 = vector.broadcast %cst_9 : f32 to vector<32x1xf32>
    %9 = arith.divf %7, %8 : vector<32x1xf32>
    %10 = vector.broadcast %9 : vector<32x1xf32> to vector<32x128xf32>
    %11 = arith.subf %0, %10 : vector<32x128xf32>
    %12 = arith.mulf %11, %11 : vector<32x128xf32>
    %cst_10 = arith.constant dense<0.000000e+00> : vector<32xf32>
    %13 = vector.multi_reduction <add>, %12, %cst_10 [1] : vector<32x128xf32> to vector<32xf32>
    %14 = vector.shape_cast %13 : vector<32xf32> to vector<32x1xf32>
    %cst_11 = arith.constant 1.280000e+02 : f32
    %15 = vector.broadcast %cst_11 : f32 to vector<32x1xf32>
    %16 = arith.divf %14, %15 : vector<32x1xf32>
    %17 = vector.broadcast %9 : vector<32x1xf32> to vector<32x128xf32>
    %18 = arith.subf %0, %17 : vector<32x128xf32>
    %cst_12 = arith.constant 9.99999974E-6 : f32
    %19 = vector.broadcast %cst_12 : f32 to vector<32x1xf32>
    %20 = arith.addf %16, %19 : vector<32x1xf32>
    %21 = math.rsqrt %20 : vector<32x1xf32>
    %22 = vector.broadcast %21 : vector<32x1xf32> to vector<32x128xf32>
    %23 = arith.mulf %18, %22 : vector<32x128xf32>
    %24 = vector.broadcast %3 : vector<1x128xf32> to vector<32x128xf32>
    %25 = arith.mulf %23, %24 : vector<32x128xf32>
    %26 = vector.broadcast %5 : vector<1x128xf32> to vector<32x128xf32>
    %27 = arith.addf %25, %26 : vector<32x128xf32>
    %28 = arith.truncf %27 : vector<32x128xf32> to vector<32x128xbf16>
    %c0_13 = arith.constant 0 : index
    %c0_14 = arith.constant 0 : index
    %c0_15 = arith.constant 0 : index
    %29 = vector.load %arg10[%c0_13, %c0_14, %c0_15] : memref<2x128x384xbf16, #tpu.memory_space<vmem>>, vector<1x128x384xbf16>
    %30 = vector.shape_cast %29 : vector<1x128x384xbf16> to vector<128x384xbf16>
    %cst_16 = arith.constant dense<0.000000e+00> : vector<32x384xf32>
    %31 = tpu.matmul %28, %30, %cst_16 {dimension_numbers = #tpu.dot_dimension_numbers<[1], [0], [0], [1], [0, 0, 1, 1], [], []>} : vector<32x128xbf16>, vector<128x384xbf16>, vector<32x384xf32> -> vector<32x384xf32>
    %32 = vector.extract_strided_slice %31 {offsets = [0, 0], sizes = [32, 128], strides = [1, 1]} : vector<32x384xf32> to vector<32x128xf32>
    %33 = vector.extract_strided_slice %31 {offsets = [0, 128], sizes = [32, 128], strides = [1, 1]} : vector<32x384xf32> to vector<32x128xf32>
    %34 = vector.extract_strided_slice %31 {offsets = [0, 256], sizes = [32, 128], strides = [1, 1]} : vector<32x384xf32> to vector<32x128xf32>
    %c0_17 = arith.constant 0 : index
    %c0_18 = arith.constant 0 : index
    %c0_19 = arith.constant 0 : index
    %c0_20 = arith.constant 0 : index
    %35 = vector.load %arg11[%c0_17, %c0_18, %c0_19, %c0_20] : memref<2x2x64x128xbf16, #tpu.memory_space<vmem>>, vector<1x2x64x128xbf16>
    %36 = vector.shape_cast %35 : vector<1x2x64x128xbf16> to vector<2x64x128xbf16>
    %37 = vector.extract_strided_slice %32 {offsets = [0, 0], sizes = [32, 64], strides = [1, 1]} : vector<32x128xf32> to vector<32x64xf32>
    %c0_21 = arith.constant 0 : index
    %c0_22 = arith.constant 0 : index
    %c0_23 = arith.constant 0 : index
    %38 = vector.load %arg6[%c0_21, %c0_22, %c0_23] : memref<2x1x64xf32, #tpu.memory_space<vmem>>, vector<1x1x64xf32>
    %39 = vector.shape_cast %38 : vector<1x1x64xf32> to vector<1x64xf32>
    %c0_24 = arith.constant 0 : index
    %c0_25 = arith.constant 0 : index
    %c0_26 = arith.constant 0 : index
    %40 = vector.load %arg7[%c0_24, %c0_25, %c0_26] : memref<2x1x64xf32, #tpu.memory_space<vmem>>, vector<1x1x64xf32>
    %41 = vector.shape_cast %40 : vector<1x1x64xf32> to vector<1x64xf32>
    %cst_27 = arith.constant dense<0.000000e+00> : vector<32xf32>
    %42 = vector.multi_reduction <add>, %37, %cst_27 [1] : vector<32x64xf32> to vector<32xf32>
    %43 = vector.shape_cast %42 : vector<32xf32> to vector<32x1xf32>
    %cst_28 = arith.constant 6.400000e+01 : f32
    %44 = vector.broadcast %cst_28 : f32 to vector<32x1xf32>
    %45 = arith.divf %43, %44 : vector<32x1xf32>
    %46 = vector.broadcast %45 : vector<32x1xf32> to vector<32x64xf32>
    %47 = arith.subf %37, %46 : vector<32x64xf32>
    %48 = arith.mulf %47, %47 : vector<32x64xf32>
    %cst_29 = arith.constant dense<0.000000e+00> : vector<32xf32>
    %49 = vector.multi_reduction <add>, %48, %cst_29 [1] : vector<32x64xf32> to vector<32xf32>
    %50 = vector.shape_cast %49 : vector<32xf32> to vector<32x1xf32>
    %cst_30 = arith.constant 6.400000e+01 : f32
    %51 = vector.broadcast %cst_30 : f32 to vector<32x1xf32>
    %52 = arith.divf %50, %51 : vector<32x1xf32>
    %53 = vector.broadcast %45 : vector<32x1xf32> to vector<32x64xf32>
    %54 = arith.subf %37, %53 : vector<32x64xf32>
    %cst_31 = arith.constant 9.99999974E-6 : f32
    %55 = vector.broadcast %cst_31 : f32 to vector<32x1xf32>
    %56 = arith.addf %52, %55 : vector<32x1xf32>
    %57 = math.rsqrt %56 : vector<32x1xf32>
    %58 = vector.broadcast %57 : vector<32x1xf32> to vector<32x64xf32>
    %59 = arith.mulf %54, %58 : vector<32x64xf32>
    %60 = vector.broadcast %39 : vector<1x64xf32> to vector<32x64xf32>
    %61 = arith.mulf %59, %60 : vector<32x64xf32>
    %62 = vector.broadcast %41 : vector<1x64xf32> to vector<32x64xf32>
    %63 = arith.addf %61, %62 : vector<32x64xf32>
    %64 = vector.extract_strided_slice %33 {offsets = [0, 0], sizes = [32, 64], strides = [1, 1]} : vector<32x128xf32> to vector<32x64xf32>
    %c0_32 = arith.constant 0 : index
    %c0_33 = arith.constant 0 : index
    %c0_34 = arith.constant 0 : index
    %65 = vector.load %arg8[%c0_32, %c0_33, %c0_34] : memref<2x1x64xf32, #tpu.memory_space<vmem>>, vector<1x1x64xf32>
    %66 = vector.shape_cast %65 : vector<1x1x64xf32> to vector<1x64xf32>
    %c0_35 = arith.constant 0 : index
    %c0_36 = arith.constant 0 : index
    %c0_37 = arith.constant 0 : index
    %67 = vector.load %arg9[%c0_35, %c0_36, %c0_37] : memref<2x1x64xf32, #tpu.memory_space<vmem>>, vector<1x1x64xf32>
    %68 = vector.shape_cast %67 : vector<1x1x64xf32> to vector<1x64xf32>
    %cst_38 = arith.constant dense<0.000000e+00> : vector<32xf32>
    %69 = vector.multi_reduction <add>, %64, %cst_38 [1] : vector<32x64xf32> to vector<32xf32>
    %70 = vector.shape_cast %69 : vector<32xf32> to vector<32x1xf32>
    %cst_39 = arith.constant 6.400000e+01 : f32
    %71 = vector.broadcast %cst_39 : f32 to vector<32x1xf32>
    %72 = arith.divf %70, %71 : vector<32x1xf32>
    %73 = vector.broadcast %72 : vector<32x1xf32> to vector<32x64xf32>
    %74 = arith.subf %64, %73 : vector<32x64xf32>
    %75 = arith.mulf %74, %74 : vector<32x64xf32>
    %cst_40 = arith.constant dense<0.000000e+00> : vector<32xf32>
    %76 = vector.multi_reduction <add>, %75, %cst_40 [1] : vector<32x64xf32> to vector<32xf32>
    %77 = vector.shape_cast %76 : vector<32xf32> to vector<32x1xf32>
    %cst_41 = arith.constant 6.400000e+01 : f32
    %78 = vector.broadcast %cst_41 : f32 to vector<32x1xf32>
    %79 = arith.divf %77, %78 : vector<32x1xf32>
    %80 = vector.broadcast %72 : vector<32x1xf32> to vector<32x64xf32>
    %81 = arith.subf %64, %80 : vector<32x64xf32>
    %cst_42 = arith.constant 9.99999974E-6 : f32
    %82 = vector.broadcast %cst_42 : f32 to vector<32x1xf32>
    %83 = arith.addf %79, %82 : vector<32x1xf32>
    %84 = math.rsqrt %83 : vector<32x1xf32>
    %85 = vector.broadcast %84 : vector<32x1xf32> to vector<32x64xf32>
    %86 = arith.mulf %81, %85 : vector<32x64xf32>
    %87 = vector.broadcast %66 : vector<1x64xf32> to vector<32x64xf32>
    %88 = arith.mulf %86, %87 : vector<32x64xf32>
    %89 = vector.broadcast %68 : vector<1x64xf32> to vector<32x64xf32>
    %90 = arith.addf %88, %89 : vector<32x64xf32>
    %91 = vector.extract_strided_slice %34 {offsets = [0, 0], sizes = [32, 64], strides = [1, 1]} : vector<32x128xf32> to vector<32x64xf32>
    %92 = arith.truncf %63 : vector<32x64xf32> to vector<32x64xbf16>
    %93 = arith.truncf %90 : vector<32x64xf32> to vector<32x64xbf16>
    %cst_43 = arith.constant dense<0.000000e+00> : vector<32x32xf32>
    %94 = tpu.matmul %92, %93, %cst_43 {dimension_numbers = #tpu.dot_dimension_numbers<[1], [1], [0], [0], [0, 0, 1, 0], [], []>} : vector<32x64xbf16>, vector<32x64xbf16>, vector<32x32xf32> -> vector<32x32xf32>
    %cst_44 = arith.constant 1.250000e-01 : f32
    %95 = vector.broadcast %cst_44 : f32 to vector<32x32xf32>
    %96 = arith.mulf %94, %95 : vector<32x32xf32>
    %97 = arith.addf %96, %1 : vector<32x32xf32>
    %cst_45 = arith.constant dense<0xFF800000> : vector<32xf32>
    %98 = vector.multi_reduction <maximumf>, %97, %cst_45 [1] : vector<32x32xf32> to vector<32xf32>
    %99 = vector.shape_cast %98 : vector<32xf32> to vector<32x1xf32>
    %100 = vector.broadcast %99 : vector<32x1xf32> to vector<32x32xf32>
    %101 = arith.subf %97, %100 : vector<32x32xf32>
    %102 = math.exp %101 : vector<32x32xf32>
    %cst_46 = arith.constant dense<0.000000e+00> : vector<32xf32>
    %103 = vector.multi_reduction <add>, %102, %cst_46 [1] : vector<32x32xf32> to vector<32xf32>
    %104 = vector.shape_cast %103 : vector<32xf32> to vector<32x1xf32>
    %105 = tpu.reciprocal %104 {approx = true} : vector<32x1xf32> -> vector<32x1xf32>
    %106 = vector.broadcast %105 : vector<32x1xf32> to vector<32x32xf32>
    %107 = arith.mulf %102, %106 : vector<32x32xf32>
    %108 = arith.truncf %107 : vector<32x32xf32> to vector<32x32xbf16>
    %109 = arith.truncf %91 : vector<32x64xf32> to vector<32x64xbf16>
    %cst_47 = arith.constant dense<0.000000e+00> : vector<32x64xf32>
    %110 = tpu.matmul %108, %109, %cst_47 {dimension_numbers = #tpu.dot_dimension_numbers<[1], [0], [0], [1], [0, 0, 1, 1], [], []>} : vector<32x32xbf16>, vector<32x64xbf16>, vector<32x64xf32> -> vector<32x64xf32>
    %111 = arith.truncf %110 : vector<32x64xf32> to vector<32x64xbf16>
    %112 = vector.extract_strided_slice %36 {offsets = [0, 0, 0], sizes = [1, 64, 128], strides = [1, 1, 1]} : vector<2x64x128xbf16> to vector<1x64x128xbf16>
    %113 = vector.shape_cast %112 : vector<1x64x128xbf16> to vector<64x128xbf16>
    %cst_48 = arith.constant dense<0.000000e+00> : vector<32x128xf32>
    %114 = tpu.matmul %111, %113, %cst_48 {dimension_numbers = #tpu.dot_dimension_numbers<[1], [0], [0], [1], [0, 0, 1, 1], [], []>} : vector<32x64xbf16>, vector<64x128xbf16>, vector<32x128xf32> -> vector<32x128xf32>
    %115 = arith.addf %0, %114 : vector<32x128xf32>
    %116 = vector.extract_strided_slice %32 {offsets = [0, 64], sizes = [32, 64], strides = [1, 1]} : vector<32x128xf32> to vector<32x64xf32>
    %c0_49 = arith.constant 0 : index
    %c0_50 = arith.constant 0 : index
    %c0_51 = arith.constant 0 : index
    %117 = vector.load %arg6[%c0_49, %c0_50, %c0_51] : memref<2x1x64xf32, #tpu.memory_space<vmem>>, vector<1x1x64xf32>
    %118 = vector.shape_cast %117 : vector<1x1x64xf32> to vector<1x64xf32>
    %c0_52 = arith.constant 0 : index
    %c0_53 = arith.constant 0 : index
    %c0_54 = arith.constant 0 : index
    %119 = vector.load %arg7[%c0_52, %c0_53, %c0_54] : memref<2x1x64xf32, #tpu.memory_space<vmem>>, vector<1x1x64xf32>
    %120 = vector.shape_cast %119 : vector<1x1x64xf32> to vector<1x64xf32>
    %cst_55 = arith.constant dense<0.000000e+00> : vector<32xf32>
    %121 = vector.multi_reduction <add>, %116, %cst_55 [1] : vector<32x64xf32> to vector<32xf32>
    %122 = vector.shape_cast %121 : vector<32xf32> to vector<32x1xf32>
    %cst_56 = arith.constant 6.400000e+01 : f32
    %123 = vector.broadcast %cst_56 : f32 to vector<32x1xf32>
    %124 = arith.divf %122, %123 : vector<32x1xf32>
    %125 = vector.broadcast %124 : vector<32x1xf32> to vector<32x64xf32>
    %126 = arith.subf %116, %125 : vector<32x64xf32>
    %127 = arith.mulf %126, %126 : vector<32x64xf32>
    %cst_57 = arith.constant dense<0.000000e+00> : vector<32xf32>
    %128 = vector.multi_reduction <add>, %127, %cst_57 [1] : vector<32x64xf32> to vector<32xf32>
    %129 = vector.shape_cast %128 : vector<32xf32> to vector<32x1xf32>
    %cst_58 = arith.constant 6.400000e+01 : f32
    %130 = vector.broadcast %cst_58 : f32 to vector<32x1xf32>
    %131 = arith.divf %129, %130 : vector<32x1xf32>
    %132 = vector.broadcast %124 : vector<32x1xf32> to vector<32x64xf32>
    %133 = arith.subf %116, %132 : vector<32x64xf32>
    %cst_59 = arith.constant 9.99999974E-6 : f32
    %134 = vector.broadcast %cst_59 : f32 to vector<32x1xf32>
    %135 = arith.addf %131, %134 : vector<32x1xf32>
    %136 = math.rsqrt %135 : vector<32x1xf32>
    %137 = vector.broadcast %136 : vector<32x1xf32> to vector<32x64xf32>
    %138 = arith.mulf %133, %137 : vector<32x64xf32>
    %139 = vector.broadcast %118 : vector<1x64xf32> to vector<32x64xf32>
    %140 = arith.mulf %138, %139 : vector<32x64xf32>
    %141 = vector.broadcast %120 : vector<1x64xf32> to vector<32x64xf32>
    %142 = arith.addf %140, %141 : vector<32x64xf32>
    %143 = vector.extract_strided_slice %33 {offsets = [0, 64], sizes = [32, 64], strides = [1, 1]} : vector<32x128xf32> to vector<32x64xf32>
    %c0_60 = arith.constant 0 : index
    %c0_61 = arith.constant 0 : index
    %c0_62 = arith.constant 0 : index
    %144 = vector.load %arg8[%c0_60, %c0_61, %c0_62] : memref<2x1x64xf32, #tpu.memory_space<vmem>>, vector<1x1x64xf32>
    %145 = vector.shape_cast %144 : vector<1x1x64xf32> to vector<1x64xf32>
    %c0_63 = arith.constant 0 : index
    %c0_64 = arith.constant 0 : index
    %c0_65 = arith.constant 0 : index
    %146 = vector.load %arg9[%c0_63, %c0_64, %c0_65] : memref<2x1x64xf32, #tpu.memory_space<vmem>>, vector<1x1x64xf32>
    %147 = vector.shape_cast %146 : vector<1x1x64xf32> to vector<1x64xf32>
    %cst_66 = arith.constant dense<0.000000e+00> : vector<32xf32>
    %148 = vector.multi_reduction <add>, %143, %cst_66 [1] : vector<32x64xf32> to vector<32xf32>
    %149 = vector.shape_cast %148 : vector<32xf32> to vector<32x1xf32>
    %cst_67 = arith.constant 6.400000e+01 : f32
    %150 = vector.broadcast %cst_67 : f32 to vector<32x1xf32>
    %151 = arith.divf %149, %150 : vector<32x1xf32>
    %152 = vector.broadcast %151 : vector<32x1xf32> to vector<32x64xf32>
    %153 = arith.subf %143, %152 : vector<32x64xf32>
    %154 = arith.mulf %153, %153 : vector<32x64xf32>
    %cst_68 = arith.constant dense<0.000000e+00> : vector<32xf32>
    %155 = vector.multi_reduction <add>, %154, %cst_68 [1] : vector<32x64xf32> to vector<32xf32>
    %156 = vector.shape_cast %155 : vector<32xf32> to vector<32x1xf32>
    %cst_69 = arith.constant 6.400000e+01 : f32
    %157 = vector.broadcast %cst_69 : f32 to vector<32x1xf32>
    %158 = arith.divf %156, %157 : vector<32x1xf32>
    %159 = vector.broadcast %151 : vector<32x1xf32> to vector<32x64xf32>
    %160 = arith.subf %143, %159 : vector<32x64xf32>
    %cst_70 = arith.constant 9.99999974E-6 : f32
    %161 = vector.broadcast %cst_70 : f32 to vector<32x1xf32>
    %162 = arith.addf %158, %161 : vector<32x1xf32>
    %163 = math.rsqrt %162 : vector<32x1xf32>
    %164 = vector.broadcast %163 : vector<32x1xf32> to vector<32x64xf32>
    %165 = arith.mulf %160, %164 : vector<32x64xf32>
    %166 = vector.broadcast %145 : vector<1x64xf32> to vector<32x64xf32>
    %167 = arith.mulf %165, %166 : vector<32x64xf32>
    %168 = vector.broadcast %147 : vector<1x64xf32> to vector<32x64xf32>
    %169 = arith.addf %167, %168 : vector<32x64xf32>
    %170 = vector.extract_strided_slice %34 {offsets = [0, 64], sizes = [32, 64], strides = [1, 1]} : vector<32x128xf32> to vector<32x64xf32>
    %171 = arith.truncf %142 : vector<32x64xf32> to vector<32x64xbf16>
    %172 = arith.truncf %169 : vector<32x64xf32> to vector<32x64xbf16>
    %cst_71 = arith.constant dense<0.000000e+00> : vector<32x32xf32>
    %173 = tpu.matmul %171, %172, %cst_71 {dimension_numbers = #tpu.dot_dimension_numbers<[1], [1], [0], [0], [0, 0, 1, 0], [], []>} : vector<32x64xbf16>, vector<32x64xbf16>, vector<32x32xf32> -> vector<32x32xf32>
    %cst_72 = arith.constant 1.250000e-01 : f32
    %174 = vector.broadcast %cst_72 : f32 to vector<32x32xf32>
    %175 = arith.mulf %173, %174 : vector<32x32xf32>
    %176 = arith.addf %175, %1 : vector<32x32xf32>
    %cst_73 = arith.constant dense<0xFF800000> : vector<32xf32>
    %177 = vector.multi_reduction <maximumf>, %176, %cst_73 [1] : vector<32x32xf32> to vector<32xf32>
    %178 = vector.shape_cast %177 : vector<32xf32> to vector<32x1xf32>
    %179 = vector.broadcast %178 : vector<32x1xf32> to vector<32x32xf32>
    %180 = arith.subf %176, %179 : vector<32x32xf32>
    %181 = math.exp %180 : vector<32x32xf32>
    %cst_74 = arith.constant dense<0.000000e+00> : vector<32xf32>
    %182 = vector.multi_reduction <add>, %181, %cst_74 [1] : vector<32x32xf32> to vector<32xf32>
    %183 = vector.shape_cast %182 : vector<32xf32> to vector<32x1xf32>
    %184 = tpu.reciprocal %183 {approx = true} : vector<32x1xf32> -> vector<32x1xf32>
    %185 = vector.broadcast %184 : vector<32x1xf32> to vector<32x32xf32>
    %186 = arith.mulf %181, %185 : vector<32x32xf32>
    %187 = arith.truncf %186 : vector<32x32xf32> to vector<32x32xbf16>
    %188 = arith.truncf %170 : vector<32x64xf32> to vector<32x64xbf16>
    %cst_75 = arith.constant dense<0.000000e+00> : vector<32x64xf32>
    %189 = tpu.matmul %187, %188, %cst_75 {dimension_numbers = #tpu.dot_dimension_numbers<[1], [0], [0], [1], [0, 0, 1, 1], [], []>} : vector<32x32xbf16>, vector<32x64xbf16>, vector<32x64xf32> -> vector<32x64xf32>
    %190 = arith.truncf %189 : vector<32x64xf32> to vector<32x64xbf16>
    %191 = vector.extract_strided_slice %36 {offsets = [1, 0, 0], sizes = [1, 64, 128], strides = [1, 1, 1]} : vector<2x64x128xbf16> to vector<1x64x128xbf16>
    %192 = vector.shape_cast %191 : vector<1x64x128xbf16> to vector<64x128xbf16>
    %cst_76 = arith.constant dense<0.000000e+00> : vector<32x128xf32>
    %193 = tpu.matmul %190, %192, %cst_76 {dimension_numbers = #tpu.dot_dimension_numbers<[1], [0], [0], [1], [0, 0, 1, 1], [], []>} : vector<32x64xbf16>, vector<64x128xbf16>, vector<32x128xf32> -> vector<32x128xf32>
    %194 = arith.addf %115, %193 : vector<32x128xf32>
    %c0_77 = arith.constant 0 : index
    %c0_78 = arith.constant 0 : index
    %c0_79 = arith.constant 0 : index
    %195 = vector.load %arg4[%c0_77, %c0_78, %c0_79] : memref<2x1x128xf32, #tpu.memory_space<vmem>>, vector<1x1x128xf32>
    %196 = vector.shape_cast %195 : vector<1x1x128xf32> to vector<1x128xf32>
    %c0_80 = arith.constant 0 : index
    %c0_81 = arith.constant 0 : index
    %c0_82 = arith.constant 0 : index
    %197 = vector.load %arg5[%c0_80, %c0_81, %c0_82] : memref<2x1x128xf32, #tpu.memory_space<vmem>>, vector<1x1x128xf32>
    %198 = vector.shape_cast %197 : vector<1x1x128xf32> to vector<1x128xf32>
    %cst_83 = arith.constant dense<0.000000e+00> : vector<32xf32>
    %199 = vector.multi_reduction <add>, %194, %cst_83 [1] : vector<32x128xf32> to vector<32xf32>
    %200 = vector.shape_cast %199 : vector<32xf32> to vector<32x1xf32>
    %cst_84 = arith.constant 1.280000e+02 : f32
    %201 = vector.broadcast %cst_84 : f32 to vector<32x1xf32>
    %202 = arith.divf %200, %201 : vector<32x1xf32>
    %203 = vector.broadcast %202 : vector<32x1xf32> to vector<32x128xf32>
    %204 = arith.subf %194, %203 : vector<32x128xf32>
    %205 = arith.mulf %204, %204 : vector<32x128xf32>
    %cst_85 = arith.constant dense<0.000000e+00> : vector<32xf32>
    %206 = vector.multi_reduction <add>, %205, %cst_85 [1] : vector<32x128xf32> to vector<32xf32>
    %207 = vector.shape_cast %206 : vector<32xf32> to vector<32x1xf32>
    %cst_86 = arith.constant 1.280000e+02 : f32
    %208 = vector.broadcast %cst_86 : f32 to vector<32x1xf32>
    %209 = arith.divf %207, %208 : vector<32x1xf32>
    %210 = vector.broadcast %202 : vector<32x1xf32> to vector<32x128xf32>
    %211 = arith.subf %194, %210 : vector<32x128xf32>
    %cst_87 = arith.constant 9.99999974E-6 : f32
    %212 = vector.broadcast %cst_87 : f32 to vector<32x1xf32>
    %213 = arith.addf %209, %212 : vector<32x1xf32>
    %214 = math.rsqrt %213 : vector<32x1xf32>
    %215 = vector.broadcast %214 : vector<32x1xf32> to vector<32x128xf32>
    %216 = arith.mulf %211, %215 : vector<32x128xf32>
    %217 = vector.broadcast %196 : vector<1x128xf32> to vector<32x128xf32>
    %218 = arith.mulf %216, %217 : vector<32x128xf32>
    %219 = vector.broadcast %198 : vector<1x128xf32> to vector<32x128xf32>
    %220 = arith.addf %218, %219 : vector<32x128xf32>
    %221 = arith.truncf %220 : vector<32x128xf32> to vector<32x128xbf16>
    %c0_88 = arith.constant 0 : index
    %c0_89 = arith.constant 0 : index
    %c0_90 = arith.constant 0 : index
    %222 = vector.load %arg12[%c0_88, %c0_89, %c0_90] : memref<2x128x512xbf16, #tpu.memory_space<vmem>>, vector<1x128x512xbf16>
    %223 = vector.shape_cast %222 : vector<1x128x512xbf16> to vector<128x512xbf16>
    %cst_91 = arith.constant dense<0.000000e+00> : vector<32x512xf32>
    %224 = tpu.matmul %221, %223, %cst_91 {dimension_numbers = #tpu.dot_dimension_numbers<[1], [0], [0], [1], [0, 0, 1, 1], [], []>} : vector<32x128xbf16>, vector<128x512xbf16>, vector<32x512xf32> -> vector<32x512xf32>
    %225 = vector.extract_strided_slice %224 {offsets = [0, 0], sizes = [32, 256], strides = [1, 1]} : vector<32x512xf32> to vector<32x256xf32>
    %226 = vector.extract_strided_slice %224 {offsets = [0, 256], sizes = [32, 256], strides = [1, 1]} : vector<32x512xf32> to vector<32x256xf32>
    %227 = arith.negf %225 : vector<32x256xf32>
    %228 = math.exp %227 : vector<32x256xf32>
    %cst_92 = arith.constant 1.000000e+00 : f32
    %229 = vector.broadcast %cst_92 : f32 to vector<32x256xf32>
    %230 = arith.addf %229, %228 : vector<32x256xf32>
    %231 = arith.divf %229, %230 : vector<32x256xf32>
    %232 = arith.mulf %225, %231 : vector<32x256xf32>
    %233 = arith.mulf %232, %226 : vector<32x256xf32>
    %234 = arith.truncf %233 : vector<32x256xf32> to vector<32x256xbf16>
    %c0_93 = arith.constant 0 : index
    %c0_94 = arith.constant 0 : index
    %c0_95 = arith.constant 0 : index
    %235 = vector.load %arg13[%c0_93, %c0_94, %c0_95] : memref<2x256x128xbf16, #tpu.memory_space<vmem>>, vector<1x256x128xbf16>
    %236 = vector.shape_cast %235 : vector<1x256x128xbf16> to vector<256x128xbf16>
    %cst_96 = arith.constant dense<0.000000e+00> : vector<32x128xf32>
    %237 = tpu.matmul %234, %236, %cst_96 {dimension_numbers = #tpu.dot_dimension_numbers<[1], [0], [0], [1], [0, 0, 1, 1], [], []>} : vector<32x256xbf16>, vector<256x128xbf16>, vector<32x128xf32> -> vector<32x128xf32>
    %238 = arith.addf %194, %237 : vector<32x128xf32>
    %c1 = arith.constant 1 : index
    %c0_97 = arith.constant 0 : index
    %c0_98 = arith.constant 0 : index
    %239 = vector.load %arg2[%c1, %c0_97, %c0_98] : memref<2x1x128xf32, #tpu.memory_space<vmem>>, vector<1x1x128xf32>
    %240 = vector.shape_cast %239 : vector<1x1x128xf32> to vector<1x128xf32>
    %c1_99 = arith.constant 1 : index
    %c0_100 = arith.constant 0 : index
    %c0_101 = arith.constant 0 : index
    %241 = vector.load %arg3[%c1_99, %c0_100, %c0_101] : memref<2x1x128xf32, #tpu.memory_space<vmem>>, vector<1x1x128xf32>
    %242 = vector.shape_cast %241 : vector<1x1x128xf32> to vector<1x128xf32>
    %cst_102 = arith.constant dense<0.000000e+00> : vector<32xf32>
    %243 = vector.multi_reduction <add>, %238, %cst_102 [1] : vector<32x128xf32> to vector<32xf32>
    %244 = vector.shape_cast %243 : vector<32xf32> to vector<32x1xf32>
    %cst_103 = arith.constant 1.280000e+02 : f32
    %245 = vector.broadcast %cst_103 : f32 to vector<32x1xf32>
    %246 = arith.divf %244, %245 : vector<32x1xf32>
    %247 = vector.broadcast %246 : vector<32x1xf32> to vector<32x128xf32>
    %248 = arith.subf %238, %247 : vector<32x128xf32>
    %249 = arith.mulf %248, %248 : vector<32x128xf32>
    %cst_104 = arith.constant dense<0.000000e+00> : vector<32xf32>
    %250 = vector.multi_reduction <add>, %249, %cst_104 [1] : vector<32x128xf32> to vector<32xf32>
    %251 = vector.shape_cast %250 : vector<32xf32> to vector<32x1xf32>
    %cst_105 = arith.constant 1.280000e+02 : f32
    %252 = vector.broadcast %cst_105 : f32 to vector<32x1xf32>
    %253 = arith.divf %251, %252 : vector<32x1xf32>
    %254 = vector.broadcast %246 : vector<32x1xf32> to vector<32x128xf32>
    %255 = arith.subf %238, %254 : vector<32x128xf32>
    %cst_106 = arith.constant 9.99999974E-6 : f32
    %256 = vector.broadcast %cst_106 : f32 to vector<32x1xf32>
    %257 = arith.addf %253, %256 : vector<32x1xf32>
    %258 = math.rsqrt %257 : vector<32x1xf32>
    %259 = vector.broadcast %258 : vector<32x1xf32> to vector<32x128xf32>
    %260 = arith.mulf %255, %259 : vector<32x128xf32>
    %261 = vector.broadcast %240 : vector<1x128xf32> to vector<32x128xf32>
    %262 = arith.mulf %260, %261 : vector<32x128xf32>
    %263 = vector.broadcast %242 : vector<1x128xf32> to vector<32x128xf32>
    %264 = arith.addf %262, %263 : vector<32x128xf32>
    %265 = arith.truncf %264 : vector<32x128xf32> to vector<32x128xbf16>
    %c1_107 = arith.constant 1 : index
    %c0_108 = arith.constant 0 : index
    %c0_109 = arith.constant 0 : index
    %266 = vector.load %arg10[%c1_107, %c0_108, %c0_109] : memref<2x128x384xbf16, #tpu.memory_space<vmem>>, vector<1x128x384xbf16>
    %267 = vector.shape_cast %266 : vector<1x128x384xbf16> to vector<128x384xbf16>
    %cst_110 = arith.constant dense<0.000000e+00> : vector<32x384xf32>
    %268 = tpu.matmul %265, %267, %cst_110 {dimension_numbers = #tpu.dot_dimension_numbers<[1], [0], [0], [1], [0, 0, 1, 1], [], []>} : vector<32x128xbf16>, vector<128x384xbf16>, vector<32x384xf32> -> vector<32x384xf32>
    %269 = vector.extract_strided_slice %268 {offsets = [0, 0], sizes = [32, 128], strides = [1, 1]} : vector<32x384xf32> to vector<32x128xf32>
    %270 = vector.extract_strided_slice %268 {offsets = [0, 128], sizes = [32, 128], strides = [1, 1]} : vector<32x384xf32> to vector<32x128xf32>
    %271 = vector.extract_strided_slice %268 {offsets = [0, 256], sizes = [32, 128], strides = [1, 1]} : vector<32x384xf32> to vector<32x128xf32>
    %c1_111 = arith.constant 1 : index
    %c0_112 = arith.constant 0 : index
    %c0_113 = arith.constant 0 : index
    %c0_114 = arith.constant 0 : index
    %272 = vector.load %arg11[%c1_111, %c0_112, %c0_113, %c0_114] : memref<2x2x64x128xbf16, #tpu.memory_space<vmem>>, vector<1x2x64x128xbf16>
    %273 = vector.shape_cast %272 : vector<1x2x64x128xbf16> to vector<2x64x128xbf16>
    %274 = vector.extract_strided_slice %269 {offsets = [0, 0], sizes = [32, 64], strides = [1, 1]} : vector<32x128xf32> to vector<32x64xf32>
    %c1_115 = arith.constant 1 : index
    %c0_116 = arith.constant 0 : index
    %c0_117 = arith.constant 0 : index
    %275 = vector.load %arg6[%c1_115, %c0_116, %c0_117] : memref<2x1x64xf32, #tpu.memory_space<vmem>>, vector<1x1x64xf32>
    %276 = vector.shape_cast %275 : vector<1x1x64xf32> to vector<1x64xf32>
    %c1_118 = arith.constant 1 : index
    %c0_119 = arith.constant 0 : index
    %c0_120 = arith.constant 0 : index
    %277 = vector.load %arg7[%c1_118, %c0_119, %c0_120] : memref<2x1x64xf32, #tpu.memory_space<vmem>>, vector<1x1x64xf32>
    %278 = vector.shape_cast %277 : vector<1x1x64xf32> to vector<1x64xf32>
    %cst_121 = arith.constant dense<0.000000e+00> : vector<32xf32>
    %279 = vector.multi_reduction <add>, %274, %cst_121 [1] : vector<32x64xf32> to vector<32xf32>
    %280 = vector.shape_cast %279 : vector<32xf32> to vector<32x1xf32>
    %cst_122 = arith.constant 6.400000e+01 : f32
    %281 = vector.broadcast %cst_122 : f32 to vector<32x1xf32>
    %282 = arith.divf %280, %281 : vector<32x1xf32>
    %283 = vector.broadcast %282 : vector<32x1xf32> to vector<32x64xf32>
    %284 = arith.subf %274, %283 : vector<32x64xf32>
    %285 = arith.mulf %284, %284 : vector<32x64xf32>
    %cst_123 = arith.constant dense<0.000000e+00> : vector<32xf32>
    %286 = vector.multi_reduction <add>, %285, %cst_123 [1] : vector<32x64xf32> to vector<32xf32>
    %287 = vector.shape_cast %286 : vector<32xf32> to vector<32x1xf32>
    %cst_124 = arith.constant 6.400000e+01 : f32
    %288 = vector.broadcast %cst_124 : f32 to vector<32x1xf32>
    %289 = arith.divf %287, %288 : vector<32x1xf32>
    %290 = vector.broadcast %282 : vector<32x1xf32> to vector<32x64xf32>
    %291 = arith.subf %274, %290 : vector<32x64xf32>
    %cst_125 = arith.constant 9.99999974E-6 : f32
    %292 = vector.broadcast %cst_125 : f32 to vector<32x1xf32>
    %293 = arith.addf %289, %292 : vector<32x1xf32>
    %294 = math.rsqrt %293 : vector<32x1xf32>
    %295 = vector.broadcast %294 : vector<32x1xf32> to vector<32x64xf32>
    %296 = arith.mulf %291, %295 : vector<32x64xf32>
    %297 = vector.broadcast %276 : vector<1x64xf32> to vector<32x64xf32>
    %298 = arith.mulf %296, %297 : vector<32x64xf32>
    %299 = vector.broadcast %278 : vector<1x64xf32> to vector<32x64xf32>
    %300 = arith.addf %298, %299 : vector<32x64xf32>
    %301 = vector.extract_strided_slice %270 {offsets = [0, 0], sizes = [32, 64], strides = [1, 1]} : vector<32x128xf32> to vector<32x64xf32>
    %c1_126 = arith.constant 1 : index
    %c0_127 = arith.constant 0 : index
    %c0_128 = arith.constant 0 : index
    %302 = vector.load %arg8[%c1_126, %c0_127, %c0_128] : memref<2x1x64xf32, #tpu.memory_space<vmem>>, vector<1x1x64xf32>
    %303 = vector.shape_cast %302 : vector<1x1x64xf32> to vector<1x64xf32>
    %c1_129 = arith.constant 1 : index
    %c0_130 = arith.constant 0 : index
    %c0_131 = arith.constant 0 : index
    %304 = vector.load %arg9[%c1_129, %c0_130, %c0_131] : memref<2x1x64xf32, #tpu.memory_space<vmem>>, vector<1x1x64xf32>
    %305 = vector.shape_cast %304 : vector<1x1x64xf32> to vector<1x64xf32>
    %cst_132 = arith.constant dense<0.000000e+00> : vector<32xf32>
    %306 = vector.multi_reduction <add>, %301, %cst_132 [1] : vector<32x64xf32> to vector<32xf32>
    %307 = vector.shape_cast %306 : vector<32xf32> to vector<32x1xf32>
    %cst_133 = arith.constant 6.400000e+01 : f32
    %308 = vector.broadcast %cst_133 : f32 to vector<32x1xf32>
    %309 = arith.divf %307, %308 : vector<32x1xf32>
    %310 = vector.broadcast %309 : vector<32x1xf32> to vector<32x64xf32>
    %311 = arith.subf %301, %310 : vector<32x64xf32>
    %312 = arith.mulf %311, %311 : vector<32x64xf32>
    %cst_134 = arith.constant dense<0.000000e+00> : vector<32xf32>
    %313 = vector.multi_reduction <add>, %312, %cst_134 [1] : vector<32x64xf32> to vector<32xf32>
    %314 = vector.shape_cast %313 : vector<32xf32> to vector<32x1xf32>
    %cst_135 = arith.constant 6.400000e+01 : f32
    %315 = vector.broadcast %cst_135 : f32 to vector<32x1xf32>
    %316 = arith.divf %314, %315 : vector<32x1xf32>
    %317 = vector.broadcast %309 : vector<32x1xf32> to vector<32x64xf32>
    %318 = arith.subf %301, %317 : vector<32x64xf32>
    %cst_136 = arith.constant 9.99999974E-6 : f32
    %319 = vector.broadcast %cst_136 : f32 to vector<32x1xf32>
    %320 = arith.addf %316, %319 : vector<32x1xf32>
    %321 = math.rsqrt %320 : vector<32x1xf32>
    %322 = vector.broadcast %321 : vector<32x1xf32> to vector<32x64xf32>
    %323 = arith.mulf %318, %322 : vector<32x64xf32>
    %324 = vector.broadcast %303 : vector<1x64xf32> to vector<32x64xf32>
    %325 = arith.mulf %323, %324 : vector<32x64xf32>
    %326 = vector.broadcast %305 : vector<1x64xf32> to vector<32x64xf32>
    %327 = arith.addf %325, %326 : vector<32x64xf32>
    %328 = vector.extract_strided_slice %271 {offsets = [0, 0], sizes = [32, 64], strides = [1, 1]} : vector<32x128xf32> to vector<32x64xf32>
    %329 = arith.truncf %300 : vector<32x64xf32> to vector<32x64xbf16>
    %330 = arith.truncf %327 : vector<32x64xf32> to vector<32x64xbf16>
    %cst_137 = arith.constant dense<0.000000e+00> : vector<32x32xf32>
    %331 = tpu.matmul %329, %330, %cst_137 {dimension_numbers = #tpu.dot_dimension_numbers<[1], [1], [0], [0], [0, 0, 1, 0], [], []>} : vector<32x64xbf16>, vector<32x64xbf16>, vector<32x32xf32> -> vector<32x32xf32>
    %cst_138 = arith.constant 1.250000e-01 : f32
    %332 = vector.broadcast %cst_138 : f32 to vector<32x32xf32>
    %333 = arith.mulf %331, %332 : vector<32x32xf32>
    %334 = arith.addf %333, %1 : vector<32x32xf32>
    %cst_139 = arith.constant dense<0xFF800000> : vector<32xf32>
    %335 = vector.multi_reduction <maximumf>, %334, %cst_139 [1] : vector<32x32xf32> to vector<32xf32>
    %336 = vector.shape_cast %335 : vector<32xf32> to vector<32x1xf32>
    %337 = vector.broadcast %336 : vector<32x1xf32> to vector<32x32xf32>
    %338 = arith.subf %334, %337 : vector<32x32xf32>
    %339 = math.exp %338 : vector<32x32xf32>
    %cst_140 = arith.constant dense<0.000000e+00> : vector<32xf32>
    %340 = vector.multi_reduction <add>, %339, %cst_140 [1] : vector<32x32xf32> to vector<32xf32>
    %341 = vector.shape_cast %340 : vector<32xf32> to vector<32x1xf32>
    %342 = tpu.reciprocal %341 {approx = true} : vector<32x1xf32> -> vector<32x1xf32>
    %343 = vector.broadcast %342 : vector<32x1xf32> to vector<32x32xf32>
    %344 = arith.mulf %339, %343 : vector<32x32xf32>
    %345 = arith.truncf %344 : vector<32x32xf32> to vector<32x32xbf16>
    %346 = arith.truncf %328 : vector<32x64xf32> to vector<32x64xbf16>
    %cst_141 = arith.constant dense<0.000000e+00> : vector<32x64xf32>
    %347 = tpu.matmul %345, %346, %cst_141 {dimension_numbers = #tpu.dot_dimension_numbers<[1], [0], [0], [1], [0, 0, 1, 1], [], []>} : vector<32x32xbf16>, vector<32x64xbf16>, vector<32x64xf32> -> vector<32x64xf32>
    %348 = arith.truncf %347 : vector<32x64xf32> to vector<32x64xbf16>
    %349 = vector.extract_strided_slice %273 {offsets = [0, 0, 0], sizes = [1, 64, 128], strides = [1, 1, 1]} : vector<2x64x128xbf16> to vector<1x64x128xbf16>
    %350 = vector.shape_cast %349 : vector<1x64x128xbf16> to vector<64x128xbf16>
    %cst_142 = arith.constant dense<0.000000e+00> : vector<32x128xf32>
    %351 = tpu.matmul %348, %350, %cst_142 {dimension_numbers = #tpu.dot_dimension_numbers<[1], [0], [0], [1], [0, 0, 1, 1], [], []>} : vector<32x64xbf16>, vector<64x128xbf16>, vector<32x128xf32> -> vector<32x128xf32>
    %352 = arith.addf %238, %351 : vector<32x128xf32>
    %353 = vector.extract_strided_slice %269 {offsets = [0, 64], sizes = [32, 64], strides = [1, 1]} : vector<32x128xf32> to vector<32x64xf32>
    %c1_143 = arith.constant 1 : index
    %c0_144 = arith.constant 0 : index
    %c0_145 = arith.constant 0 : index
    %354 = vector.load %arg6[%c1_143, %c0_144, %c0_145] : memref<2x1x64xf32, #tpu.memory_space<vmem>>, vector<1x1x64xf32>
    %355 = vector.shape_cast %354 : vector<1x1x64xf32> to vector<1x64xf32>
    %c1_146 = arith.constant 1 : index
    %c0_147 = arith.constant 0 : index
    %c0_148 = arith.constant 0 : index
    %356 = vector.load %arg7[%c1_146, %c0_147, %c0_148] : memref<2x1x64xf32, #tpu.memory_space<vmem>>, vector<1x1x64xf32>
    %357 = vector.shape_cast %356 : vector<1x1x64xf32> to vector<1x64xf32>
    %cst_149 = arith.constant dense<0.000000e+00> : vector<32xf32>
    %358 = vector.multi_reduction <add>, %353, %cst_149 [1] : vector<32x64xf32> to vector<32xf32>
    %359 = vector.shape_cast %358 : vector<32xf32> to vector<32x1xf32>
    %cst_150 = arith.constant 6.400000e+01 : f32
    %360 = vector.broadcast %cst_150 : f32 to vector<32x1xf32>
    %361 = arith.divf %359, %360 : vector<32x1xf32>
    %362 = vector.broadcast %361 : vector<32x1xf32> to vector<32x64xf32>
    %363 = arith.subf %353, %362 : vector<32x64xf32>
    %364 = arith.mulf %363, %363 : vector<32x64xf32>
    %cst_151 = arith.constant dense<0.000000e+00> : vector<32xf32>
    %365 = vector.multi_reduction <add>, %364, %cst_151 [1] : vector<32x64xf32> to vector<32xf32>
    %366 = vector.shape_cast %365 : vector<32xf32> to vector<32x1xf32>
    %cst_152 = arith.constant 6.400000e+01 : f32
    %367 = vector.broadcast %cst_152 : f32 to vector<32x1xf32>
    %368 = arith.divf %366, %367 : vector<32x1xf32>
    %369 = vector.broadcast %361 : vector<32x1xf32> to vector<32x64xf32>
    %370 = arith.subf %353, %369 : vector<32x64xf32>
    %cst_153 = arith.constant 9.99999974E-6 : f32
    %371 = vector.broadcast %cst_153 : f32 to vector<32x1xf32>
    %372 = arith.addf %368, %371 : vector<32x1xf32>
    %373 = math.rsqrt %372 : vector<32x1xf32>
    %374 = vector.broadcast %373 : vector<32x1xf32> to vector<32x64xf32>
    %375 = arith.mulf %370, %374 : vector<32x64xf32>
    %376 = vector.broadcast %355 : vector<1x64xf32> to vector<32x64xf32>
    %377 = arith.mulf %375, %376 : vector<32x64xf32>
    %378 = vector.broadcast %357 : vector<1x64xf32> to vector<32x64xf32>
    %379 = arith.addf %377, %378 : vector<32x64xf32>
    %380 = vector.extract_strided_slice %270 {offsets = [0, 64], sizes = [32, 64], strides = [1, 1]} : vector<32x128xf32> to vector<32x64xf32>
    %c1_154 = arith.constant 1 : index
    %c0_155 = arith.constant 0 : index
    %c0_156 = arith.constant 0 : index
    %381 = vector.load %arg8[%c1_154, %c0_155, %c0_156] : memref<2x1x64xf32, #tpu.memory_space<vmem>>, vector<1x1x64xf32>
    %382 = vector.shape_cast %381 : vector<1x1x64xf32> to vector<1x64xf32>
    %c1_157 = arith.constant 1 : index
    %c0_158 = arith.constant 0 : index
    %c0_159 = arith.constant 0 : index
    %383 = vector.load %arg9[%c1_157, %c0_158, %c0_159] : memref<2x1x64xf32, #tpu.memory_space<vmem>>, vector<1x1x64xf32>
    %384 = vector.shape_cast %383 : vector<1x1x64xf32> to vector<1x64xf32>
    %cst_160 = arith.constant dense<0.000000e+00> : vector<32xf32>
    %385 = vector.multi_reduction <add>, %380, %cst_160 [1] : vector<32x64xf32> to vector<32xf32>
    %386 = vector.shape_cast %385 : vector<32xf32> to vector<32x1xf32>
    %cst_161 = arith.constant 6.400000e+01 : f32
    %387 = vector.broadcast %cst_161 : f32 to vector<32x1xf32>
    %388 = arith.divf %386, %387 : vector<32x1xf32>
    %389 = vector.broadcast %388 : vector<32x1xf32> to vector<32x64xf32>
    %390 = arith.subf %380, %389 : vector<32x64xf32>
    %391 = arith.mulf %390, %390 : vector<32x64xf32>
    %cst_162 = arith.constant dense<0.000000e+00> : vector<32xf32>
    %392 = vector.multi_reduction <add>, %391, %cst_162 [1] : vector<32x64xf32> to vector<32xf32>
    %393 = vector.shape_cast %392 : vector<32xf32> to vector<32x1xf32>
    %cst_163 = arith.constant 6.400000e+01 : f32
    %394 = vector.broadcast %cst_163 : f32 to vector<32x1xf32>
    %395 = arith.divf %393, %394 : vector<32x1xf32>
    %396 = vector.broadcast %388 : vector<32x1xf32> to vector<32x64xf32>
    %397 = arith.subf %380, %396 : vector<32x64xf32>
    %cst_164 = arith.constant 9.99999974E-6 : f32
    %398 = vector.broadcast %cst_164 : f32 to vector<32x1xf32>
    %399 = arith.addf %395, %398 : vector<32x1xf32>
    %400 = math.rsqrt %399 : vector<32x1xf32>
    %401 = vector.broadcast %400 : vector<32x1xf32> to vector<32x64xf32>
    %402 = arith.mulf %397, %401 : vector<32x64xf32>
    %403 = vector.broadcast %382 : vector<1x64xf32> to vector<32x64xf32>
    %404 = arith.mulf %402, %403 : vector<32x64xf32>
    %405 = vector.broadcast %384 : vector<1x64xf32> to vector<32x64xf32>
    %406 = arith.addf %404, %405 : vector<32x64xf32>
    %407 = vector.extract_strided_slice %271 {offsets = [0, 64], sizes = [32, 64], strides = [1, 1]} : vector<32x128xf32> to vector<32x64xf32>
    %408 = arith.truncf %379 : vector<32x64xf32> to vector<32x64xbf16>
    %409 = arith.truncf %406 : vector<32x64xf32> to vector<32x64xbf16>
    %cst_165 = arith.constant dense<0.000000e+00> : vector<32x32xf32>
    %410 = tpu.matmul %408, %409, %cst_165 {dimension_numbers = #tpu.dot_dimension_numbers<[1], [1], [0], [0], [0, 0, 1, 0], [], []>} : vector<32x64xbf16>, vector<32x64xbf16>, vector<32x32xf32> -> vector<32x32xf32>
    %cst_166 = arith.constant 1.250000e-01 : f32
    %411 = vector.broadcast %cst_166 : f32 to vector<32x32xf32>
    %412 = arith.mulf %410, %411 : vector<32x32xf32>
    %413 = arith.addf %412, %1 : vector<32x32xf32>
    %cst_167 = arith.constant dense<0xFF800000> : vector<32xf32>
    %414 = vector.multi_reduction <maximumf>, %413, %cst_167 [1] : vector<32x32xf32> to vector<32xf32>
    %415 = vector.shape_cast %414 : vector<32xf32> to vector<32x1xf32>
    %416 = vector.broadcast %415 : vector<32x1xf32> to vector<32x32xf32>
    %417 = arith.subf %413, %416 : vector<32x32xf32>
    %418 = math.exp %417 : vector<32x32xf32>
    %cst_168 = arith.constant dense<0.000000e+00> : vector<32xf32>
    %419 = vector.multi_reduction <add>, %418, %cst_168 [1] : vector<32x32xf32> to vector<32xf32>
    %420 = vector.shape_cast %419 : vector<32xf32> to vector<32x1xf32>
    %421 = tpu.reciprocal %420 {approx = true} : vector<32x1xf32> -> vector<32x1xf32>
    %422 = vector.broadcast %421 : vector<32x1xf32> to vector<32x32xf32>
    %423 = arith.mulf %418, %422 : vector<32x32xf32>
    %424 = arith.truncf %423 : vector<32x32xf32> to vector<32x32xbf16>
    %425 = arith.truncf %407 : vector<32x64xf32> to vector<32x64xbf16>
    %cst_169 = arith.constant dense<0.000000e+00> : vector<32x64xf32>
    %426 = tpu.matmul %424, %425, %cst_169 {dimension_numbers = #tpu.dot_dimension_numbers<[1], [0], [0], [1], [0, 0, 1, 1], [], []>} : vector<32x32xbf16>, vector<32x64xbf16>, vector<32x64xf32> -> vector<32x64xf32>
    %427 = arith.truncf %426 : vector<32x64xf32> to vector<32x64xbf16>
    %428 = vector.extract_strided_slice %273 {offsets = [1, 0, 0], sizes = [1, 64, 128], strides = [1, 1, 1]} : vector<2x64x128xbf16> to vector<1x64x128xbf16>
    %429 = vector.shape_cast %428 : vector<1x64x128xbf16> to vector<64x128xbf16>
    %cst_170 = arith.constant dense<0.000000e+00> : vector<32x128xf32>
    %430 = tpu.matmul %427, %429, %cst_170 {dimension_numbers = #tpu.dot_dimension_numbers<[1], [0], [0], [1], [0, 0, 1, 1], [], []>} : vector<32x64xbf16>, vector<64x128xbf16>, vector<32x128xf32> -> vector<32x128xf32>
    %431 = arith.addf %352, %430 : vector<32x128xf32>
    %c1_171 = arith.constant 1 : index
    %c0_172 = arith.constant 0 : index
    %c0_173 = arith.constant 0 : index
    %432 = vector.load %arg4[%c1_171, %c0_172, %c0_173] : memref<2x1x128xf32, #tpu.memory_space<vmem>>, vector<1x1x128xf32>
    %433 = vector.shape_cast %432 : vector<1x1x128xf32> to vector<1x128xf32>
    %c1_174 = arith.constant 1 : index
    %c0_175 = arith.constant 0 : index
    %c0_176 = arith.constant 0 : index
    %434 = vector.load %arg5[%c1_174, %c0_175, %c0_176] : memref<2x1x128xf32, #tpu.memory_space<vmem>>, vector<1x1x128xf32>
    %435 = vector.shape_cast %434 : vector<1x1x128xf32> to vector<1x128xf32>
    %cst_177 = arith.constant dense<0.000000e+00> : vector<32xf32>
    %436 = vector.multi_reduction <add>, %431, %cst_177 [1] : vector<32x128xf32> to vector<32xf32>
    %437 = vector.shape_cast %436 : vector<32xf32> to vector<32x1xf32>
    %cst_178 = arith.constant 1.280000e+02 : f32
    %438 = vector.broadcast %cst_178 : f32 to vector<32x1xf32>
    %439 = arith.divf %437, %438 : vector<32x1xf32>
    %440 = vector.broadcast %439 : vector<32x1xf32> to vector<32x128xf32>
    %441 = arith.subf %431, %440 : vector<32x128xf32>
    %442 = arith.mulf %441, %441 : vector<32x128xf32>
    %cst_179 = arith.constant dense<0.000000e+00> : vector<32xf32>
    %443 = vector.multi_reduction <add>, %442, %cst_179 [1] : vector<32x128xf32> to vector<32xf32>
    %444 = vector.shape_cast %443 : vector<32xf32> to vector<32x1xf32>
    %cst_180 = arith.constant 1.280000e+02 : f32
    %445 = vector.broadcast %cst_180 : f32 to vector<32x1xf32>
    %446 = arith.divf %444, %445 : vector<32x1xf32>
    %447 = vector.broadcast %439 : vector<32x1xf32> to vector<32x128xf32>
    %448 = arith.subf %431, %447 : vector<32x128xf32>
    %cst_181 = arith.constant 9.99999974E-6 : f32
    %449 = vector.broadcast %cst_181 : f32 to vector<32x1xf32>
    %450 = arith.addf %446, %449 : vector<32x1xf32>
    %451 = math.rsqrt %450 : vector<32x1xf32>
    %452 = vector.broadcast %451 : vector<32x1xf32> to vector<32x128xf32>
    %453 = arith.mulf %448, %452 : vector<32x128xf32>
    %454 = vector.broadcast %433 : vector<1x128xf32> to vector<32x128xf32>
    %455 = arith.mulf %453, %454 : vector<32x128xf32>
    %456 = vector.broadcast %435 : vector<1x128xf32> to vector<32x128xf32>
    %457 = arith.addf %455, %456 : vector<32x128xf32>
    %458 = arith.truncf %457 : vector<32x128xf32> to vector<32x128xbf16>
    %c1_182 = arith.constant 1 : index
    %c0_183 = arith.constant 0 : index
    %c0_184 = arith.constant 0 : index
    %459 = vector.load %arg12[%c1_182, %c0_183, %c0_184] : memref<2x128x512xbf16, #tpu.memory_space<vmem>>, vector<1x128x512xbf16>
    %460 = vector.shape_cast %459 : vector<1x128x512xbf16> to vector<128x512xbf16>
    %cst_185 = arith.constant dense<0.000000e+00> : vector<32x512xf32>
    %461 = tpu.matmul %458, %460, %cst_185 {dimension_numbers = #tpu.dot_dimension_numbers<[1], [0], [0], [1], [0, 0, 1, 1], [], []>} : vector<32x128xbf16>, vector<128x512xbf16>, vector<32x512xf32> -> vector<32x512xf32>
    %462 = vector.extract_strided_slice %461 {offsets = [0, 0], sizes = [32, 256], strides = [1, 1]} : vector<32x512xf32> to vector<32x256xf32>
    %463 = vector.extract_strided_slice %461 {offsets = [0, 256], sizes = [32, 256], strides = [1, 1]} : vector<32x512xf32> to vector<32x256xf32>
    %464 = arith.negf %462 : vector<32x256xf32>
    %465 = math.exp %464 : vector<32x256xf32>
    %cst_186 = arith.constant 1.000000e+00 : f32
    %466 = vector.broadcast %cst_186 : f32 to vector<32x256xf32>
    %467 = arith.addf %466, %465 : vector<32x256xf32>
    %468 = arith.divf %466, %467 : vector<32x256xf32>
    %469 = arith.mulf %462, %468 : vector<32x256xf32>
    %470 = arith.mulf %469, %463 : vector<32x256xf32>
    %471 = arith.truncf %470 : vector<32x256xf32> to vector<32x256xbf16>
    %c1_187 = arith.constant 1 : index
    %c0_188 = arith.constant 0 : index
    %c0_189 = arith.constant 0 : index
    %472 = vector.load %arg13[%c1_187, %c0_188, %c0_189] : memref<2x256x128xbf16, #tpu.memory_space<vmem>>, vector<1x256x128xbf16>
    %473 = vector.shape_cast %472 : vector<1x256x128xbf16> to vector<256x128xbf16>
    %cst_190 = arith.constant dense<0.000000e+00> : vector<32x128xf32>
    %474 = tpu.matmul %471, %473, %cst_190 {dimension_numbers = #tpu.dot_dimension_numbers<[1], [0], [0], [1], [0, 0, 1, 1], [], []>} : vector<32x256xbf16>, vector<256x128xbf16>, vector<32x128xf32> -> vector<32x128xf32>
    %475 = arith.addf %431, %474 : vector<32x128xf32>
    %c0_191 = arith.constant 0 : index
    %c0_192 = arith.constant 0 : index
    %476 = vector.load %arg14[%c0_191, %c0_192] : memref<1x128xf32, #tpu.memory_space<vmem>>, vector<1x128xf32>
    %c0_193 = arith.constant 0 : index
    %c0_194 = arith.constant 0 : index
    %477 = vector.load %arg15[%c0_193, %c0_194] : memref<1x128xf32, #tpu.memory_space<vmem>>, vector<1x128xf32>
    %cst_195 = arith.constant dense<0.000000e+00> : vector<32xf32>
    %478 = vector.multi_reduction <add>, %475, %cst_195 [1] : vector<32x128xf32> to vector<32xf32>
    %479 = vector.shape_cast %478 : vector<32xf32> to vector<32x1xf32>
    %cst_196 = arith.constant 1.280000e+02 : f32
    %480 = vector.broadcast %cst_196 : f32 to vector<32x1xf32>
    %481 = arith.divf %479, %480 : vector<32x1xf32>
    %482 = vector.broadcast %481 : vector<32x1xf32> to vector<32x128xf32>
    %483 = arith.subf %475, %482 : vector<32x128xf32>
    %484 = arith.mulf %483, %483 : vector<32x128xf32>
    %cst_197 = arith.constant dense<0.000000e+00> : vector<32xf32>
    %485 = vector.multi_reduction <add>, %484, %cst_197 [1] : vector<32x128xf32> to vector<32xf32>
    %486 = vector.shape_cast %485 : vector<32xf32> to vector<32x1xf32>
    %cst_198 = arith.constant 1.280000e+02 : f32
    %487 = vector.broadcast %cst_198 : f32 to vector<32x1xf32>
    %488 = arith.divf %486, %487 : vector<32x1xf32>
    %489 = vector.broadcast %481 : vector<32x1xf32> to vector<32x128xf32>
    %490 = arith.subf %475, %489 : vector<32x128xf32>
    %cst_199 = arith.constant 9.99999974E-6 : f32
    %491 = vector.broadcast %cst_199 : f32 to vector<32x1xf32>
    %492 = arith.addf %488, %491 : vector<32x1xf32>
    %493 = math.rsqrt %492 : vector<32x1xf32>
    %494 = vector.broadcast %493 : vector<32x1xf32> to vector<32x128xf32>
    %495 = arith.mulf %490, %494 : vector<32x128xf32>
    %496 = vector.broadcast %476 : vector<1x128xf32> to vector<32x128xf32>
    %497 = arith.mulf %495, %496 : vector<32x128xf32>
    %498 = vector.broadcast %477 : vector<1x128xf32> to vector<32x128xf32>
    %499 = arith.addf %497, %498 : vector<32x128xf32>
    %c0_200 = arith.constant 0 : index
    %c0_201 = arith.constant 0 : index
    %500 = vector.load %arg16[%c0_200, %c0_201] : memref<32x128xf32, #tpu.memory_space<vmem>>, vector<32x128xf32>
    tpu.vector_store %arg16[%c0_200, %c0_201], %499 {strides = array<i32>} : memref<32x128xf32, #tpu.memory_space<vmem>>, vector<32x128xf32>,
    return
  }
}

</mosaic_0001>

<bundles_post_ra>
// kernel: transformer_encoder.1
= control target key start
LH: loop header
LB: loop body
LE: loop exit
PB: predicated region body
PF: predicated region fallthrough
CT: control target
= control target key end

     0   :  { %s6382_s0 = inlined_call_operand.vmem [shape: f32[32,128], index: 0, kind: input, shape index: {}]   ;;  %s6383_s1 = inlined_call_operand.vmem [shape: f32[32,32], index: 1, kind: input, shape index: {}]   ;;  %s6384_s2 = inlined_call_operand.vmem [shape: f32[2,1,128], index: 2, kind: input, shape index: {}]   ;;  %s6385_s3 = inlined_call_operand.vmem [shape: f32[2,1,128], index: 3, kind: input, shape index: {}]   ;;  %s6386_s4 = inlined_call_operand.vmem [shape: f32[2,1,128], index: 4, kind: input, shape index: {}]   ;;  %s6387_s5 = inlined_call_operand.vmem [shape: f32[2,1,128], index: 5, kind: input, shape index: {}]   ;;  %s6388_s6 = inlined_call_operand.vmem [shape: f32[2,1,64], index: 6, kind: input, shape index: {}]   ;;  %s6389_s7 = inlined_call_operand.vmem [shape: f32[2,1,64], index: 7, kind: input, shape index: {}]   ;;  %s6390_s8 = inlined_call_operand.vmem [shape: f32[2,1,64], index: 8, kind: input, shape index: {}]   ;;  %s6391_s9 = inlined_call_operand.vmem [shape: f32[2,1,64], index: 9, kind: input, shape index: {}]   ;;  %s6392_s10 = inlined_call_operand.vmem [shape: bf16[2,128,384], index: 10, kind: input, shape index: {}]   ;;  %s6393_s11 = inlined_call_operand.vmem [shape: bf16[2,2,64,128], index: 11, kind: input, shape index: {}]   ;;  %s6394_s12 = inlined_call_operand.vmem [shape: bf16[2,128,512], index: 12, kind: input, shape index: {}]   ;;  %s6395_s13 = inlined_call_operand.vmem [shape: bf16[2,256,128], index: 13, kind: input, shape index: {}]   ;;  %s6396_s14 = inlined_call_operand.vmem [shape: f32[1,128], index: 14, kind: input, shape index: {}]   ;;  %s6397_s15 = inlined_call_operand.vmem [shape: f32[1,128], index: 15, kind: input, shape index: {}]   ;;  %s6398_s16 = inlined_call_operand.hbm [shape: f32[32,128], index: 16, kind: output, shape index: {}]  }
   0x1   :  { %6400 = sst [smem:[#allocation5_spill]] %s6382_s0 }
   0x2   :  { %s6401_s23 = sld [smem:[#allocation5_spill]]  ;;  %v4506_v4 = vld [vmem:[%s6392_s10 + $0x4] ss:$12 sps:$4 sm:$0xff]   ;;  %v4508_v5 = vld [vmem:[%s6392_s10] ss:$12 sps:$4 sm:$0xff]  }
   0x3   :  { %v4509_v6 = vld [vmem:[%s6392_s10 + $0x1c] ss:$12 sps:$4 sm:$0xff]   ;;  %292 = vmatprep.subr.bf16.mxu0 %v4506_v4 }
   0x4   :  { %v4511_v7 = vld [vmem:[%s6392_s10 + $0x8] ss:$12 sps:$4 sm:$0xff]   ;;  %293 = vmatpush1.bf16.msra.mxu0 %v4508_v5 }
   0x5   :  { %4325 = vmatprep.subr.bf16.mxu1 %v4511_v7  ;;  %294 = vmatprep.subr.bf16.mxu0 %v4509_v6 }
   0x6   :  { %4326 = vmatpush3.bf16.msra.mxu1 %v4511_v7 }
   0x8   :  { %v55_v0 = vld [vmem:[%s6401_s23] sm:$0xff]  ;;  %v57_v1 = vld [vmem:[%s6401_s23 + $0x10] sm:$0xff]  ;;  %v56_v2 = vld [vmem:[%s6401_s23 + $0x8] sm:$0xff] }
   0x9   :  { %65 = vadd.xlane.f32.xlu0 %v55_v0  ;;  %69 = vadd.xlane.f32.xlu1 %v57_v1  ;;  %v58_v3 = vld [vmem:[%s6401_s23 + $0x18] sm:$0xff] }
   0xd   :  { %67 = vadd.xlane.f32.xlu0 %v56_v2  ;;  %71 = vadd.xlane.f32.xlu1 %v58_v3 }
   0xe   :  { %21 = vsyncpa [#allocation3], 0  ;;  %v4512_v24 = vld [vmem:[%s6392_s10 + $0x18] ss:$12 sps:$4 sm:$0xff]   ;;  %v4513_v25 = vld [vmem:[%s6392_s10 + $0x34] ss:$12 sps:$4 sm:$0xff]  }
   0xf   :  { %295 = vmatpush1.bf16.msra.mxu0 %v4512_v24  ;;  %v4515_v26 = vld [vmem:[%s6392_s10 + $0x20] ss:$12 sps:$4 sm:$0xff]   ;;  %v4516_v27 = vld [vmem:[%s6392_s10 + $0x30] ss:$12 sps:$4 sm:$0xff]   ;;  %v4519_v29 = vld [vmem:[%s6392_s10 + $0x38] ss:$12 sps:$4 sm:$0xff]  }
  0x10   :  { %296 = vmatprep.subr.bf16.mxu0 %v4513_v25  ;;  %4327 = vmatprep.subr.bf16.mxu1 %v4515_v26  ;;  %v4517_v28 = vld [vmem:[%s6392_s10 + $0x4c] ss:$12 sps:$4 sm:$0xff]   ;;  %v4520_v30 = vld [vmem:[%s6392_s10 + $0x48] ss:$12 sps:$4 sm:$0xff]   ;;  %v4521_v31 = vld [vmem:[%s6392_s10 + $0x64] ss:$12 sps:$4 sm:$0xff]  }
  0x11   :  { %4328 = vmatpush3.bf16.msra.mxu1 %v4515_v26  ;;  %v4523_v32 = vld [vmem:[%s6392_s10 + $0x50] ss:$12 sps:$4 sm:$0xff]   ;;  %v4524_v33 = vld [vmem:[%s6392_s10 + $0x60] ss:$12 sps:$4 sm:$0xff]   ;;  %v4527_v35 = vld [vmem:[%s6392_s10 + $0x68] ss:$12 sps:$4 sm:$0xff]  }
  0x12   :  { %4329 = vmatprep.subr.bf16.mxu1 %v4519_v29  ;;  %v4525_v34 = vld [vmem:[%s6392_s10 + $0x7c] ss:$12 sps:$4 sm:$0xff]   ;;  %v4528_v36 = vld [vmem:[%s6392_s10 + $0x78] ss:$12 sps:$4 sm:$0xff]   ;;  %v4529_v37 = vld [vmem:[%s6392_s10 + $0x94] ss:$12 sps:$4 sm:$0xff]  }
  0x13   :  { %297 = vmatpush1.bf16.msra.mxu0 %v4516_v27  ;;  %v4531_v38 = vld [vmem:[%s6392_s10 + $0x80] ss:$12 sps:$4 sm:$0xff]   ;;  %v4978_v39 = vmov 0   ;;  %v4532_v40 = vld [vmem:[%s6392_s10 + $0x90] ss:$12 sps:$4 sm:$0xff]   ;;  %vm412_vm0 = vcmask 523264  }
  0x14   :  { %298 = vmatprep.subr.bf16.mxu0 %v4517_v28  ;;  %324 = vmatprep.mubr.bf16.mxu0 %v4978_v39  ;;  %v4533_v41 = vld [vmem:[%s6392_s10 + $0xac] ss:$12 sps:$4 sm:$0xff]   ;;  %v4536_v43 = vld [vmem:[%s6392_s10 + $0xa8] ss:$12 sps:$4 sm:$0xff]   ;;  %v4537_v44 = vld [vmem:[%s6392_s10 + $0xb0] ss:$12 sps:$4 sm:$0xff]  }
  0x15   :  { %4330 = vmatpush3.bf16.msra.mxu1 %v4519_v29  ;;  %v4535_v42 = vld [vmem:[%s6392_s10 + $0x98] ss:$12 sps:$4 sm:$0xff]   ;;  %v3855_v59 = vld [vmem:[%s6384_s2] ss:$0 sm:$0xff]  ;;  %s4979_s26 = smov 64   ;;  %vm633_vm1 = vcmask 261120  }
  0x16   :  { %4331 = vmatprep.subr.bf16.mxu1 %v4523_v32 }
  0x17   :  { %299 = vmatpush1.bf16.msra.mxu0 %v4520_v30 }
  0x18   :  { %300 = vmatprep.subr.bf16.mxu0 %v4521_v31 }
  0x19   :  { %4332 = vmatpush3.bf16.msra.mxu1 %v4523_v32 }
  0x1a   :  { %4333 = vmatprep.subr.bf16.mxu1 %v4527_v35 }
  0x1b   :  { %301 = vmatpush1.bf16.msra.mxu0 %v4524_v33 }
  0x1c   :  { %302 = vmatprep.subr.bf16.mxu0 %v4525_v34 }
  0x1d   :  { %4334 = vmatpush3.bf16.msra.mxu1 %v4527_v35 }
  0x1e   :  { %4335 = vmatprep.subr.bf16.mxu1 %v4531_v38 }
  0x1f   :  { %303 = vmatpush1.bf16.msra.mxu0 %v4528_v36 }
  0x20   :  { %304 = vmatprep.subr.bf16.mxu0 %v4529_v37 }
  0x21   :  { %4336 = vmatpush3.bf16.msra.mxu1 %v4531_v38 }
  0x22   :  { %4337 = vmatprep.subr.bf16.mxu1 %v4535_v42 }
  0x23   :  { %305 = vmatpush1.bf16.msra.mxu0 %v4532_v40 }
  0x24   :  { %306 = vmatprep.subr.bf16.mxu0 %v4533_v41 }
  0x25   :  { %4338 = vmatpush3.bf16.msra.mxu1 %v4535_v42 }
  0x26   :  { %4339 = vmatprep.subr.bf16.mxu1 %v4537_v44 }
  0x27   :  { %307 = vmatpush1.bf16.msra.mxu0 %v4536_v43 }
  0x29   :  { %4340 = vmatpush3.bf16.msra.mxu1 %v4537_v44 }
  0x96   :  { %v66_v8 = vpop.xlane.xlu0 %65  ;;  %v70_v9 = vpop.xlane.xlu1 %69 }
  0x97   :  { %v74_v10 = vmul.f32 0.0078125, %v66_v8  ;;  %v76_v11 = vmul.f32 0.0078125, %v70_v9 }
  0x99   :  { %v5092_v12 = vsub.f32 %v55_v0, %v74_v10  ;;  %v5094_v13 = vsub.f32 %v57_v1, %v76_v11  ;;  %v3856_v0 = vld [vmem:[%s6385_s3] ss:$0 sm:$0xff] }
  0x9a   :  { %v68_v14 = vpop.xlane.xlu0 %67  ;;  %v72_v15 = vpop.xlane.xlu1 %71 }
  0x9b   :  { %v75_v16 = vmul.f32 0.0078125, %v68_v14  ;;  %v82_v17 = vmul.f32 %v5092_v12, %v5092_v12  ;;  %v77_v18 = vmul.f32 0.0078125, %v72_v15  ;;  %v84_v19 = vmul.f32 %v5094_v13, %v5094_v13 }
  0x9d   :  { %86 = vadd.xlane.f32.xlu0 %v82_v17  ;;  %v5100_v20 = vsub.f32 %v56_v2, %v75_v16  ;;  %v5102_v21 = vsub.f32 %v58_v3, %v77_v18 }
  0x9f   :  { %v83_v22 = vmul.f32 %v5100_v20, %v5100_v20  ;;  %v85_v23 = vmul.f32 %v5102_v21, %v5102_v21 }
  0xa1   :  { %90 = vadd.xlane.f32.xlu0 %v84_v19  ;;  %88 = vadd.xlane.f32.xlu1 %v83_v22 }
  0xa5   :  { %92 = vadd.xlane.f32.xlu1 %v85_v23 }
 0x12a   :  { %v87_v45 = vpop.xlane.xlu0 %86 }
 0x12b   :  { %v94_v46 = vmul.f32 0.0078125, %v87_v45 }
 0x12d   :  { %v98_v47 = vadd.f32 1e-05, %v94_v46 }
 0x12e   :  { %v89_v48 = vpop.xlane.xlu1 %88  ;;  %v91_v49 = vpop.xlane.xlu0 %90 }
 0x12f   :  { %4714 = vrsqrt.f32 %v98_v47  ;;  %v95_v50 = vmul.f32 0.0078125, %v89_v48  ;;  %v96_v51 = vmul.f32 0.0078125, %v91_v49 }
 0x131   :  { %v99_v52 = vadd.f32 1e-05, %v95_v50  ;;  %v100_v53 = vadd.f32 1e-05, %v96_v51 }
 0x132   :  { %v93_v54 = vpop.xlane.xlu1 %92 }
 0x133   :  { %4716 = vrsqrt.f32 %v99_v52  ;;  %v97_v55 = vmul.f32 0.0078125, %v93_v54 }
 0x134   :  { %4718 = vrsqrt.f32 %v100_v53 }
 0x135   :  { %v101_v56 = vadd.f32 1e-05, %v97_v55 }
 0x137   :  { %4720 = vrsqrt.f32 %v101_v56 }
 0x139   :  { %v4715_v57 = vpop.eup %4714 }
 0x13a   :  { %v106_v58 = vmul.f32 %v4715_v57, %v5092_v12 }
 0x13c   :  { %v116_v63 = vmul.f32 %v3855_v59, %v106_v58 }
 0x13d   :  { %v4717_v60 = vpop.eup %4716 }
 0x13e   :  { %v4719_v61 = vpop.eup %4718  ;;  %v107_v62 = vmul.f32 %v4717_v60, %v5100_v20  ;;  %v126_v4 = vadd.f32 %v3856_v0, %v116_v63 }
 0x13f   :  { %v108_v1 = vmul.f32 %v4719_v61, %v5094_v13 }
 0x140   :  { %v117_v2 = vmul.f32 %v3855_v59, %v107_v62 }
 0x141   :  { %v4721_v3 = vpop.eup %4720  ;;  %v118_v7 = vmul.f32 %v3855_v59, %v108_v1 }
 0x142   :  { %v127_v5 = vadd.f32 %v3856_v0, %v117_v2  ;;  %v109_v6 = vmul.f32 %v4721_v3, %v5102_v21 }
 0x143   :  { %v128_v10 = vadd.f32 %v3856_v0, %v118_v7 }
 0x144   :  { %v130_v8 = vpack.c.bf16 %v127_v5, %v126_v4  ;;  %v119_v9 = vmul.f32 %v3855_v59, %v109_v6 }
 0x146   :  { %325 = vmatmul.mubr.bf16.vlgmr.msra.gmra.mrb[0].mxu0 %v130_v8  ;;  %4341 = vmatprep.mubr.bf16.mxu1 %v130_v8  ;;  %v129_v11 = vadd.f32 %v3856_v0, %v119_v9 }
 0x147   :  { %334 = vmatprep.mubr.bf16.mxu0 %v4978_v39 }
 0x148   :  { %v131_v12 = vpack.c.bf16 %v129_v11, %v128_v10 }
 0x14a   :  { %4342 = vmatmul.mubr.bf16.vlgmr.msra.gmra.mrb[0].mxu1 %v131_v12 }
 0x14e   :  { %335 = vmatmul.mubr.bf16.gmra.mrb[4].mxu0 %v131_v12 }
 0x219   :  { %v5180_v13 = vpop.f32.mrb[0].mxu0 }
 0x21a   :  { %v5182_v14 = vpop.f32.mrb[1].mxu0  ;;  %v413_v32 = vsel %vm412_vm0, %v5180_v13, 0.0 }
 0x21b   :  { %v5184_v15 = vpop.f32.mrb[2].mxu0  ;;  %v488_v16 = vsel %vm412_vm0, %v5182_v14, 0.0 }
 0x21c   :  { %489 = vadd.xlane.f32.xlu0 %v488_v16  ;;  %v5188_v17 = vpop.f32.mrb[3].mxu0  ;;  %v416_v26 = vsel %vm412_vm0, %v5184_v15, 0.0 }
 0x21d   :  { %v4343_v18 = vpop.f32.mrb[0].mxu1  ;;  %v491_v19 = vsel %vm412_vm0, %v5188_v17, 0.0 }
 0x21e   :  { %492 = vadd.xlane.f32.xlu1 %v491_v19  ;;  %v379_v20 = vpop.f32.mrb[1].mxu1 }
 0x21f   :  { %v4344_v21 = vpop.f32.mrb[2].mxu1 }
 0x220   :  { %v5192_v22 = vpack.c.bf16 %v4344_v21, %v4343_v18  ;;  %v382_v23 = vpop.f32.mrb[3].mxu1 }
 0x221   :  { %v5194_v24 = vpack.c.bf16 %v382_v23, %v379_v20  ;;  %v5196_v25 = vpop.f32.mrb[4].mxu0 }
 0x222   :  { %417 = vadd.xlane.f32.xlu1 %v416_v26  ;;  %v5200_v27 = vpop.f32.mrb[5].mxu0  ;;  %v419_v34 = vsel %vm412_vm0, %v5196_v25, 0.0 }
 0x223   :  { %v5202_v28 = vpop.f32.mrb[6].mxu0  ;;  %4353 = vmatprep.subr.bf16.mxu1 %v5194_v24  ;;  %v494_v29 = vsel %vm412_vm0, %v5200_v27, 0.0 }
 0x224   :  { %4354 = vmatpush3.bf16.msra.mxu1 %v5194_v24  ;;  %495 = vadd.xlane.f32.xlu0 %v494_v29  ;;  %v5208_v30 = vpop.f32.mrb[7].mxu0  ;;  %v422_v33 = vsel %vm412_vm0, %v5202_v28, 0.0 }
 0x225   :  { %4355 = vmatprep.subr.bf16.mxu1 %v5192_v22  ;;  %v497_v31 = vsel %vm412_vm0, %v5208_v30, 0.0 }
 0x226   :  { %498 = vadd.xlane.f32.xlu1 %v497_v31 }
 0x228   :  { %4356 = vmatpush3.bf16.msra.mxu1 %v5192_v22  ;;  %414 = vadd.xlane.f32.xlu0 %v413_v32 }
 0x22a   :  { %423 = vadd.xlane.f32.xlu1 %v422_v33 }
 0x22c   :  { %420 = vadd.xlane.f32.xlu0 %v419_v34 }
 0x23b   :  { %926 = vrot.lane.b32.xlu1 %v5188_v17, %s4979_s26 }
 0x23f   :  { %928 = vrot.lane.b32.xlu1 %v5200_v27, %s4979_s26 }
 0x242   :  { %924 = vrot.lane.b32.xlu0 %v5182_v14, %s4979_s26 }
 0x243   :  { %930 = vrot.lane.b32.xlu1 %v5208_v30, %s4979_s26 }
 0x246   :  { %826 = vrot.lane.b32.xlu0 %v5180_v13, %s4979_s26 }
 0x247   :  { %828 = vrot.lane.b32.xlu1 %v5184_v15, %s4979_s26 }
 0x24a   :  { %830 = vrot.lane.b32.xlu0 %v5196_v25, %s4979_s26 }
 0x24b   :  { %832 = vrot.lane.b32.xlu1 %v5202_v28, %s4979_s26 }
 0x2a9   :  { %v490_v35 = vpop.xlane.xlu0 %489 }
 0x2aa   :  { %v500_v36 = vmul.f32 0.015625, %v490_v35 }
 0x2ab   :  { %v493_v37 = vpop.xlane.xlu1 %492 }
 0x2ac   :  { %v5237_v38 = vsub.f32 %v5182_v14, %v500_v36  ;;  %v501_v40 = vmul.f32 0.015625, %v493_v37 }
 0x2ae   :  { %v5240_v41 = vsub.f32 %v5188_v17, %v501_v40  ;;  %v508_v42 = vmul.f32 %v5237_v38, %v5237_v38 }
 0x2af   :  { %v418_v43 = vpop.xlane.xlu1 %417 }
 0x2b0   :  { %v427_v44 = vmul.f32 0.015625, %v418_v43  ;;  %v512_v45 = vsel %vm412_vm0, %v508_v42, 0.0  ;;  %v509_v46 = vmul.f32 %v5240_v41, %v5240_v41 }
 0x2b1   :  { %513 = vadd.xlane.f32.xlu0 %v512_v45  ;;  %v496_v47 = vpop.xlane.xlu0 %495 }
 0x2b2   :  { %v5248_v48 = vsub.f32 %v5184_v15, %v427_v44  ;;  %v502_v49 = vmul.f32 0.015625, %v496_v47  ;;  %v515_v50 = vsel %vm412_vm0, %v509_v46, 0.0 }
 0x2b3   :  { %516 = vadd.xlane.f32.xlu1 %v515_v50  ;;  %v499_v51 = vpop.xlane.xlu1 %498 }
 0x2b4   :  { %v5252_v52 = vsub.f32 %v5200_v27, %v502_v49  ;;  %v503_v53 = vmul.f32 0.015625, %v499_v51  ;;  %v435_v54 = vmul.f32 %v5248_v48, %v5248_v48 }
 0x2b5   :  { %v415_v55 = vpop.xlane.xlu0 %414 }
 0x2b6   :  { %v5257_v56 = vsub.f32 %v5208_v30, %v503_v53  ;;  %v426_v57 = vmul.f32 0.015625, %v415_v55  ;;  %v441_v58 = vsel %vm412_vm0, %v435_v54, 0.0  ;;  %v510_v59 = vmul.f32 %v5252_v52, %v5252_v52 }
 0x2b7   :  { %442 = vadd.xlane.f32.xlu1 %v441_v58  ;;  %v424_v60 = vpop.xlane.xlu1 %423 }
 0x2b8   :  { %v5263_v61 = vsub.f32 %v5180_v13, %v426_v57  ;;  %v429_v62 = vmul.f32 0.015625, %v424_v60  ;;  %v518_v63 = vsel %vm412_vm0, %v510_v59, 0.0  ;;  %v511_v0 = vmul.f32 %v5257_v56, %v5257_v56 }
 0x2b9   :  { %519 = vadd.xlane.f32.xlu0 %v518_v63  ;;  %v421_v1 = vpop.xlane.xlu0 %420  ;;  %v5295_v63 = vld [vmem:[%s6390_s8] ss:$0 sm:$0xff] }
 0x2ba   :  { %v5269_v2 = vsub.f32 %v5202_v28, %v429_v62  ;;  %v428_v3 = vmul.f32 0.015625, %v421_v1  ;;  %v521_v6 = vsel %vm412_vm0, %v511_v0, 0.0  ;;  %v434_v8 = vmul.f32 %v5263_v61, %v5263_v61 }
 0x2bb   :  { %v927_v4 = vpop.permute.xlu1 %926 }
 0x2bc   :  { %v5272_v5 = vsub.f32 %v5196_v25, %v428_v3  ;;  %v437_v7 = vmul.f32 %v5269_v2, %v5269_v2  ;;  %v438_v11 = vsel %vm412_vm0, %v434_v8, 0.0  ;;  %v939_v16 = vsel %vm412_vm0, %v927_v4, 0.0 }
 0x2bd   :  { %522 = vadd.xlane.f32.xlu0 %v521_v6  ;;  %v925_v20 = vpop.permute.xlu0 %924 }
 0x2be   :  { %v447_v9 = vsel %vm412_vm0, %v437_v7, 0.0  ;;  %v436_v12 = vmul.f32 %v5272_v5, %v5272_v5  ;;  %v936_v26 = vsel %vm412_vm0, %v925_v20, 0.0 }
 0x2bf   :  { %448 = vadd.xlane.f32.xlu1 %v447_v9  ;;  %v929_v10 = vpop.permute.xlu1 %928 }
 0x2c0   :  { %v444_v19 = vsel %vm412_vm0, %v436_v12, 0.0  ;;  %v942_v33 = vsel %vm412_vm0, %v929_v10, 0.0  ;;  %v5303_v12 = vld [vmem:[%s6391_s9] ss:$0 sm:$0xff] }
 0x2c1   :  { %439 = vadd.xlane.f32.xlu0 %v438_v11  ;;  %v827_v31 = vpop.permute.xlu0 %826 }
 0x2c2   :  { %v838_v35 = vsel %vm412_vm0, %v827_v31, 0.0 }
 0x2c3   :  { %940 = vadd.xlane.f32.xlu1 %v939_v16  ;;  %v931_v18 = vpop.permute.xlu1 %930 }
 0x2c4   :  { %v945_v21 = vsel %vm412_vm0, %v931_v18, 0.0 }
 0x2c5   :  { %445 = vadd.xlane.f32.xlu0 %v444_v19  ;;  %v831_v36 = vpop.permute.xlu0 %830 }
 0x2c6   :  { %v844_v37 = vsel %vm412_vm0, %v831_v36, 0.0 }
 0x2c7   :  { %946 = vadd.xlane.f32.xlu1 %v945_v21  ;;  %v829_v23 = vpop.permute.xlu1 %828 }
 0x2c8   :  { %v841_v29 = vsel %vm412_vm0, %v829_v23, 0.0 }
 0x2c9   :  { %937 = vadd.xlane.f32.xlu0 %v936_v26 }
 0x2cb   :  { %842 = vadd.xlane.f32.xlu1 %v841_v29  ;;  %v833_v32 = vpop.permute.xlu1 %832 }
 0x2cc   :  { %v847_v34 = vsel %vm412_vm0, %v833_v32, 0.0 }
 0x2cd   :  { %943 = vadd.xlane.f32.xlu0 %v942_v33 }
 0x2cf   :  { %848 = vadd.xlane.f32.xlu1 %v847_v34 }
 0x2d1   :  { %839 = vadd.xlane.f32.xlu0 %v838_v35 }
 0x2d5   :  { %845 = vadd.xlane.f32.xlu0 %v844_v37 }
 0x33e   :  { %v514_v40 = vpop.xlane.xlu0 %513 }
 0x33f   :  { %v524_v42 = vmul.f32 0.015625, %v514_v40 }
 0x340   :  { %v517_v43 = vpop.xlane.xlu1 %516 }
 0x341   :  { %v528_v44 = vadd.f32 1e-05, %v524_v42  ;;  %v525_v45 = vmul.f32 0.015625, %v517_v43 }
 0x343   :  { %4722 = vrsqrt.f32 %v528_v44  ;;  %v529_v46 = vadd.f32 1e-05, %v525_v45 }
 0x344   :  { %v443_v47 = vpop.xlane.xlu1 %442 }
 0x345   :  { %4724 = vrsqrt.f32 %v529_v46  ;;  %v451_v49 = vmul.f32 0.015625, %v443_v47 }
 0x346   :  { %v520_v50 = vpop.xlane.xlu0 %519 }
 0x347   :  { %v526_v51 = vmul.f32 0.015625, %v520_v50  ;;  %v455_v53 = vadd.f32 1e-05, %v451_v49 }
 0x349   :  { %v530_v54 = vadd.f32 1e-05, %v526_v51 }
 0x34a   :  { %v523_v55 = vpop.xlane.xlu0 %522 }
 0x34b   :  { %4726 = vrsqrt.f32 %v530_v54  ;;  %v527_v57 = vmul.f32 0.015625, %v523_v55 }
 0x34c   :  { %4728 = vrsqrt.f32 %v455_v53  ;;  %v449_v58 = vpop.xlane.xlu1 %448 }
 0x34d   :  { %v4723_v59 = vpop.eup %4722  ;;  %v531_v60 = vadd.f32 1e-05, %v527_v57  ;;  %v453_v62 = vmul.f32 0.015625, %v449_v58 }
 0x34e   :  { %v440_v0 = vpop.xlane.xlu0 %439  ;;  %v536_v1 = vmul.f32 %v4723_v59, %v5237_v38  ;;  %v5345_v59 = vld [vmem:[%s6389_s7] ss:$0 sm:$0xff] }
 0x34f   :  { %v4725_v3 = vpop.eup %4724  ;;  %4730 = vrsqrt.f32 %v531_v60  ;;  %v457_v4 = vadd.f32 1e-05, %v453_v62  ;;  %v450_v6 = vmul.f32 0.015625, %v440_v0 }
 0x350   :  { %v941_v7 = vpop.xlane.xlu1 %940  ;;  %v537_v8 = vmul.f32 %v4725_v3, %v5240_v41  ;;  %v546_v9 = vmul.f32 %v5295_v63, %v536_v1 }
 0x351   :  { %4732 = vrsqrt.f32 %v457_v4  ;;  %v454_v10 = vadd.f32 1e-05, %v450_v6  ;;  %v949_v11 = vmul.f32 0.015625, %v941_v7 }
 0x352   :  { %v446_v16 = vpop.xlane.xlu0 %445  ;;  %v547_v38 = vmul.f32 %v5295_v63, %v537_v8  ;;  %v556_v41 = vadd.f32 %v5303_v12, %v546_v9 }
 0x353   :  { %4734 = vrsqrt.f32 %v454_v10  ;;  %v5307_v18 = vsub.f32 %v5188_v17, %v949_v11  ;;  %v452_v19 = vmul.f32 0.015625, %v446_v16 }
 0x354   :  { %v947_v20 = vpop.xlane.xlu1 %946  ;;  %v557_v21 = vadd.f32 %v5303_v12, %v547_v38 }
 0x355   :  { %v4727_v23 = vpop.eup %4726  ;;  %v456_v26 = vadd.f32 1e-05, %v452_v19  ;;  %v957_v29 = vmul.f32 %v5307_v18, %v5307_v18  ;;  %v951_v37 = vmul.f32 0.015625, %v947_v20 }
 0x356   :  { %v4729_v31 = vpop.eup %4728  ;;  %v938_v32 = vpop.xlane.xlu0 %937  ;;  %v562_v33 = vpack.c.bf16 %v557_v21, %v556_v41  ;;  %v538_v34 = vmul.f32 %v4727_v23, %v5252_v52  ;;  %v5324_v52 = vld [vmem:[%s6388_s6] ss:$0 sm:$0xff] }
 0x357   :  { %4736 = vrsqrt.f32 %v456_v26  ;;  %v948_v35 = vmul.f32 0.015625, %v938_v32  ;;  %966 = vrot.lane.b32.xlu1 %v957_v29, %s4979_s26  ;;  %v463_v42 = vmul.f32 %v4729_v31, %v5248_v48  ;;  %v5332_v48 = vsub.f32 %v5208_v30, %v951_v37 }
 0x358   :  { %4493 = vmatprep.subr.msk.bf16.mxu0 %vm412_vm0, %v562_v33  ;;  %v571_v17 = vsel %vm412_vm0, %v562_v33, 0  ;;  %v843_v43 = vpop.xlane.xlu1 %842  ;;  %v548_v46 = vmul.f32 %v5295_v63, %v538_v34 }
 0x359   :  { %v4731_v36 = vpop.eup %4730  ;;  %v5318_v40 = vsub.f32 %v5182_v14, %v948_v35  ;;  %4346 = vmatpush3.bf16.xpose.msra.mxu0 %v571_v17  ;;  %v959_v6 = vmul.f32 %v5332_v48, %v5332_v48 }
 0x35a   :  { %v944_v44 = vpop.xlane.xlu0 %943  ;;  %v539_v45 = vmul.f32 %v4731_v36, %v5257_v56  ;;  %v473_v56 = vmul.f32 %v5324_v52, %v463_v42  ;;  %v558_v57 = vadd.f32 %v5303_v12, %v548_v46 }
 0x35b   :  { %v4733_v47 = vpop.eup %4732  ;;  %v950_v49 = vmul.f32 0.015625, %v944_v44  ;;  %v956_v14 = vmul.f32 %v5318_v40, %v5318_v40 }
 0x35c   :  { %v549_v50 = vmul.f32 %v5295_v63, %v539_v45  ;;  %v465_v54 = vmul.f32 %v4733_v47, %v5269_v2  ;;  %v849_v0 = vpop.xlane.xlu1 %848 }
 0x35d   :  { %v4735_v51 = vpop.eup %4734  ;;  %v5335_v53 = vsub.f32 %v5200_v27, %v950_v49  ;;  %964 = vrot.lane.b32.xlu0 %v956_v14, %s4979_s26  ;;  %v851_v27 = vmul.f32 0.015625, %v843_v43  ;;  %v853_v16 = vmul.f32 0.015625, %v849_v0 }
 0x35e   :  { %v840_v55 = vpop.xlane.xlu0 %839  ;;  %v559_v58 = vadd.f32 %v5303_v12, %v549_v50  ;;  %v462_v30 = vmul.f32 %v4735_v51, %v5263_v61  ;;  %v483_v61 = vadd.f32 %v5345_v59, %v473_v56  ;;  %v475_v7 = vmul.f32 %v5324_v52, %v465_v54 }
 0x35f   :  { %v850_v60 = vmul.f32 0.015625, %v840_v55  ;;  %v958_v62 = vmul.f32 %v5335_v53, %v5335_v53  ;;  %v5378_v23 = vsub.f32 %v5202_v28, %v853_v16 }
 0x360   :  { %v563_v1 = vpack.c.bf16 %v559_v58, %v558_v57  ;;  %v472_v2 = vmul.f32 %v5324_v52, %v462_v30  ;;  %v485_v21 = vadd.f32 %v5345_v59, %v475_v7 }
 0x361   :  { %v4737_v3 = vpop.eup %4736  ;;  %v5352_v4 = vsub.f32 %v5180_v13, %v850_v60  ;;  %968 = vrot.lane.b32.xlu1 %v958_v62, %s4979_s26  ;;  %v5364_v13 = vsub.f32 %v5184_v15, %v851_v27  ;;  %v861_v31 = vmul.f32 %v5378_v23, %v5378_v23 }
 0x362   :  { %v464_v8 = vmul.f32 %v4737_v3, %v5272_v5  ;;  %4494 = vmatprep.subr.msk.bf16.mxu0 %vm412_vm0, %v563_v1  ;;  %v846_v9 = vpop.xlane.xlu0 %845  ;;  %v574_v10 = vsel %vm412_vm0, %v563_v1, 0  ;;  %v482_v11 = vadd.f32 %v5345_v59, %v472_v2 }
 0x363   :  { %v852_v38 = vmul.f32 0.015625, %v846_v9  ;;  %4348 = vmatpush3.bf16.xpose.msra.mxu0 %v574_v10  ;;  %v858_v19 = vmul.f32 %v5352_v4, %v5352_v4  ;;  %v859_v26 = vmul.f32 %v5364_v13, %v5364_v13 }
 0x364   :  { %v474_v20 = vmul.f32 %v5324_v52, %v464_v8  ;;  %v560_v41 = vpack.c.bf16 %v483_v61, %v482_v11 }
 0x365   :  { %v5370_v5 = vsub.f32 %v5196_v25, %v852_v38  ;;  %970 = vrot.lane.b32.xlu1 %v959_v6, %s4979_s26  ;;  %866 = vrot.lane.b32.xlu0 %v858_v19, %s4979_s26 }
 0x366   :  { %4349 = vmatprep.mubr.msk.bf16.mxu0 %vm412_vm0, %v560_v41  ;;  %v484_v15 = vadd.f32 %v5345_v59, %v474_v20 }
 0x367   :  { %v860_v25 = vmul.f32 %v5370_v5, %v5370_v5 }
 0x368   :  { %v561_v29 = vpack.c.bf16 %v485_v21, %v484_v15 }
 0x369   :  { %868 = vrot.lane.b32.xlu1 %v859_v26, %s4979_s26  ;;  %870 = vrot.lane.b32.xlu0 %v860_v25, %s4979_s26 }
 0x36a   :  { %4350 = vmatmul.mubr.msk.bf16.vlgmr.msra.gmra.mrb[8].mxu0 %vm412_vm0, %v561_v29 }
 0x36d   :  { %872 = vrot.lane.b32.xlu1 %v861_v31, %s4979_s26 }
 0x3c9   :  { %v967_v28 = vpop.permute.xlu1 %966 }
 0x3ca   :  { %v979_v44 = vsel %vm412_vm0, %v967_v28, 0.0 }
 0x3cf   :  { %v965_v32 = vpop.permute.xlu0 %964 }
 0x3d0   :  { %v976_v42 = vsel %vm412_vm0, %v965_v32, 0.0 }
 0x3d3   :  { %v969_v33 = vpop.permute.xlu1 %968 }
 0x3d4   :  { %v982_v49 = vsel %vm412_vm0, %v969_v33, 0.0 }
 0x3d7   :  { %v971_v34 = vpop.permute.xlu1 %970  ;;  %v867_v35 = vpop.permute.xlu0 %866 }
 0x3d8   :  { %v878_v17 = vsel %vm412_vm0, %v867_v35, 0.0  ;;  %v985_v14 = vsel %vm412_vm0, %v971_v34, 0.0 }
 0x3d9   :  { %879 = vadd.xlane.f32.xlu0 %v878_v17 }
 0x3db   :  { %v869_v36 = vpop.permute.xlu1 %868  ;;  %v871_v43 = vpop.permute.xlu0 %870 }
 0x3dc   :  { %v881_v37 = vsel %vm412_vm0, %v869_v36, 0.0  ;;  %v884_v45 = vsel %vm412_vm0, %v871_v43, 0.0 }
 0x3dd   :  { %882 = vadd.xlane.f32.xlu1 %v881_v37  ;;  %977 = vadd.xlane.f32.xlu0 %v976_v42 }
 0x3df   :  { %v873_v46 = vpop.permute.xlu1 %872 }
 0x3e0   :  { %v887_v47 = vsel %vm412_vm0, %v873_v46, 0.0 }
 0x3e1   :  { %980 = vadd.xlane.f32.xlu1 %v979_v44  ;;  %885 = vadd.xlane.f32.xlu0 %v884_v45 }
 0x3e5   :  { %888 = vadd.xlane.f32.xlu1 %v887_v47  ;;  %983 = vadd.xlane.f32.xlu0 %v982_v49 }
 0x3e9   :  { %986 = vadd.xlane.f32.xlu0 %v985_v14 }
 0x3f6   :  { %1011 = vrot.lane.b32.xlu1 %v5303_v12, %s4979_s26 }
 0x3fa   :  { %906 = vrot.lane.b32.xlu1 %v5324_v52, %s4979_s26 }
 0x3fe   :  { %913 = vrot.lane.b32.xlu1 %v5345_v59, %s4979_s26 }
 0x3ff   :  { %1004 = vrot.lane.b32.xlu0 %v5295_v63, %s4979_s26 }
 0x43d   :  { %v5406_v50 = vpop.f32.mrb[8].mxu0 }
 0x43e   :  { %v5408_v51 = vpop.f32.mrb[9].mxu0 }
 0x43f   :  { %v5410_v56 = vpop.f32.mrb[10].mxu0 }
 0x440   :  { %v5412_v54 = vpop.f32.mrb[11].mxu0 }
 0x466   :  { %v880_v55 = vpop.xlane.xlu0 %879 }
 0x467   :  { %v890_v57 = vmul.f32 0.015625, %v880_v55 }
 0x469   :  { %v894_v59 = vadd.f32 1e-05, %v890_v57 }
 0x46a   :  { %v883_v12 = vpop.xlane.xlu1 %882  ;;  %v978_v58 = vpop.xlane.xlu0 %977 }
 0x46b   :  { %v891_v30 = vmul.f32 0.015625, %v883_v12  ;;  %v988_v52 = vmul.f32 0.015625, %v978_v58 }
 0x46d   :  { %v895_v27 = vadd.f32 1e-05, %v891_v30  ;;  %v992_v60 = vadd.f32 1e-05, %v988_v52 }
 0x46e   :  { %v981_v62 = vpop.xlane.xlu1 %980  ;;  %v886_v0 = vpop.xlane.xlu0 %885 }
 0x46f   :  { %4738 = vrsqrt.f32 %v895_v27  ;;  %v989_v63 = vmul.f32 0.015625, %v981_v62  ;;  %v892_v2 = vmul.f32 0.015625, %v886_v0  ;;  %v627_v62 = vmul.f32 0.125, %v5406_v50 }
 0x470   :  { %4740 = vrsqrt.f32 %v992_v60 }
 0x471   :  { %v993_v1 = vadd.f32 1e-05, %v989_v63  ;;  %4742 = vrsqrt.f32 %v894_v59  ;;  %v896_v8 = vadd.f32 1e-05, %v892_v2  ;;  %v5437_v63 = vld [vmem:[%s6383_s1 + $0x10] sm:$0xff] }
 0x472   :  { %v889_v3 = vpop.xlane.xlu1 %888  ;;  %v984_v6 = vpop.xlane.xlu0 %983 }
 0x473   :  { %4744 = vrsqrt.f32 %v993_v1  ;;  %v893_v61 = vmul.f32 0.015625, %v889_v3  ;;  %v990_v7 = vmul.f32 0.015625, %v984_v6  ;;  %v628_v1 = vmul.f32 0.125, %v5410_v56  ;;  %v5445_v3 = vld [vmem:[%s6383_s1 + $0x18] sm:$0xff]  ;;  %v60_v56 = vld [vmem:[%s6383_s1 + $0x8] sm:$0xff] }
 0x475   :  { %v897_v9 = vadd.f32 1e-05, %v893_v61  ;;  %v994_v10 = vadd.f32 1e-05, %v990_v7  ;;  %v632_v6 = vadd.f32 %v628_v1, %v5445_v3  ;;  %v626_v61 = vmul.f32 0.125, %v5412_v54 }
 0x476   :  { %v1012_v11 = vpop.permute.xlu1 %1011  ;;  %v987_v16 = vpop.xlane.xlu0 %986 }
 0x477   :  { %4746 = vrsqrt.f32 %v897_v9  ;;  %v991_v38 = vmul.f32 0.015625, %v987_v16  ;;  %v643_v7 = vsel %vm633_vm1, %v632_v6, -inf }
 0x478   :  { %4748 = vrsqrt.f32 %v994_v10 }
 0x479   :  { %v4739_v19 = vpop.eup %4738  ;;  %4750 = vrsqrt.f32 %v896_v8  ;;  %v995_v20 = vadd.f32 1e-05, %v991_v38  ;;  %v630_v8 = vadd.f32 %v626_v61, %v60_v56  ;;  %v4538_v61 = vld [vmem:[%s6393_s11] sm:$0xff]  }
 0x47a   :  { %v4741_v41 = vpop.eup %4740  ;;  %v907_v15 = vpop.permute.xlu1 %906  ;;  %v903_v29 = vmul.f32 %v4739_v19, %v5364_v13  ;;  %4361 = vmatprep.subr.bf16.mxu1 %v4538_v61 }
 0x47b   :  { %4752 = vrsqrt.f32 %v995_v20  ;;  %v1005_v21 = vpop.permute.xlu0 %1004  ;;  %v1000_v26 = vmul.f32 %v4741_v41, %v5318_v40  ;;  %v4743_v25 = vpop.eup %4742  ;;  %v637_v9 = vsel %vm633_vm1, %v630_v8, -inf }
 0x47c   :  { %v902_v34 = vmul.f32 %v4743_v25, %v5352_v4  ;;  %v910_v35 = vmul.f32 %v907_v15, %v903_v29 }
 0x47d   :  { %v4745_v31 = vpop.eup %4744  ;;  %v1007_v32 = vmul.f32 %v1005_v21, %v1000_v26 }
 0x47e   :  { %v1001_v28 = vmul.f32 %v4745_v31, %v5307_v18  ;;  %v914_v36 = vpop.permute.xlu1 %913  ;;  %v909_v44 = vmul.f32 %v907_v15, %v902_v34 }
 0x47f   :  { %v1014_v42 = vadd.f32 %v1012_v11, %v1007_v32  ;;  %v917_v13 = vadd.f32 %v914_v36, %v910_v35 }
 0x480   :  { %v1008_v33 = vmul.f32 %v1005_v21, %v1001_v28  ;;  %v916_v47 = vadd.f32 %v914_v36, %v909_v44 }
 0x481   :  { %v4747_v17 = vpop.eup %4746 }
 0x482   :  { %v4749_v37 = vpop.eup %4748  ;;  %v1015_v43 = vadd.f32 %v1012_v11, %v1008_v33  ;;  %v905_v49 = vmul.f32 %v4747_v17, %v5378_v23  ;;  %v1018_v57 = vpack.c.bf16 %v917_v13, %v916_v47 }
 0x483   :  { %v4751_v45 = vpop.eup %4750  ;;  %v1002_v40 = vmul.f32 %v4749_v37, %v5335_v53 }
 0x484   :  { %v1020_v46 = vpack.c.bf16 %v1015_v43, %v1014_v42  ;;  %v904_v55 = vmul.f32 %v4751_v45, %v5370_v5  ;;  %v912_v58 = vmul.f32 %v907_v15, %v905_v49  ;;  %v5430_v5 = vld [vmem:[%s6383_s1] sm:$0xff] }
 0x485   :  { %v4753_v18 = vpop.eup %4752  ;;  %v1009_v14 = vmul.f32 %v1005_v21, %v1002_v40 }
 0x486   :  { %1030 = vrot.lane.b32.xlu0 %v1020_v46, %s4979_s26  ;;  %v1003_v4 = vmul.f32 %v4753_v18, %v5332_v48  ;;  %v911_v52 = vmul.f32 %v907_v15, %v904_v55  ;;  %v919_v60 = vadd.f32 %v914_v36, %v912_v58  ;;  %v625_v48 = vmul.f32 0.125, %v5408_v51 }
 0x487   :  { %v1016_v30 = vadd.f32 %v1012_v11, %v1009_v14  ;;  %v631_v51 = vadd.f32 %v627_v62, %v5437_v63 }
 0x488   :  { %v1010_v12 = vmul.f32 %v1005_v21, %v1003_v4  ;;  %v918_v23 = vadd.f32 %v914_v36, %v911_v52  ;;  %v629_v0 = vadd.f32 %v625_v48, %v5430_v5 }
 0x489   :  { %v640_v50 = vsel %vm633_vm1, %v631_v51, -inf }
 0x48a   :  { %1024 = vrot.lane.b32.xlu0 %v1018_v57, %s4979_s26  ;;  %v1017_v53 = vadd.f32 %v1012_v11, %v1010_v12  ;;  %v1019_v59 = vpack.c.bf16 %v919_v60, %v918_v23  ;;  %v634_v2 = vsel %vm633_vm1, %v629_v0, -inf }
 0x48c   :  { %v1021_v27 = vpack.c.bf16 %v1017_v53, %v1016_v30 }
 0x48e   :  { %1032 = vrot.lane.b32.xlu1 %v1021_v27, %s4979_s26 }
 0x492   :  { %1026 = vrot.lane.b32.xlu1 %v1019_v59, %s4979_s26 }
 0x4a9   :  { %635 = vmax.xlane.f32.xlu0 %v634_v2 }
 0x4ad   :  { %641 = vmax.xlane.f32.xlu0 %v640_v50 }
 0x4b1   :  { %644 = vmax.xlane.f32.xlu0 %v643_v7  ;;  %v4540_v7 = vld [vmem:[%s6393_s11 + $0x10] sm:$0xff]  }
 0x4b6   :  { %638 = vmax.xlane.f32.xlu1 %v637_v9 }
 0x4f8   :  { %v1031_v10 = vpop.permute.xlu0 %1030 }
 0x4f9   :  { %4495 = vmatprep.subr.msk.bf16.mxu0 %vm412_vm0, %v1031_v10  ;;  %v1041_v11 = vsel %vm412_vm0, %v1031_v10, 0 }
 0x4fa   :  { %4374 = vmatpush3.bf16.xpose.msra.mxu0 %v1041_v11 }
 0x4fc   :  { %v1025_v16 = vpop.permute.xlu0 %1024 }
 0x4fd   :  { %4377 = vmatprep.mubr.msk.bf16.mxu0 %vm412_vm0, %v1025_v16 }
 0x500   :  { %v1033_v54 = vpop.permute.xlu1 %1032 }
 0x501   :  { %4496 = vmatprep.subr.msk.bf16.mxu0 %vm412_vm0, %v1033_v54  ;;  %v1044_v38 = vsel %vm412_vm0, %v1033_v54, 0 }
 0x502   :  { %4376 = vmatpush3.bf16.xpose.msra.mxu0 %v1044_v38 }
 0x504   :  { %v1027_v19 = vpop.permute.xlu1 %1026 }
 0x509   :  { %4378 = vmatmul.mubr.msk.bf16.vlgmr.msra.gmra.mrb[12].mxu0 %vm412_vm0, %v1027_v19 }
 0x50a   :  { %1589 = vmatprep.mubr.bf16.mxu0 %v4978_v39 }
 0x536   :  { %v636_v20 = vpop.xlane.xlu0 %635 }
 0x537   :  { %v646_v41 = vsub.f32 %v629_v0, %v636_v20 }
 0x539   :  { %v650_v15 = vmul.f32 1.442695, %v646_v41 }
 0x53a   :  { %v642_v21 = vpop.xlane.xlu0 %641 }
 0x53b   :  { %4754 = vpow2.f32 %v650_v15  ;;  %v648_v26 = vsub.f32 %v631_v51, %v642_v21 }
 0x53d   :  { %v654_v25 = vmul.f32 1.442695, %v648_v26 }
 0x53e   :  { %v645_v29 = vpop.xlane.xlu0 %644 }
 0x53f   :  { %4756 = vpow2.f32 %v654_v25  ;;  %v649_v31 = vsub.f32 %v632_v6, %v645_v29 }
 0x541   :  { %v656_v34 = vmul.f32 1.442695, %v649_v31 }
 0x543   :  { %v639_v28 = vpop.xlane.xlu1 %638 }
 0x544   :  { %v647_v32 = vsub.f32 %v630_v8, %v639_v28  ;;  %v4541_v8 = vld [vmem:[%s6393_s11 + $0x18] sm:$0xff]  }
 0x545   :  { %v4755_v33 = vpop.eup %4754 }
 0x546   :  { %v652_v35 = vmul.f32 1.442695, %v647_v32  ;;  %v658_v17 = vsel %vm633_vm1, %v4755_v33, 0.0 }
 0x547   :  { %659 = vadd.xlane.f32.xlu0 %v658_v17 }
 0x548   :  { %4758 = vpow2.f32 %v652_v35 }
 0x549   :  { %v4757_v36 = vpop.eup %4756  ;;  %4760 = vpow2.f32 %v656_v34 }
 0x54a   :  { %v664_v37 = vsel %vm633_vm1, %v4757_v36, 0.0 }
 0x54b   :  { %665 = vadd.xlane.f32.xlu0 %v664_v37 }
 0x552   :  { %v4759_v42 = vpop.eup %4758 }
 0x553   :  { %v661_v43 = vsel %vm633_vm1, %v4759_v42, 0.0  ;;  %v4761_v44 = vpop.eup %4760 }
 0x554   :  { %662 = vadd.xlane.f32.xlu1 %v661_v43  ;;  %v667_v45 = vsel %vm633_vm1, %v4761_v44, 0.0 }
 0x558   :  { %668 = vadd.xlane.f32.xlu1 %v667_v45 }
 0x5d4   :  { %v660_v40 = vpop.xlane.xlu0 %659 }
 0x5d5   :  { %4762 = vrcp.f32 %v660_v40 }
 0x5d8   :  { %v666_v12 = vpop.xlane.xlu0 %665 }
 0x5dc   :  { %v4379_v46 = vpop.f32.mrb[12].mxu0 }
 0x5dd   :  { %v1080_v47 = vpop.f32.mrb[13].mxu0  ;;  %v1097_v13 = vmul.f32 0.125, %v4379_v46 }
 0x5de   :  { %v1095_v49 = vmul.f32 0.125, %v1080_v47  ;;  %v4380_v18 = vpop.f32.mrb[14].mxu0 }
 0x5df   :  { %v1083_v4 = vpop.f32.mrb[15].mxu0  ;;  %v1098_v14 = vmul.f32 0.125, %v4380_v18  ;;  %v1101_v52 = vadd.f32 %v1097_v13, %v5437_v63  ;;  %v4542_v13 = vld [vmem:[%s6393_s11 + $0x20] sm:$0xff]  }
 0x5e0   :  { %v1096_v55 = vmul.f32 0.125, %v1083_v4  ;;  %v1099_v57 = vadd.f32 %v1095_v49, %v5430_v5  ;;  %v4763_v5 = vpop.eup %4762 }
 0x5e1   :  { %v663_v58 = vpop.xlane.xlu1 %662  ;;  %v1102_v60 = vadd.f32 %v1098_v14, %v5445_v3  ;;  %v1109_v59 = vsel %vm633_vm1, %v1101_v52, -inf  ;;  %v674_v0 = vmul.f32 %v4763_v5, %v4755_v33 }
 0x5e2   :  { %4764 = vrcp.f32 %v663_v58  ;;  %v1103_v30 = vsel %vm633_vm1, %v1099_v57, -inf  ;;  %v1100_v53 = vadd.f32 %v1096_v55, %v60_v56  ;;  %v4539_v56 = vld [vmem:[%s6393_s11 + $0x8] sm:$0xff]  }
 0x5e3   :  { %1104 = vmax.xlane.f32.xlu0 %v1103_v30  ;;  %4766 = vrcp.f32 %v666_v12  ;;  %v1112_v48 = vsel %vm633_vm1, %v1102_v60, -inf }
 0x5e4   :  { %v1106_v27 = vsel %vm633_vm1, %v1100_v53, -inf }
 0x5e5   :  { %1107 = vmax.xlane.f32.xlu1 %v1106_v27  ;;  %v669_v23 = vpop.xlane.xlu1 %668  ;;  %v4544_v27 = vld [vmem:[%s6393_s11 + $0x30] sm:$0xff]  }
 0x5e6   :  { %4768 = vrcp.f32 %v669_v23 }
 0x5e7   :  { %1110 = vmax.xlane.f32.xlu0 %v1109_v59 }
 0x5e9   :  { %1113 = vmax.xlane.f32.xlu1 %v1112_v48 }
 0x5ec   :  { %v4765_v62 = vpop.eup %4764 }
 0x5ed   :  { %v675_v1 = vmul.f32 %v4765_v62, %v4759_v42  ;;  %v4767_v63 = vpop.eup %4766 }
 0x5ee   :  { %v676_v50 = vmul.f32 %v4767_v63, %v4757_v36 }
 0x5ef   :  { %v678_v2 = vpack.c.bf16 %v675_v1, %v674_v0 }
 0x5f0   :  { %v4769_v51 = vpop.eup %4768 }
 0x5f1   :  { %v677_v6 = vmul.f32 %v4769_v51, %v4761_v44  ;;  %4357 = vmatprep.mubr.msk.bf16.mxu1 %vm633_vm1, %v678_v2  ;;  %v4946_v2 = vld [vmem:[%s6401_s23] sm:$0xff] }
 0x5f3   :  { %v679_v3 = vpack.c.bf16 %v677_v6, %v676_v50 }
 0x5f5   :  { %4358 = vmatmul.mubr.msk.bf16.vlgmr.msra.gmra.mrb[4].mxu1 %vm633_vm1, %v679_v3  ;;  %v4947_v3 = vld [vmem:[%s6401_s23 + $0x8] sm:$0xff] }
 0x5f6   :  { %4362 = vmatpush3.bf16.msra.mxu1 %v4538_v61 }
 0x5f7   :  { %4363 = vmatprep.subr.bf16.mxu1 %v4539_v56 }
 0x5fa   :  { %4364 = vmatpush3.bf16.msra.mxu1 %v4539_v56  ;;  %v4948_v56 = vld [vmem:[%s6401_s23 + $0x18] sm:$0xff] }
 0x5fb   :  { %4365 = vmatprep.subr.bf16.mxu1 %v4540_v7 }
 0x5fe   :  { %4366 = vmatpush3.bf16.msra.mxu1 %v4540_v7 }
 0x5ff   :  { %4367 = vmatprep.subr.bf16.mxu1 %v4541_v8 }
 0x602   :  { %4368 = vmatpush3.bf16.msra.mxu1 %v4541_v8  ;;  %v4949_v8 = vld [vmem:[%s6401_s23 + $0x10] sm:$0xff] }
 0x670   :  { %v1105_v9 = vpop.xlane.xlu0 %1104 }
 0x671   :  { %v1115_v10 = vsub.f32 %v1099_v57, %v1105_v9 }
 0x672   :  { %v1108_v11 = vpop.xlane.xlu1 %1107 }
 0x673   :  { %v1116_v54 = vsub.f32 %v1100_v53, %v1108_v11  ;;  %v1119_v19 = vmul.f32 1.442695, %v1115_v10  ;;  %v4546_v10 = vld [vmem:[%s6394_s12] ss:$16 sps:$4 sm:$0xff]   ;;  %v4548_v11 = vld [vmem:[%s6394_s12 + $0x4] ss:$16 sps:$4 sm:$0xff]  }
 0x674   :  { %v1111_v16 = vpop.xlane.xlu0 %1110  ;;  %1557 = vmatprep.subr.bf16.mxu0 %v4548_v11 }
 0x675   :  { %v1117_v38 = vsub.f32 %v1101_v52, %v1111_v16  ;;  %v1121_v21 = vmul.f32 1.442695, %v1116_v54  ;;  %v4543_v52 = vld [vmem:[%s6393_s11 + $0x28] sm:$0xff]   ;;  %1558 = vmatpush1.bf16.msra.mxu0 %v4546_v10 }
 0x676   :  { %v1114_v20 = vpop.xlane.xlu1 %1113  ;;  %v4549_v16 = vld [vmem:[%s6394_s12 + $0x8] ss:$16 sps:$4 sm:$0xff]   ;;  %v4551_v54 = vld [vmem:[%s6394_s12 + $0xc] ss:$16 sps:$4 sm:$0xff]  }
 0x677   :  { %v1123_v41 = vmul.f32 1.442695, %v1117_v38  ;;  %v1118_v15 = vsub.f32 %v1102_v60, %v1114_v20  ;;  %v4545_v60 = vld [vmem:[%s6393_s11 + $0x38] sm:$0xff]   ;;  %v4554_v38 = vld [vmem:[%s6394_s12 + $0x24] ss:$16 sps:$4 sm:$0xff]  }
 0x678   :  { %v4552_v20 = vld [vmem:[%s6394_s12 + $0x20] ss:$16 sps:$4 sm:$0xff]   ;;  %1559 = vmatprep.subr.bf16.mxu0 %v4554_v38 }
 0x679   :  { %4770 = vpow2.f32 %v1123_v41  ;;  %v1125_v26 = vmul.f32 1.442695, %v1118_v15  ;;  %v4555_v41 = vld [vmem:[%s6394_s12 + $0x28] ss:$16 sps:$4 sm:$0xff]   ;;  %1560 = vmatpush1.bf16.msra.mxu0 %v4552_v20 }
 0x67a   :  { %4772 = vpow2.f32 %v1119_v19  ;;  %v4557_v19 = vld [vmem:[%s6394_s12 + $0x2c] ss:$16 sps:$4 sm:$0xff]  }
 0x67b   :  { %4774 = vpow2.f32 %v1125_v26 }
 0x67c   :  { %4776 = vpow2.f32 %v1121_v21 }
 0x683   :  { %v4771_v25 = vpop.eup %4770 }
 0x684   :  { %v4773_v29 = vpop.eup %4772  ;;  %v1133_v31 = vsel %vm633_vm1, %v4771_v25, 0.0 }
 0x685   :  { %v4775_v28 = vpop.eup %4774  ;;  %1134 = vadd.xlane.f32.xlu0 %v1133_v31  ;;  %v1127_v34 = vsel %vm633_vm1, %v4773_v29, 0.0 }
 0x686   :  { %v1136_v32 = vsel %vm633_vm1, %v4775_v28, 0.0  ;;  %v4777_v33 = vpop.eup %4776 }
 0x687   :  { %1137 = vadd.xlane.f32.xlu1 %v1136_v32  ;;  %v1130_v35 = vsel %vm633_vm1, %v4777_v33, 0.0 }
 0x689   :  { %1128 = vadd.xlane.f32.xlu0 %v1127_v34 }
 0x68b   :  { %1131 = vadd.xlane.f32.xlu1 %v1130_v35 }
 0x69c   :  { %1153 = vrot.lane.b32.xlu1 %v5192_v22, %s4979_s26 }
 0x69f   :  { %1151 = vrot.lane.b32.xlu0 %v5194_v24, %s4979_s26 }
 0x6c8   :  { %v4359_v17 = vpop.f32.mrb[4].mxu1 }
 0x6c9   :  { %v722_v36 = vpop.f32.mrb[5].mxu1 }
 0x6ca   :  { %v4360_v37 = vpop.f32.mrb[6].mxu1 }
 0x6cb   :  { %v738_v42 = vpack.c.bf16 %v4360_v37, %v4359_v17  ;;  %v725_v43 = vpop.f32.mrb[7].mxu1 }
 0x6cc   :  { %v737_v44 = vpack.c.bf16 %v725_v43, %v722_v36 }
 0x6ce   :  { %4369 = vmatprep.mubr.msk.bf16.mxu1 %vm412_vm0, %v737_v44  ;;  %v4560_v44 = vld [vmem:[%s6394_s12 + $0x44] ss:$16 sps:$4 sm:$0xff]  }
 0x6cf   :  { %4370 = vmatmul.mubr.msk.bf16.vlgmr.msra.gmra.mrb[8].mxu1 %vm412_vm0, %v738_v42  ;;  %1561 = vmatprep.subr.bf16.mxu0 %v4560_v44  ;;  %v4597_v44 = vld [vmem:[%s6395_s13 + $0x8] sm:$0xff]  }
 0x712   :  { %v1135_v45 = vpop.xlane.xlu0 %1134 }
 0x714   :  { %v1138_v40 = vpop.xlane.xlu1 %1137 }
 0x715   :  { %4778 = vrcp.f32 %v1138_v40  ;;  %v4558_v40 = vld [vmem:[%s6394_s12 + $0x40] ss:$16 sps:$4 sm:$0xff]  }
 0x716   :  { %v1129_v46 = vpop.xlane.xlu0 %1128  ;;  %1562 = vmatpush1.bf16.msra.mxu0 %v4558_v40  ;;  %v4599_v40 = vld [vmem:[%s6395_s13 + $0x10] sm:$0xff]  }
 0x717   :  { %4780 = vrcp.f32 %v1129_v46  ;;  %v4561_v46 = vld [vmem:[%s6394_s12 + $0x48] ss:$16 sps:$4 sm:$0xff]  }
 0x718   :  { %4782 = vrcp.f32 %v1135_v45  ;;  %v1132_v22 = vpop.xlane.xlu1 %1131  ;;  %v4563_v45 = vld [vmem:[%s6394_s12 + $0x4c] ss:$16 sps:$4 sm:$0xff]  }
 0x719   :  { %4784 = vrcp.f32 %v1132_v22  ;;  %v4566_v22 = vld [vmem:[%s6394_s12 + $0x64] ss:$16 sps:$4 sm:$0xff]  }
 0x71a   :  { %v1152_v47 = vpop.permute.xlu0 %1151  ;;  %1563 = vmatprep.subr.bf16.mxu0 %v4566_v22  ;;  %v4601_v22 = vld [vmem:[%s6395_s13 + $0x18] sm:$0xff]  }
 0x71b   :  { %4381 = vmatprep.subr.bf16.mxu1 %v1152_v47 }
 0x71c   :  { %v1154_v24 = vpop.permute.xlu1 %1153  ;;  %4382 = vmatpush3.bf16.msra.mxu1 %v1152_v47  ;;  %v4569_v47 = vld [vmem:[%s6394_s12 + $0x6c] ss:$16 sps:$4 sm:$0xff]  }
 0x71d   :  { %4383 = vmatprep.subr.bf16.mxu1 %v1154_v24 }
 0x71f   :  { %v4779_v49 = vpop.eup %4778 }
 0x720   :  { %4384 = vmatpush3.bf16.msra.mxu1 %v1154_v24  ;;  %v1146_v55 = vmul.f32 %v4779_v49, %v4775_v28  ;;  %v4564_v24 = vld [vmem:[%s6394_s12 + $0x60] ss:$16 sps:$4 sm:$0xff]   ;;  %v4572_v49 = vld [vmem:[%s6394_s12 + $0x84] ss:$16 sps:$4 sm:$0xff]  }
 0x721   :  { %v4781_v18 = vpop.eup %4780  ;;  %4389 = vmatprep.subr.bf16.mxu1 %v4542_v13  ;;  %1564 = vmatpush1.bf16.msra.mxu0 %v4564_v24  ;;  %v4603_v24 = vld [vmem:[%s6395_s13 + $0x20] sm:$0xff]  }
 0x722   :  { %v4783_v4 = vpop.eup %4782  ;;  %v1143_v57 = vmul.f32 %v4781_v18, %v4773_v29  ;;  %v4575_v18 = vld [vmem:[%s6394_s12 + $0x8c] ss:$16 sps:$4 sm:$0xff]   ;;  %1565 = vmatprep.subr.bf16.mxu0 %v4572_v49 }
 0x723   :  { %v4785_v14 = vpop.eup %4784  ;;  %v1145_v58 = vmul.f32 %v4783_v4, %v4771_v25  ;;  %v4570_v4 = vld [vmem:[%s6394_s12 + $0x80] ss:$16 sps:$4 sm:$0xff]   ;;  %v4605_v49 = vld [vmem:[%s6395_s13 + $0x28] sm:$0xff]  }
 0x724   :  { %v1144_v12 = vmul.f32 %v4785_v14, %v4777_v33  ;;  %v4573_v14 = vld [vmem:[%s6394_s12 + $0x88] ss:$16 sps:$4 sm:$0xff]  }
 0x725   :  { %v1148_v53 = vpack.c.bf16 %v1146_v55, %v1145_v58  ;;  %1566 = vmatpush1.bf16.msra.mxu0 %v4570_v4  ;;  %v4576_v55 = vld [vmem:[%s6394_s12 + $0xa0] ss:$16 sps:$4 sm:$0xff]   ;;  %v4581_v58 = vld [vmem:[%s6394_s12 + $0xac] ss:$16 sps:$4 sm:$0xff]  }
 0x726   :  { %v1147_v30 = vpack.c.bf16 %v1144_v12, %v1143_v57  ;;  %v4578_v57 = vld [vmem:[%s6394_s12 + $0xa4] ss:$16 sps:$4 sm:$0xff]   ;;  %v4579_v12 = vld [vmem:[%s6394_s12 + $0xa8] ss:$16 sps:$4 sm:$0xff]  }
 0x727   :  { %1567 = vmatprep.subr.bf16.mxu0 %v4578_v57  ;;  %v4607_v4 = vld [vmem:[%s6395_s13 + $0x30] sm:$0xff]  }
 0x728   :  { %4385 = vmatprep.mubr.msk.bf16.mxu1 %vm633_vm1, %v1147_v30  ;;  %v4584_v30 = vld [vmem:[%s6394_s12 + $0xc4] ss:$16 sps:$4 sm:$0xff]  }
 0x729   :  { %4386 = vmatmul.mubr.msk.bf16.vlgmr.msra.gmra.mrb[12].mxu1 %vm633_vm1, %v1148_v53  ;;  %v4587_v53 = vld [vmem:[%s6394_s12 + $0xcc] ss:$16 sps:$4 sm:$0xff]   ;;  %1568 = vmatpush1.bf16.msra.mxu0 %v4576_v55 }
 0x72a   :  { %4390 = vmatpush3.bf16.msra.mxu1 %v4542_v13  ;;  %v4567_v13 = vld [vmem:[%s6394_s12 + $0x68] ss:$16 sps:$4 sm:$0xff]   ;;  %1569 = vmatprep.subr.bf16.mxu0 %v4584_v30 }
 0x72b   :  { %4391 = vmatprep.subr.bf16.mxu1 %v4543_v52  ;;  %v4609_v55 = vld [vmem:[%s6395_s13 + $0x38] sm:$0xff]  }
 0x72e   :  { %4392 = vmatpush3.bf16.msra.mxu1 %v4543_v52  ;;  %v4582_v52 = vld [vmem:[%s6394_s12 + $0xc0] ss:$16 sps:$4 sm:$0xff]  }
 0x72f   :  { %4393 = vmatprep.subr.bf16.mxu1 %v4544_v27  ;;  %1570 = vmatpush1.bf16.msra.mxu0 %v4582_v52 }
 0x732   :  { %4394 = vmatpush3.bf16.msra.mxu1 %v4544_v27  ;;  %v4585_v27 = vld [vmem:[%s6394_s12 + $0xc8] ss:$16 sps:$4 sm:$0xff]  }
 0x733   :  { %4395 = vmatprep.subr.bf16.mxu1 %v4545_v60 }
 0x736   :  { %4396 = vmatpush3.bf16.msra.mxu1 %v4545_v60  ;;  %v4590_v60 = vld [vmem:[%s6394_s12 + $0xe4] ss:$16 sps:$4 sm:$0xff]  }
 0x737   :  { %1610 = vmatprep.subr.bf16.mxu1 %v4551_v54  ;;  %1571 = vmatprep.subr.bf16.mxu0 %v4590_v60 }
 0x7fc   :  { %v4387_v23 = vpop.f32.mrb[12].mxu1 }
 0x7fd   :  { %v1197_v59 = vpop.f32.mrb[13].mxu1 }
 0x7fe   :  { %v4388_v48 = vpop.f32.mrb[14].mxu1 }
 0x7ff   :  { %v1213_v5 = vpack.c.bf16 %v4388_v48, %v4387_v23  ;;  %v1200_v62 = vpop.f32.mrb[15].mxu1  ;;  %v4593_v23 = vld [vmem:[%s6394_s12 + $0xec] ss:$16 sps:$4 sm:$0xff]   ;;  %v4591_v48 = vld [vmem:[%s6394_s12 + $0xe8] ss:$16 sps:$4 sm:$0xff]  }
 0x800   :  { %v1212_v0 = vpack.c.bf16 %v1200_v62, %v1197_v59  ;;  %v4588_v59 = vld [vmem:[%s6394_s12 + $0xe0] ss:$16 sps:$4 sm:$0xff]  }
 0x801   :  { %1572 = vmatpush1.bf16.msra.mxu0 %v4588_v59 }
 0x802   :  { %4397 = vmatprep.mubr.msk.bf16.mxu1 %vm412_vm0, %v1212_v0 }
 0x803   :  { %4398 = vmatmul.mubr.msk.bf16.vlgmr.msra.gmra.mrb[8].mxu1 %vm412_vm0, %v1213_v5 }
 0x804   :  { %1642 = vmatprep.mubr.bf16.mxu1 %v4978_v39  ;;  %1611 = vmatpush1.bf16.msra.mxu1 %v4549_v16  ;;  %v3905_v16 = vld [vmem:[%s6386_s4] ss:$0 sm:$0xff] }
 0x805   :  { %1612 = vmatprep.subr.bf16.mxu1 %v4557_v19 }
 0x808   :  { %1613 = vmatpush1.bf16.msra.mxu1 %v4555_v41  ;;  %v3906_v41 = vld [vmem:[%s6387_s5] ss:$0 sm:$0xff] }
 0x809   :  { %1614 = vmatprep.subr.bf16.mxu1 %v4563_v45  ;;  %v4598_v45 = vld [vmem:[%s6395_s13 + $0x50] sm:$0xff]  }
 0x80c   :  { %1615 = vmatpush1.bf16.msra.mxu1 %v4561_v46  ;;  %v4600_v46 = vld [vmem:[%s6395_s13 + $0x58] sm:$0xff]  }
 0x80d   :  { %1616 = vmatprep.subr.bf16.mxu1 %v4569_v47  ;;  %v4602_v47 = vld [vmem:[%s6395_s13 + $0x60] sm:$0xff]  }
 0x810   :  { %1617 = vmatpush1.bf16.msra.mxu1 %v4567_v13  ;;  %v4604_v13 = vld [vmem:[%s6395_s13 + $0x68] sm:$0xff]  }
 0x811   :  { %1618 = vmatprep.subr.bf16.mxu1 %v4575_v18  ;;  %v4606_v18 = vld [vmem:[%s6395_s13 + $0x70] sm:$0xff]  }
 0x814   :  { %1619 = vmatpush1.bf16.msra.mxu1 %v4573_v14  ;;  %v4608_v14 = vld [vmem:[%s6395_s13 + $0x78] sm:$0xff]  }
 0x815   :  { %1620 = vmatprep.subr.bf16.mxu1 %v4581_v58 }
 0x818   :  { %1621 = vmatpush1.bf16.msra.mxu1 %v4579_v12 }
 0x819   :  { %1622 = vmatprep.subr.bf16.mxu1 %v4587_v53 }
 0x81c   :  { %1623 = vmatpush1.bf16.msra.mxu1 %v4585_v27 }
 0x81d   :  { %1624 = vmatprep.subr.bf16.mxu1 %v4593_v23 }
 0x820   :  { %1625 = vmatpush1.bf16.msra.mxu1 %v4591_v48 }
 0x8d6   :  { %v4399_v1 = vpop.f32.mrb[8].mxu1 }
 0x8d7   :  { %v1278_v63 = vpop.f32.mrb[9].mxu1  ;;  %v5534_v9 = vadd.f32 %v4949_v8, %v4399_v1 }
 0x8d8   :  { %v5517_v51 = vadd.f32 %v4946_v2, %v1278_v63  ;;  %v4400_v50 = vpop.f32.mrb[10].mxu1 }
 0x8d9   :  { %v1281_v6 = vpop.f32.mrb[11].mxu1  ;;  %v5528_v7 = vadd.f32 %v4948_v56, %v4400_v50 }
 0x8da   :  { %v5522_v61 = vadd.f32 %v4947_v3, %v1281_v6  ;;  %1299 = vadd.xlane.f32.xlu1 %v5517_v51 }
 0x8dc   :  { %1301 = vadd.xlane.f32.xlu0 %v5522_v61 }
 0x8de   :  { %1305 = vadd.xlane.f32.xlu1 %v5528_v7 }
 0x8e0   :  { %1303 = vadd.xlane.f32.xlu0 %v5534_v9 }
 0x967   :  { %v1300_v15 = vpop.xlane.xlu1 %1299 }
 0x968   :  { %v1307_v21 = vmul.f32 0.0078125, %v1300_v15 }
 0x969   :  { %v1302_v26 = vpop.xlane.xlu0 %1301 }
 0x96a   :  { %v1308_v25 = vmul.f32 0.0078125, %v1302_v26  ;;  %v5563_v29 = vsub.f32 %v5517_v51, %v1307_v21 }
 0x96b   :  { %v1306_v31 = vpop.xlane.xlu1 %1305 }
 0x96c   :  { %v1310_v28 = vmul.f32 0.0078125, %v1306_v31  ;;  %v1315_v32 = vmul.f32 %v5563_v29, %v5563_v29  ;;  %v5568_v33 = vsub.f32 %v5522_v61, %v1308_v25 }
 0x96d   :  { %v1304_v34 = vpop.xlane.xlu0 %1303 }
 0x96e   :  { %v1309_v35 = vmul.f32 0.0078125, %v1304_v34  ;;  %1319 = vadd.xlane.f32.xlu0 %v1315_v32  ;;  %v1316_v17 = vmul.f32 %v5568_v33, %v5568_v33  ;;  %v5573_v36 = vsub.f32 %v5528_v7, %v1310_v28 }
 0x970   :  { %1321 = vadd.xlane.f32.xlu1 %v1316_v17  ;;  %v5576_v37 = vsub.f32 %v5534_v9, %v1309_v35  ;;  %v1318_v42 = vmul.f32 %v5573_v36, %v5573_v36 }
 0x972   :  { %v1317_v43 = vmul.f32 %v5576_v37, %v5576_v37 }
 0x974   :  { %1325 = vadd.xlane.f32.xlu1 %v1318_v42  ;;  %1323 = vadd.xlane.f32.xlu0 %v1317_v43  ;;  %v4596_v43 = vld [vmem:[%s6395_s13 + $0x48] sm:$0xff]  }
 0x9fb   :  { %v1320_v5 = vpop.xlane.xlu0 %1319 }
 0x9fc   :  { %v1327_v62 = vmul.f32 0.0078125, %v1320_v5 }
 0x9fd   :  { %v1322_v0 = vpop.xlane.xlu1 %1321 }
 0x9fe   :  { %v1331_v1 = vadd.f32 1e-05, %v1327_v62  ;;  %v1328_v63 = vmul.f32 0.0078125, %v1322_v0 }
 0xa00   :  { %4786 = vrsqrt.f32 %v1331_v1  ;;  %v1332_v2 = vadd.f32 1e-05, %v1328_v63 }
 0xa01   :  { %v1326_v50 = vpop.xlane.xlu1 %1325  ;;  %v1324_v6 = vpop.xlane.xlu0 %1323 }
 0xa02   :  { %4788 = vrsqrt.f32 %v1332_v2  ;;  %v1330_v3 = vmul.f32 0.0078125, %v1326_v50  ;;  %v1329_v56 = vmul.f32 0.0078125, %v1324_v6 }
 0xa04   :  { %v1334_v8 = vadd.f32 1e-05, %v1330_v3  ;;  %v1333_v10 = vadd.f32 1e-05, %v1329_v56 }
 0xa06   :  { %4790 = vrsqrt.f32 %v1334_v8 }
 0xa07   :  { %4792 = vrsqrt.f32 %v1333_v10 }
 0xa0a   :  { %v4787_v11 = vpop.eup %4786 }
 0xa0b   :  { %v1339_v54 = vmul.f32 %v4787_v11, %v5563_v29 }
 0xa0c   :  { %v4789_v38 = vpop.eup %4788 }
 0xa0d   :  { %v1340_v19 = vmul.f32 %v4789_v38, %v5568_v33  ;;  %v1349_v20 = vmul.f32 %v3905_v16, %v1339_v54 }
 0xa0f   :  { %v1350_v15 = vmul.f32 %v3905_v16, %v1340_v19  ;;  %v1359_v25 = vadd.f32 %v3906_v41, %v1349_v20 }
 0xa10   :  { %v4791_v21 = vpop.eup %4790 }
 0xa11   :  { %v4793_v26 = vpop.eup %4792  ;;  %v1360_v31 = vadd.f32 %v3906_v41, %v1350_v15  ;;  %v1342_v28 = vmul.f32 %v4791_v21, %v5573_v36  ;;  %v4594_v36 = vld [vmem:[%s6395_s13 + $0x40] sm:$0xff]  }
 0xa12   :  { %v1341_v32 = vmul.f32 %v4793_v26, %v5576_v37  ;;  %v4595_v37 = vld [vmem:[%s6395_s13] sm:$0xff]   ;;  %4231 = vmatprep.subr.bf16.mxu0 %v4594_v36 }
 0xa13   :  { %v1363_v34 = vpack.c.bf16 %v1360_v31, %v1359_v25  ;;  %v1352_v35 = vmul.f32 %v3905_v16, %v1342_v28 }
 0xa14   :  { %v1351_v29 = vmul.f32 %v3905_v16, %v1341_v32 }
 0xa15   :  { %1590 = vmatmul.mubr.bf16.vlgmr.msra.gmra.mrb[16].mxu0 %v1363_v34  ;;  %1643 = vmatmul.mubr.bf16.vlgmr.msra.gmra.mrb[16].mxu1 %v1363_v34  ;;  %v1362_v17 = vadd.f32 %v3906_v41, %v1352_v35 }
 0xa16   :  { %1599 = vmatprep.mubr.bf16.mxu0 %v4978_v39  ;;  %1652 = vmatprep.mubr.bf16.mxu1 %v4978_v39  ;;  %v1361_v33 = vadd.f32 %v3906_v41, %v1351_v29 }
 0xa17   :  { %4232 = vmatpush3.bf16.msra.mxu0 %v4595_v37 }
 0xa18   :  { %v1364_v42 = vpack.c.bf16 %v1362_v17, %v1361_v33  ;;  %4233 = vmatprep.subr.bf16.mxu0 %v4596_v43 }
 0xa1b   :  { %4234 = vmatpush3.bf16.msra.mxu0 %v4597_v44 }
 0xa1c   :  { %4235 = vmatprep.subr.bf16.mxu0 %v4598_v45 }
 0xa1d   :  { %1600 = vmatmul.mubr.bf16.gmra.mrb[20].mxu0 %v1364_v42  ;;  %1653 = vmatmul.mubr.bf16.gmra.mrb[20].mxu1 %v1364_v42 }
 0xa1e   :  { %2175 = vmatprep.mubr.bf16.mxu1 %v4978_v39 }
 0xa1f   :  { %4236 = vmatpush3.bf16.msra.mxu0 %v4599_v40 }
 0xa20   :  { %4237 = vmatprep.subr.bf16.mxu0 %v4600_v46 }
 0xa23   :  { %4238 = vmatpush3.bf16.msra.mxu0 %v4601_v22 }
 0xa24   :  { %4239 = vmatprep.subr.bf16.mxu0 %v4602_v47 }
 0xa27   :  { %4240 = vmatpush3.bf16.msra.mxu0 %v4603_v24 }
 0xa28   :  { %4241 = vmatprep.subr.bf16.mxu0 %v4604_v13 }
 0xa2b   :  { %4242 = vmatpush3.bf16.msra.mxu0 %v4605_v49 }
 0xa2c   :  { %4243 = vmatprep.subr.bf16.mxu0 %v4606_v18 }
 0xa2f   :  { %4244 = vmatpush3.bf16.msra.mxu0 %v4607_v4 }
 0xa30   :  { %4245 = vmatprep.subr.bf16.mxu0 %v4608_v14 }
 0xa33   :  { %4246 = vmatpush3.bf16.msra.mxu0 %v4609_v55 }
 0xae8   :  { %v1591_v57 = vpop.f32.mrb[16].mxu0  ;;  %v1644_v12 = vpop.f32.mrb[16].mxu1 }
 0xae9   :  { %v3939_v58 = vmul.f32 -1.442695, %v1591_v57  ;;  %v1593_v30 = vpop.f32.mrb[17].mxu0  ;;  %v1646_v53 = vpop.f32.mrb[17].mxu1 }
 0xaea   :  { %v3940_v52 = vmul.f32 -1.442695, %v1593_v30  ;;  %v1595_v27 = vpop.f32.mrb[18].mxu0  ;;  %v1648_v60 = vpop.f32.mrb[18].mxu1 }
 0xaeb   :  { %4794 = vpow2.f32 %v3939_v58  ;;  %v3941_v23 = vmul.f32 -1.442695, %v1595_v27  ;;  %v1597_v59 = vpop.f32.mrb[19].mxu0  ;;  %v1650_v48 = vpop.f32.mrb[19].mxu1 }
 0xaec   :  { %4796 = vpow2.f32 %v3940_v52  ;;  %v3942_v5 = vmul.f32 -1.442695, %v1597_v59 }
 0xaed   :  { %4798 = vpow2.f32 %v3941_v23 }
 0xaee   :  { %4800 = vpow2.f32 %v3942_v5 }
 0xaf0   :  { %v1601_v62 = vpop.f32.mrb[20].mxu0  ;;  %v1654_v0 = vpop.f32.mrb[20].mxu1 }
 0xaf1   :  { %v3943_v1 = vmul.f32 -1.442695, %v1601_v62  ;;  %v1603_v63 = vpop.f32.mrb[21].mxu0  ;;  %v1656_v2 = vpop.f32.mrb[21].mxu1 }
 0xaf2   :  { %v3944_v50 = vmul.f32 -1.442695, %v1603_v63  ;;  %v1605_v6 = vpop.f32.mrb[22].mxu0  ;;  %v1658_v3 = vpop.f32.mrb[22].mxu1 }
 0xaf3   :  { %4802 = vpow2.f32 %v3943_v1  ;;  %v3945_v56 = vmul.f32 -1.442695, %v1605_v6  ;;  %v1607_v8 = vpop.f32.mrb[23].mxu0  ;;  %v1660_v10 = vpop.f32.mrb[23].mxu1 }
 0xaf4   :  { %4804 = vpow2.f32 %v3944_v50  ;;  %v3946_v11 = vmul.f32 -1.442695, %v1607_v8 }
 0xaf5   :  { %v4795_v16 = vpop.eup %4794  ;;  %4806 = vpow2.f32 %v3945_v56 }
 0xaf6   :  { %v4797_v54 = vpop.eup %4796  ;;  %v1687_v38 = vadd.f32 1.0, %v4795_v16  ;;  %4808 = vpow2.f32 %v3946_v11  ;;  %v4612_v16 = vld [vmem:[%s6392_s10 + $0xc4] ss:$12 sps:$4 sm:$0xff]  }
 0xaf7   :  { %v4799_v19 = vpop.eup %4798  ;;  %v1688_v20 = vadd.f32 1.0, %v4797_v54  ;;  %2143 = vmatprep.subr.bf16.mxu1 %v4612_v16 }
 0xaf8   :  { %v4801_v41 = vpop.eup %4800  ;;  %4810 = vrcp.f32 %v1687_v38  ;;  %v1689_v15 = vadd.f32 1.0, %v4799_v19 }
 0xaf9   :  { %4812 = vrcp.f32 %v1688_v20  ;;  %v1690_v21 = vadd.f32 1.0, %v4801_v41 }
 0xafa   :  { %4814 = vrcp.f32 %v1689_v15 }
 0xafb   :  { %4816 = vrcp.f32 %v1690_v21 }
 0xafd   :  { %v4803_v26 = vpop.eup %4802 }
 0xafe   :  { %v4805_v25 = vpop.eup %4804  ;;  %v1691_v31 = vadd.f32 1.0, %v4803_v26 }
 0xaff   :  { %v4807_v28 = vpop.eup %4806  ;;  %v1692_v32 = vadd.f32 1.0, %v4805_v25 }
 0xb00   :  { %v4809_v34 = vpop.eup %4808  ;;  %4818 = vrcp.f32 %v1691_v31  ;;  %v1693_v35 = vadd.f32 1.0, %v4807_v28 }
 0xb01   :  { %4820 = vrcp.f32 %v1692_v32  ;;  %v1694_v29 = vadd.f32 1.0, %v4809_v34 }
 0xb02   :  { %v4811_v33 = vpop.eup %4810  ;;  %4822 = vrcp.f32 %v1693_v35 }
 0xb03   :  { %v4813_v17 = vpop.eup %4812  ;;  %v1711_v42 = vmul.f32 %v4811_v33, %v1591_v57  ;;  %4824 = vrcp.f32 %v1694_v29 }
 0xb04   :  { %v4815_v36 = vpop.eup %4814  ;;  %v1712_v37 = vmul.f32 %v4813_v17, %v1593_v30  ;;  %v4618_v17 = vld [vmem:[%s6392_s10 + $0xf4] ss:$12 sps:$4 sm:$0xff]  }
 0xb05   :  { %v4817_v43 = vpop.eup %4816  ;;  %v1719_v44 = vmul.f32 %v1711_v42, %v1644_v12  ;;  %v1713_v45 = vmul.f32 %v4815_v36, %v1595_v27  ;;  %v4619_v42 = vld [vmem:[%s6392_s10 + $0xc8] ss:$12 sps:$4 sm:$0xff]   ;;  %v4616_v36 = vld [vmem:[%s6392_s10 + $0xf0] ss:$12 sps:$4 sm:$0xff]  }
 0xb06   :  { %v1720_v40 = vmul.f32 %v1712_v37, %v1646_v53  ;;  %v1714_v46 = vmul.f32 %v4817_v43, %v1597_v59  ;;  %4401 = vmatprep.subr.bf16.mxu0 %v4619_v42  ;;  %v4622_v37 = vld [vmem:[%s6392_s10 + $0x10c] ss:$12 sps:$4 sm:$0xff]  }
 0xb07   :  { %v1721_v22 = vmul.f32 %v1713_v45, %v1648_v60  ;;  %v4623_v43 = vld [vmem:[%s6392_s10 + $0xe0] ss:$12 sps:$4 sm:$0xff]   ;;  %v4626_v45 = vld [vmem:[%s6392_s10 + $0x124] ss:$12 sps:$4 sm:$0xff]  }
 0xb08   :  { %v1722_v47 = vmul.f32 %v1714_v46, %v1650_v48  ;;  %v4624_v46 = vld [vmem:[%s6392_s10 + $0x120] ss:$12 sps:$4 sm:$0xff]  }
 0xb09   :  { %v1727_v24 = vpack.c.bf16 %v1721_v22, %v1719_v44  ;;  %v4620_v44 = vld [vmem:[%s6392_s10 + $0x108] ss:$12 sps:$4 sm:$0xff]  }
 0xb0a   :  { %v4819_v13 = vpop.eup %4818  ;;  %v1728_v49 = vpack.c.bf16 %v1722_v47, %v1720_v40  ;;  %v4627_v40 = vld [vmem:[%s6392_s10 + $0xf8] ss:$12 sps:$4 sm:$0xff]   ;;  %v4630_v22 = vld [vmem:[%s6392_s10 + $0x13c] ss:$12 sps:$4 sm:$0xff]  }
 0xb0b   :  { %v4821_v18 = vpop.eup %4820  ;;  %v1715_v4 = vmul.f32 %v4819_v13, %v1601_v62  ;;  %v4631_v47 = vld [vmem:[%s6392_s10 + $0x110] ss:$12 sps:$4 sm:$0xff]   ;;  %v4634_v13 = vld [vmem:[%s6392_s10 + $0x154] ss:$12 sps:$4 sm:$0xff]  }
 0xb0c   :  { %v4823_v14 = vpop.eup %4822  ;;  %v1716_v55 = vmul.f32 %v4821_v18, %v1603_v63  ;;  %1891 = vmatprep.mubr.bf16.mxu0 %v1728_v49  ;;  %v4635_v49 = vld [vmem:[%s6392_s10 + $0x128] ss:$12 sps:$4 sm:$0xff]   ;;  %v4632_v18 = vld [vmem:[%s6392_s10 + $0x150] ss:$12 sps:$4 sm:$0xff]  }
 0xb0d   :  { %v4825_v58 = vpop.eup %4824  ;;  %v1723_v57 = vmul.f32 %v1715_v4, %v1654_v0  ;;  %v1717_v52 = vmul.f32 %v4823_v14, %v1605_v6  ;;  %1892 = vmatmul.mubr.bf16.vlgmr.msra.gmra.mrb[24].mxu0 %v1727_v24  ;;  %v4628_v24 = vld [vmem:[%s6392_s10 + $0x138] ss:$12 sps:$4 sm:$0xff]   ;;  %v4636_v4 = vld [vmem:[%s6392_s10 + $0x168] ss:$12 sps:$4 sm:$0xff]  }
 0xb0e   :  { %v1724_v30 = vmul.f32 %v1716_v55, %v1656_v2  ;;  %v1718_v23 = vmul.f32 %v4825_v58, %v1607_v8  ;;  %4402 = vmatpush3.bf16.msra.mxu0 %v4619_v42  ;;  %v4638_v14 = vld [vmem:[%s6392_s10 + $0x16c] ss:$12 sps:$4 sm:$0xff]  }
 0xb0f   :  { %v1725_v12 = vmul.f32 %v1717_v52, %v1658_v3  ;;  %4403 = vmatprep.subr.bf16.mxu0 %v4623_v43  ;;  %v4639_v55 = vld [vmem:[%s6392_s10 + $0x140] ss:$12 sps:$4 sm:$0xff]   ;;  %v4640_v58 = vld [vmem:[%s6392_s10 + $0x158] ss:$12 sps:$4 sm:$0xff]  }
 0xb10   :  { %v1726_v27 = vmul.f32 %v1718_v23, %v1660_v10 }
 0xb11   :  { %v1729_v53 = vpack.c.bf16 %v1725_v12, %v1723_v57  ;;  %v4641_v57 = vld [vmem:[%s6392_s10 + $0x170] ss:$12 sps:$4 sm:$0xff]  }
 0xb12   :  { %v1730_v59 = vpack.c.bf16 %v1726_v27, %v1724_v30  ;;  %4404 = vmatpush3.bf16.msra.mxu0 %v4623_v43 }
 0xb13   :  { %4405 = vmatprep.subr.bf16.mxu0 %v4627_v40 }
 0xb14   :  { %1899 = vmatprep.mubr.bf16.mxu0 %v1730_v59 }
 0xb15   :  { %1900 = vmatmul.mubr.bf16.gmra.mrb[28].mxu0 %v1729_v53 }
 0xb16   :  { %4406 = vmatpush3.bf16.msra.mxu0 %v4627_v40 }
 0xb17   :  { %4407 = vmatprep.subr.bf16.mxu0 %v4631_v47 }
 0xb1a   :  { %4408 = vmatpush3.bf16.msra.mxu0 %v4631_v47 }
 0xb1b   :  { %4409 = vmatprep.subr.bf16.mxu0 %v4635_v49 }
 0xb1e   :  { %4410 = vmatpush3.bf16.msra.mxu0 %v4635_v49 }
 0xb1f   :  { %4411 = vmatprep.subr.bf16.mxu0 %v4639_v55 }
 0xb22   :  { %4412 = vmatpush3.bf16.msra.mxu0 %v4639_v55 }
 0xb23   :  { %4413 = vmatprep.subr.bf16.mxu0 %v4640_v58 }
 0xb26   :  { %4414 = vmatpush3.bf16.msra.mxu0 %v4640_v58 }
 0xb27   :  { %4415 = vmatprep.subr.bf16.mxu0 %v4641_v57 }
 0xb2a   :  { %4416 = vmatpush3.bf16.msra.mxu0 %v4641_v57 }
 0xbe0   :  { %v4247_v60 = vpop.f32.mrb[24].mxu0 }
 0xbe1   :  { %v4248_v48 = vpop.f32.mrb[25].mxu0 }
 0xbe2   :  { %v4249_v5 = vadd.f32 %v4248_v48, %v4247_v60  ;;  %v4250_v1 = vpop.f32.mrb[26].mxu0 }
 0xbe3   :  { %v4251_v62 = vpop.f32.mrb[27].mxu0 }
 0xbe4   :  { %v5716_v63 = vadd.f32 %v5517_v51, %v4249_v5  ;;  %v4252_v50 = vadd.f32 %v4251_v62, %v4250_v1 }
 0xbe6   :  { %v5719_v0 = vadd.f32 %v5522_v61, %v4252_v50  ;;  %1916 = vadd.xlane.f32.xlu0 %v5716_v63  ;;  %v4610_v61 = vld [vmem:[%s6392_s10 + $0xc0] ss:$12 sps:$4 sm:$0xff]  }
 0xbe7   :  { %2144 = vmatpush1.bf16.msra.mxu1 %v4610_v61 }
 0xbe8   :  { %1918 = vadd.xlane.f32.xlu1 %v5719_v0  ;;  %v4253_v2 = vpop.f32.mrb[28].mxu0 }
 0xbe9   :  { %v4254_v6 = vpop.f32.mrb[29].mxu0 }
 0xbea   :  { %v4255_v3 = vadd.f32 %v4254_v6, %v4253_v2  ;;  %v4256_v56 = vpop.f32.mrb[30].mxu0  ;;  %v3965_v2 = vld [vmem:[%s6384_s2 + $0x1] ss:$0 sm:$0xff] }
 0xbeb   :  { %v4257_v8 = vpop.f32.mrb[31].mxu0 }
 0xbec   :  { %v5724_v10 = vadd.f32 %v5534_v9, %v4255_v3  ;;  %v4258_v11 = vadd.f32 %v4257_v8, %v4256_v56  ;;  %v4615_v9 = vld [vmem:[%s6392_s10 + $0xdc] ss:$12 sps:$4 sm:$0xff]  }
 0xbed   :  { %2145 = vmatprep.subr.bf16.mxu1 %v4615_v9 }
 0xbee   :  { %v5727_v51 = vadd.f32 %v5528_v7, %v4258_v11  ;;  %1920 = vadd.xlane.f32.xlu0 %v5724_v10  ;;  %v4613_v7 = vld [vmem:[%s6392_s10 + $0xd8] ss:$12 sps:$4 sm:$0xff]   ;;  %v3966_v11 = vld [vmem:[%s6385_s3 + $0x1] ss:$0 sm:$0xff] }
 0xbef   :  { %2146 = vmatpush1.bf16.msra.mxu1 %v4613_v7 }
 0xbf0   :  { %1922 = vadd.xlane.f32.xlu1 %v5727_v51  ;;  %2147 = vmatprep.subr.bf16.mxu1 %v4618_v17 }
 0xbf3   :  { %2148 = vmatpush1.bf16.msra.mxu1 %v4616_v36 }
 0xbf4   :  { %2149 = vmatprep.subr.bf16.mxu1 %v4622_v37 }
 0xbf7   :  { %2150 = vmatpush1.bf16.msra.mxu1 %v4620_v44 }
 0xbf8   :  { %2151 = vmatprep.subr.bf16.mxu1 %v4626_v45 }
 0xbfb   :  { %2152 = vmatpush1.bf16.msra.mxu1 %v4624_v46 }
 0xbfc   :  { %2153 = vmatprep.subr.bf16.mxu1 %v4630_v22 }
 0xbff   :  { %2154 = vmatpush1.bf16.msra.mxu1 %v4628_v24 }
 0xc00   :  { %2155 = vmatprep.subr.bf16.mxu1 %v4634_v13 }
 0xc03   :  { %2156 = vmatpush1.bf16.msra.mxu1 %v4632_v18 }
 0xc04   :  { %2157 = vmatprep.subr.bf16.mxu1 %v4638_v14 }
 0xc07   :  { %2158 = vmatpush1.bf16.msra.mxu1 %v4636_v4 }
 0xc73   :  { %v1917_v54 = vpop.xlane.xlu0 %1916 }
 0xc74   :  { %v1924_v38 = vmul.f32 0.0078125, %v1917_v54 }
 0xc75   :  { %v1919_v19 = vpop.xlane.xlu1 %1918 }
 0xc76   :  { %v5744_v20 = vsub.f32 %v5716_v63, %v1924_v38  ;;  %v1925_v41 = vmul.f32 0.0078125, %v1919_v19 }
 0xc78   :  { %v5747_v15 = vsub.f32 %v5719_v0, %v1925_v41  ;;  %v1932_v21 = vmul.f32 %v5744_v20, %v5744_v20 }
 0xc7a   :  { %1936 = vadd.xlane.f32.xlu0 %v1932_v21  ;;  %v1933_v26 = vmul.f32 %v5747_v15, %v5747_v15 }
 0xc7b   :  { %v1921_v25 = vpop.xlane.xlu0 %1920 }
 0xc7c   :  { %v1926_v31 = vmul.f32 0.0078125, %v1921_v25  ;;  %1938 = vadd.xlane.f32.xlu1 %v1933_v26 }
 0xc7d   :  { %v1923_v28 = vpop.xlane.xlu1 %1922 }
 0xc7e   :  { %v5754_v32 = vsub.f32 %v5724_v10, %v1926_v31  ;;  %v1927_v34 = vmul.f32 0.0078125, %v1923_v28 }
 0xc80   :  { %v5757_v35 = vsub.f32 %v5727_v51, %v1927_v34  ;;  %v1934_v29 = vmul.f32 %v5754_v32, %v5754_v32 }
 0xc82   :  { %1940 = vadd.xlane.f32.xlu0 %v1934_v29  ;;  %v1935_v33 = vmul.f32 %v5757_v35, %v5757_v35 }
 0xc84   :  { %1942 = vadd.xlane.f32.xlu1 %v1935_v33 }
 0xd07   :  { %v1937_v52 = vpop.xlane.xlu0 %1936 }
 0xd08   :  { %v1944_v30 = vmul.f32 0.0078125, %v1937_v52 }
 0xd09   :  { %v1939_v23 = vpop.xlane.xlu1 %1938 }
 0xd0a   :  { %v1948_v12 = vadd.f32 1e-05, %v1944_v30  ;;  %v1945_v27 = vmul.f32 0.0078125, %v1939_v23 }
 0xd0c   :  { %4826 = vrsqrt.f32 %v1948_v12  ;;  %v1949_v53 = vadd.f32 1e-05, %v1945_v27 }
 0xd0e   :  { %4828 = vrsqrt.f32 %v1949_v53 }
 0xd0f   :  { %v1941_v59 = vpop.xlane.xlu0 %1940 }
 0xd10   :  { %v1946_v60 = vmul.f32 0.0078125, %v1941_v59 }
 0xd11   :  { %v1943_v48 = vpop.xlane.xlu1 %1942 }
 0xd12   :  { %v1950_v5 = vadd.f32 1e-05, %v1946_v60  ;;  %v1947_v1 = vmul.f32 0.0078125, %v1943_v48 }
 0xd14   :  { %4830 = vrsqrt.f32 %v1950_v5  ;;  %v1951_v62 = vadd.f32 1e-05, %v1947_v1 }
 0xd16   :  { %v4827_v50 = vpop.eup %4826  ;;  %4832 = vrsqrt.f32 %v1951_v62 }
 0xd17   :  { %v1956_v6 = vmul.f32 %v4827_v50, %v5744_v20 }
 0xd18   :  { %v4829_v3 = vpop.eup %4828 }
 0xd19   :  { %v1966_v56 = vmul.f32 %v3965_v2, %v1956_v6  ;;  %v1957_v8 = vmul.f32 %v4829_v3, %v5747_v15 }
 0xd1b   :  { %v1967_v61 = vmul.f32 %v3965_v2, %v1957_v8  ;;  %v1976_v16 = vadd.f32 %v3966_v11, %v1966_v56 }
 0xd1d   :  { %v1977_v9 = vadd.f32 %v3966_v11, %v1967_v61 }
 0xd1e   :  { %v4831_v7 = vpop.eup %4830 }
 0xd1f   :  { %v1980_v54 = vpack.c.bf16 %v1977_v9, %v1976_v16  ;;  %v1958_v38 = vmul.f32 %v4831_v7, %v5754_v32 }
 0xd20   :  { %v4833_v19 = vpop.eup %4832 }
 0xd21   :  { %2176 = vmatmul.mubr.bf16.vlgmr.msra.gmra.mrb[24].mxu1 %v1980_v54  ;;  %4417 = vmatprep.mubr.bf16.mxu0 %v1980_v54  ;;  %v1959_v20 = vmul.f32 %v4833_v19, %v5757_v35  ;;  %v1968_v41 = vmul.f32 %v3965_v2, %v1958_v38 }
 0xd22   :  { %2185 = vmatprep.mubr.bf16.mxu1 %v4978_v39 }
 0xd23   :  { %v1969_v15 = vmul.f32 %v3965_v2, %v1959_v20  ;;  %v1978_v21 = vadd.f32 %v3966_v11, %v1968_v41 }
 0xd25   :  { %v1979_v26 = vadd.f32 %v3966_v11, %v1969_v15 }
 0xd27   :  { %v1981_v25 = vpack.c.bf16 %v1979_v26, %v1978_v21 }
 0xd29   :  { %2186 = vmatmul.mubr.bf16.gmra.mrb[28].mxu1 %v1981_v25  ;;  %4418 = vmatmul.mubr.bf16.vlgmr.msra.gmra.mrb[32].mxu0 %v1981_v25 }
 0xdf4   :  { %v5834_v31 = vpop.f32.mrb[24].mxu1 }
 0xdf5   :  { %v5836_v28 = vpop.f32.mrb[25].mxu1  ;;  %v2266_v13 = vsel %vm412_vm0, %v5834_v31, 0.0 }
 0xdf6   :  { %v5838_v34 = vpop.f32.mrb[26].mxu1  ;;  %v2342_v32 = vsel %vm412_vm0, %v5836_v28, 0.0 }
 0xdf7   :  { %2343 = vadd.xlane.f32.xlu0 %v2342_v32  ;;  %v5842_v35 = vpop.f32.mrb[27].mxu1  ;;  %v2269_v42 = vsel %vm412_vm0, %v5838_v34, 0.0 }
 0xdf8   :  { %v2345_v29 = vsel %vm412_vm0, %v5842_v35, 0.0 }
 0xdf9   :  { %2346 = vadd.xlane.f32.xlu1 %v2345_v29 }
 0xdfc   :  { %v5846_v33 = vpop.f32.mrb[28].mxu1  ;;  %v4419_v17 = vpop.f32.mrb[32].mxu0 }
 0xdfd   :  { %2270 = vadd.xlane.f32.xlu1 %v2269_v42  ;;  %v5850_v36 = vpop.f32.mrb[29].mxu1  ;;  %v2230_v37 = vpop.f32.mrb[33].mxu0  ;;  %v2272_v18 = vsel %vm412_vm0, %v5846_v33, 0.0 }
 0xdfe   :  { %v5852_v43 = vpop.f32.mrb[30].mxu1  ;;  %v4420_v44 = vpop.f32.mrb[34].mxu0  ;;  %v2348_v45 = vsel %vm412_vm0, %v5850_v36, 0.0 }
 0xdff   :  { %v5856_v40 = vpack.c.bf16 %v4420_v44, %v4419_v17  ;;  %v2233_v46 = vpop.f32.mrb[35].mxu0  ;;  %2349 = vadd.xlane.f32.xlu0 %v2348_v45  ;;  %v5858_v22 = vpop.f32.mrb[31].mxu1  ;;  %v2275_v49 = vsel %vm412_vm0, %v5852_v43, 0.0 }
 0xe00   :  { %v5860_v47 = vpack.c.bf16 %v2233_v46, %v2230_v37  ;;  %v2351_v24 = vsel %vm412_vm0, %v5858_v22, 0.0 }
 0xe01   :  { %2352 = vadd.xlane.f32.xlu1 %v2351_v24 }
 0xe03   :  { %2267 = vadd.xlane.f32.xlu0 %v2266_v13 }
 0xe05   :  { %2276 = vadd.xlane.f32.xlu1 %v2275_v49 }
 0xe07   :  { %2273 = vadd.xlane.f32.xlu0 %v2272_v18 }
 0xe16   :  { %2779 = vrot.lane.b32.xlu1 %v5842_v35, %s4979_s26 }
 0xe1a   :  { %2781 = vrot.lane.b32.xlu1 %v5850_v36, %s4979_s26 }
 0xe1d   :  { %2777 = vrot.lane.b32.xlu0 %v5836_v28, %s4979_s26 }
 0xe1e   :  { %2783 = vrot.lane.b32.xlu1 %v5858_v22, %s4979_s26 }
 0xe21   :  { %2679 = vrot.lane.b32.xlu0 %v5834_v31, %s4979_s26 }
 0xe22   :  { %2681 = vrot.lane.b32.xlu1 %v5838_v34, %s4979_s26 }
 0xe25   :  { %2683 = vrot.lane.b32.xlu0 %v5846_v33, %s4979_s26 }
 0xe26   :  { %2685 = vrot.lane.b32.xlu1 %v5852_v43, %s4979_s26 }
 0xe84   :  { %v2344_v4 = vpop.xlane.xlu0 %2343 }
 0xe85   :  { %v2354_v14 = vmul.f32 0.015625, %v2344_v4 }
 0xe86   :  { %v2347_v55 = vpop.xlane.xlu1 %2346 }
 0xe87   :  { %v5887_v58 = vsub.f32 %v5836_v28, %v2354_v14  ;;  %v2355_v57 = vmul.f32 0.015625, %v2347_v55 }
 0xe89   :  { %v5890_v52 = vsub.f32 %v5842_v35, %v2355_v57  ;;  %v2362_v30 = vmul.f32 %v5887_v58, %v5887_v58 }
 0xe8a   :  { %v2271_v23 = vpop.xlane.xlu1 %2270 }
 0xe8b   :  { %v2279_v12 = vmul.f32 0.015625, %v2271_v23  ;;  %v2366_v27 = vsel %vm412_vm0, %v2362_v30, 0.0  ;;  %v2363_v53 = vmul.f32 %v5890_v52, %v5890_v52 }
 0xe8c   :  { %2367 = vadd.xlane.f32.xlu0 %v2366_v27  ;;  %v2350_v59 = vpop.xlane.xlu0 %2349 }
 0xe8d   :  { %v5898_v60 = vsub.f32 %v5838_v34, %v2279_v12  ;;  %v2356_v48 = vmul.f32 0.015625, %v2350_v59  ;;  %v2369_v5 = vsel %vm412_vm0, %v2363_v53, 0.0 }
 0xe8e   :  { %2370 = vadd.xlane.f32.xlu1 %v2369_v5  ;;  %v2353_v1 = vpop.xlane.xlu1 %2352 }
 0xe8f   :  { %v5902_v62 = vsub.f32 %v5850_v36, %v2356_v48  ;;  %v2357_v50 = vmul.f32 0.015625, %v2353_v1  ;;  %v2287_v2 = vmul.f32 %v5898_v60, %v5898_v60 }
 0xe90   :  { %v2268_v6 = vpop.xlane.xlu0 %2267 }
 0xe91   :  { %v5907_v3 = vsub.f32 %v5858_v22, %v2357_v50  ;;  %v2278_v56 = vmul.f32 0.015625, %v2268_v6  ;;  %v2293_v8 = vsel %vm412_vm0, %v2287_v2, 0.0  ;;  %v2364_v11 = vmul.f32 %v5902_v62, %v5902_v62 }
 0xe92   :  { %2294 = vadd.xlane.f32.xlu1 %v2293_v8  ;;  %v2277_v61 = vpop.xlane.xlu1 %2276 }
 0xe93   :  { %v5913_v16 = vsub.f32 %v5834_v31, %v2278_v56  ;;  %v2281_v9 = vmul.f32 0.015625, %v2277_v61  ;;  %v2372_v7 = vsel %vm412_vm0, %v2364_v11, 0.0  ;;  %v2365_v54 = vmul.f32 %v5907_v3, %v5907_v3 }
 0xe94   :  { %2373 = vadd.xlane.f32.xlu0 %v2372_v7  ;;  %v2274_v38 = vpop.xlane.xlu0 %2273 }
 0xe95   :  { %v5919_v19 = vsub.f32 %v5852_v43, %v2281_v9  ;;  %v2280_v20 = vmul.f32 0.015625, %v2274_v38  ;;  %v2375_v21 = vsel %vm412_vm0, %v2365_v54, 0.0  ;;  %v2286_v25 = vmul.f32 %v5913_v16, %v5913_v16 }
 0xe96   :  { %v2780_v41 = vpop.permute.xlu1 %2779 }
 0xe97   :  { %v5922_v15 = vsub.f32 %v5846_v33, %v2280_v20  ;;  %v2289_v26 = vmul.f32 %v5919_v19, %v5919_v19  ;;  %v2290_v17 = vsel %vm412_vm0, %v2286_v25, 0.0  ;;  %v2792_v37 = vsel %vm412_vm0, %v2780_v41, 0.0  ;;  %v5945_v41 = vld [vmem:[%s6390_s8 + $0x1] ss:$0 sm:$0xff] }
 0xe98   :  { %2376 = vadd.xlane.f32.xlu0 %v2375_v21  ;;  %v2778_v46 = vpop.permute.xlu0 %2777 }
 0xe99   :  { %v2299_v32 = vsel %vm412_vm0, %v2289_v26, 0.0  ;;  %v2288_v42 = vmul.f32 %v5922_v15, %v5922_v15  ;;  %v2789_v49 = vsel %vm412_vm0, %v2778_v46, 0.0  ;;  %v5953_v46 = vld [vmem:[%s6391_s9 + $0x1] ss:$0 sm:$0xff] }
 0xe9a   :  { %2300 = vadd.xlane.f32.xlu1 %v2299_v32  ;;  %v2782_v29 = vpop.permute.xlu1 %2781 }
 0xe9b   :  { %v2296_v45 = vsel %vm412_vm0, %v2288_v42, 0.0  ;;  %v2795_v55 = vsel %vm412_vm0, %v2782_v29, 0.0 }
 0xe9c   :  { %2291 = vadd.xlane.f32.xlu0 %v2290_v17  ;;  %v2680_v4 = vpop.permute.xlu0 %2679 }
 0xe9d   :  { %v2691_v30 = vsel %vm412_vm0, %v2680_v4, 0.0 }
 0xe9e   :  { %2793 = vadd.xlane.f32.xlu1 %v2792_v37  ;;  %v2784_v44 = vpop.permute.xlu1 %2783 }
 0xe9f   :  { %v2798_v24 = vsel %vm412_vm0, %v2784_v44, 0.0 }
 0xea0   :  { %2297 = vadd.xlane.f32.xlu0 %v2296_v45  ;;  %v2684_v23 = vpop.permute.xlu0 %2683 }
 0xea1   :  { %v2697_v12 = vsel %vm412_vm0, %v2684_v23, 0.0 }
 0xea2   :  { %2799 = vadd.xlane.f32.xlu1 %v2798_v24  ;;  %v2682_v13 = vpop.permute.xlu1 %2681 }
 0xea3   :  { %v2694_v18 = vsel %vm412_vm0, %v2682_v13, 0.0 }
 0xea4   :  { %2790 = vadd.xlane.f32.xlu0 %v2789_v49 }
 0xea6   :  { %2695 = vadd.xlane.f32.xlu1 %v2694_v18  ;;  %v2686_v14 = vpop.permute.xlu1 %2685 }
 0xea7   :  { %v2700_v57 = vsel %vm412_vm0, %v2686_v14, 0.0 }
 0xea8   :  { %2796 = vadd.xlane.f32.xlu0 %v2795_v55 }
 0xeaa   :  { %2701 = vadd.xlane.f32.xlu1 %v2700_v57 }
 0xeac   :  { %2692 = vadd.xlane.f32.xlu0 %v2691_v30 }
 0xeb0   :  { %2698 = vadd.xlane.f32.xlu0 %v2697_v12 }
 0xf19   :  { %v2368_v27 = vpop.xlane.xlu0 %2367 }
 0xf1a   :  { %v2378_v53 = vmul.f32 0.015625, %v2368_v27 }
 0xf1b   :  { %v2371_v59 = vpop.xlane.xlu1 %2370 }
 0xf1c   :  { %v2382_v48 = vadd.f32 1e-05, %v2378_v53  ;;  %v2379_v5 = vmul.f32 0.015625, %v2371_v59 }
 0xf1e   :  { %4834 = vrsqrt.f32 %v2382_v48  ;;  %v2383_v1 = vadd.f32 1e-05, %v2379_v5 }
 0xf1f   :  { %v2295_v50 = vpop.xlane.xlu1 %2294 }
 0xf20   :  { %4836 = vrsqrt.f32 %v2383_v1  ;;  %v2303_v2 = vmul.f32 0.015625, %v2295_v50  ;;  %v5975_v50 = vld [vmem:[%s6388_s6 + $0x1] ss:$0 sm:$0xff] }
 0xf21   :  { %v2374_v6 = vpop.xlane.xlu0 %2373 }
 0xf22   :  { %v2380_v56 = vmul.f32 0.015625, %v2374_v6  ;;  %v2307_v8 = vadd.f32 1e-05, %v2303_v2 }
 0xf24   :  { %v2384_v11 = vadd.f32 1e-05, %v2380_v56 }
 0xf25   :  { %v2377_v61 = vpop.xlane.xlu0 %2376 }
 0xf26   :  { %4838 = vrsqrt.f32 %v2384_v11  ;;  %v2381_v9 = vmul.f32 0.015625, %v2377_v61 }
 0xf27   :  { %4840 = vrsqrt.f32 %v2307_v8  ;;  %v2301_v7 = vpop.xlane.xlu1 %2300 }
 0xf28   :  { %v4835_v54 = vpop.eup %4834  ;;  %v2385_v38 = vadd.f32 1e-05, %v2381_v9  ;;  %v2305_v20 = vmul.f32 0.015625, %v2301_v7 }
 0xf29   :  { %v2390_v21 = vmul.f32 %v4835_v54, %v5887_v58  ;;  %v2292_v26 = vpop.xlane.xlu0 %2291 }
 0xf2a   :  { %v4837_v25 = vpop.eup %4836  ;;  %4842 = vrsqrt.f32 %v2385_v38  ;;  %v2309_v32 = vadd.f32 1e-05, %v2305_v20  ;;  %v2302_v29 = vmul.f32 0.015625, %v2292_v26 }
 0xf2b   :  { %v2391_v17 = vmul.f32 %v4837_v25, %v5890_v52  ;;  %v2794_v42 = vpop.xlane.xlu1 %2793  ;;  %v2400_v37 = vmul.f32 %v5945_v41, %v2390_v21 }
 0xf2c   :  { %4844 = vrsqrt.f32 %v2309_v32  ;;  %v2306_v44 = vadd.f32 1e-05, %v2302_v29  ;;  %v2802_v45 = vmul.f32 0.015625, %v2794_v42 }
 0xf2d   :  { %v2298_v24 = vpop.xlane.xlu0 %2297  ;;  %v2401_v58 = vmul.f32 %v5945_v41, %v2391_v17  ;;  %v2410_v18 = vadd.f32 %v5953_v46, %v2400_v37 }
 0xf2e   :  { %4846 = vrsqrt.f32 %v2306_v44  ;;  %v5957_v13 = vsub.f32 %v5842_v35, %v2802_v45  ;;  %v2304_v49 = vmul.f32 0.015625, %v2298_v24 }
 0xf2f   :  { %v2800_v52 = vpop.xlane.xlu1 %2799  ;;  %v2411_v4 = vadd.f32 %v5953_v46, %v2401_v58 }
 0xf30   :  { %v4839_v14 = vpop.eup %4838  ;;  %v2810_v55 = vmul.f32 %v5957_v13, %v5957_v13  ;;  %v2308_v57 = vadd.f32 1e-05, %v2304_v49  ;;  %v2804_v5 = vmul.f32 0.015625, %v2800_v52 }
 0xf31   :  { %v4841_v30 = vpop.eup %4840  ;;  %v2392_v23 = vmul.f32 %v4839_v14, %v5902_v62  ;;  %v2791_v12 = vpop.xlane.xlu0 %2790  ;;  %v2416_v27 = vpack.c.bf16 %v2411_v4, %v2410_v18 }
 0xf32   :  { %4848 = vrsqrt.f32 %v2308_v57  ;;  %v2801_v53 = vmul.f32 0.015625, %v2791_v12  ;;  %2819 = vrot.lane.b32.xlu1 %v2810_v55, %s4979_s26  ;;  %v2315_v48 = vmul.f32 %v4841_v30, %v5898_v60  ;;  %v5982_v9 = vsub.f32 %v5858_v22, %v2804_v5  ;;  %v5996_v22 = vld [vmem:[%s6389_s7 + $0x1] ss:$0 sm:$0xff] }
 0xf33   :  { %4497 = vmatprep.subr.msk.bf16.mxu1 %vm412_vm0, %v2416_v27  ;;  %v2425_v35 = vsel %vm412_vm0, %v2416_v27, 0  ;;  %v2696_v2 = vpop.xlane.xlu1 %2695  ;;  %v2402_v56 = vmul.f32 %v5945_v41, %v2392_v23 }
 0xf34   :  { %v4843_v59 = vpop.eup %4842  ;;  %v5969_v1 = vsub.f32 %v5836_v28, %v2801_v53  ;;  %4422 = vmatpush3.bf16.xpose.msra.mxu1 %v2425_v35  ;;  %v2325_v7 = vmul.f32 %v5975_v50, %v2315_v48  ;;  %v2812_v42 = vmul.f32 %v5982_v9, %v5982_v9 }
 0xf35   :  { %v2393_v62 = vmul.f32 %v4843_v59, %v5907_v3  ;;  %v2797_v6 = vpop.xlane.xlu0 %2796  ;;  %v2412_v21 = vadd.f32 %v5953_v46, %v2402_v56 }
 0xf36   :  { %v4845_v8 = vpop.eup %4844  ;;  %v2809_v60 = vmul.f32 %v5969_v1, %v5969_v1  ;;  %v2803_v11 = vmul.f32 0.015625, %v2797_v6  ;;  %v2335_v44 = vadd.f32 %v5996_v22, %v2325_v7 }
 0xf37   :  { %v2403_v28 = vmul.f32 %v5945_v41, %v2393_v62  ;;  %v2317_v54 = vmul.f32 %v4845_v8, %v5919_v19  ;;  %v2702_v29 = vpop.xlane.xlu1 %2701 }
 0xf38   :  { %v4847_v61 = vpop.eup %4846  ;;  %v5985_v3 = vsub.f32 %v5850_v36, %v2803_v11  ;;  %2817 = vrot.lane.b32.xlu0 %v2809_v60, %s4979_s26  ;;  %v2704_v36 = vmul.f32 0.015625, %v2696_v2 }
 0xf39   :  { %v2314_v38 = vmul.f32 %v4847_v61, %v5913_v16  ;;  %v2693_v20 = vpop.xlane.xlu0 %2692  ;;  %v2413_v26 = vadd.f32 %v5953_v46, %v2403_v28  ;;  %v2327_v45 = vmul.f32 %v5975_v50, %v2317_v54 }
 0xf3a   :  { %v2811_v25 = vmul.f32 %v5985_v3, %v5985_v3  ;;  %v2703_v32 = vmul.f32 0.015625, %v2693_v20  ;;  %v6014_v18 = vsub.f32 %v5838_v34, %v2704_v36 }
 0xf3b   :  { %v2417_v17 = vpack.c.bf16 %v2413_v26, %v2412_v21  ;;  %v2324_v19 = vmul.f32 %v5975_v50, %v2314_v38  ;;  %v2337_v30 = vadd.f32 %v5996_v22, %v2327_v45 }
 0xf3c   :  { %v4849_v16 = vpop.eup %4848  ;;  %v6004_v37 = vsub.f32 %v5834_v31, %v2703_v32  ;;  %2821 = vrot.lane.b32.xlu1 %v2811_v25, %s4979_s26  ;;  %v2706_v31 = vmul.f32 0.015625, %v2702_v29  ;;  %v2712_v23 = vmul.f32 %v6014_v18, %v6014_v18 }
 0xf3d   :  { %v2316_v24 = vmul.f32 %v4849_v16, %v5922_v15  ;;  %4498 = vmatprep.subr.msk.bf16.mxu1 %vm412_vm0, %v2417_v17  ;;  %v2699_v58 = vpop.xlane.xlu0 %2698  ;;  %v2428_v49 = vsel %vm412_vm0, %v2417_v17, 0  ;;  %v2334_v52 = vadd.f32 %v5996_v22, %v2324_v19 }
 0xf3e   :  { %v2711_v4 = vmul.f32 %v6004_v37, %v6004_v37  ;;  %v2705_v14 = vmul.f32 0.015625, %v2699_v58  ;;  %4424 = vmatpush3.bf16.xpose.msra.mxu1 %v2428_v49  ;;  %v6031_v12 = vsub.f32 %v5852_v43, %v2706_v31 }
 0xf3f   :  { %v2326_v55 = vmul.f32 %v5975_v50, %v2316_v24  ;;  %4429 = vmatprep.subr.bf16.mxu1 %v5860_v47  ;;  %v2414_v15 = vpack.c.bf16 %v2335_v44, %v2334_v52 }
 0xf40   :  { %v6021_v57 = vsub.f32 %v5846_v33, %v2705_v14  ;;  %2823 = vrot.lane.b32.xlu1 %v2812_v42, %s4979_s26  ;;  %2719 = vrot.lane.b32.xlu0 %v2711_v4, %s4979_s26  ;;  %v2714_v53 = vmul.f32 %v6031_v12, %v6031_v12 }
 0xf41   :  { %4425 = vmatprep.mubr.msk.bf16.mxu1 %vm412_vm0, %v2414_v15  ;;  %v2336_v34 = vadd.f32 %v5996_v22, %v2326_v55 }
 0xf42   :  { %v2713_v33 = vmul.f32 %v6021_v57, %v6021_v57 }
 0xf43   :  { %v2415_v27 = vpack.c.bf16 %v2337_v30, %v2336_v34 }
 0xf44   :  { %2721 = vrot.lane.b32.xlu1 %v2712_v23, %s4979_s26  ;;  %2723 = vrot.lane.b32.xlu0 %v2713_v33, %s4979_s26 }
 0xf45   :  { %4426 = vmatmul.mubr.msk.bf16.vlgmr.msra.gmra.mrb[32].mxu1 %vm412_vm0, %v2415_v27 }
 0xf46   :  { %4430 = vmatpush3.bf16.msra.mxu1 %v5860_v47 }
 0xf47   :  { %4431 = vmatprep.subr.bf16.mxu1 %v5856_v40 }
 0xf48   :  { %2725 = vrot.lane.b32.xlu1 %v2714_v53, %s4979_s26 }
 0xf4a   :  { %4432 = vmatpush3.bf16.msra.mxu1 %v5856_v40 }
 0xfa4   :  { %v2820_v43 = vpop.permute.xlu1 %2819 }
 0xfa5   :  { %v2832_v60 = vsel %vm412_vm0, %v2820_v43, 0.0 }
 0xfaa   :  { %v2818_v35 = vpop.permute.xlu0 %2817 }
 0xfab   :  { %v2829_v6 = vsel %vm412_vm0, %v2818_v35, 0.0 }
 0xfae   :  { %v2822_v59 = vpop.permute.xlu1 %2821 }
 0xfaf   :  { %v2835_v61 = vsel %vm412_vm0, %v2822_v59, 0.0 }
 0xfb2   :  { %v2824_v48 = vpop.permute.xlu1 %2823  ;;  %v2720_v5 = vpop.permute.xlu0 %2719 }
 0xfb3   :  { %v2731_v62 = vsel %vm412_vm0, %v2720_v5, 0.0  ;;  %v2838_v54 = vsel %vm412_vm0, %v2824_v48, 0.0 }
 0xfb4   :  { %2732 = vadd.xlane.f32.xlu0 %v2731_v62 }
 0xfb6   :  { %v2722_v2 = vpop.permute.xlu1 %2721  ;;  %v2724_v8 = vpop.permute.xlu0 %2723 }
 0xfb7   :  { %v2734_v56 = vsel %vm412_vm0, %v2722_v2, 0.0  ;;  %v2737_v11 = vsel %vm412_vm0, %v2724_v8, 0.0 }
 0xfb8   :  { %2735 = vadd.xlane.f32.xlu1 %v2734_v56  ;;  %2830 = vadd.xlane.f32.xlu0 %v2829_v6 }
 0xfba   :  { %v2726_v28 = vpop.permute.xlu1 %2725 }
 0xfbb   :  { %v2740_v7 = vsel %vm412_vm0, %v2726_v28, 0.0 }
 0xfbc   :  { %2833 = vadd.xlane.f32.xlu1 %v2832_v60  ;;  %2738 = vadd.xlane.f32.xlu0 %v2737_v11 }
 0xfc0   :  { %2741 = vadd.xlane.f32.xlu1 %v2740_v7  ;;  %2836 = vadd.xlane.f32.xlu0 %v2835_v61 }
 0xfc4   :  { %2839 = vadd.xlane.f32.xlu0 %v2838_v54 }
 0xfd1   :  { %2864 = vrot.lane.b32.xlu1 %v5953_v46, %s4979_s26 }
 0xfd5   :  { %2759 = vrot.lane.b32.xlu1 %v5975_v50, %s4979_s26 }
 0xfd9   :  { %2766 = vrot.lane.b32.xlu1 %v5996_v22, %s4979_s26 }
 0xfda   :  { %2857 = vrot.lane.b32.xlu0 %v5945_v41, %s4979_s26 }
0x1018   :  { %v6060_v38 = vpop.f32.mrb[32].mxu1 }
0x1019   :  { %v6062_v20 = vpop.f32.mrb[33].mxu1 }
0x101a   :  { %v6064_v21 = vpop.f32.mrb[34].mxu1 }
0x101b   :  { %v6066_v26 = vpop.f32.mrb[35].mxu1 }
0x1041   :  { %v2733_v36 = vpop.xlane.xlu0 %2732 }
0x1042   :  { %v2743_v25 = vmul.f32 0.015625, %v2733_v36 }
0x1044   :  { %v2747_v22 = vadd.f32 1e-05, %v2743_v25 }
0x1045   :  { %v2736_v46 = vpop.xlane.xlu1 %2735  ;;  %v2831_v32 = vpop.xlane.xlu0 %2830 }
0x1046   :  { %v2744_v29 = vmul.f32 0.015625, %v2736_v46  ;;  %v2841_v50 = vmul.f32 0.015625, %v2831_v32 }
0x1048   :  { %v2748_v17 = vadd.f32 1e-05, %v2744_v29  ;;  %v2845_v19 = vadd.f32 1e-05, %v2841_v50 }
0x1049   :  { %v2834_v16 = vpop.xlane.xlu1 %2833  ;;  %v2739_v42 = vpop.xlane.xlu0 %2738 }
0x104a   :  { %4850 = vrsqrt.f32 %v2748_v17  ;;  %v2842_v41 = vmul.f32 0.015625, %v2834_v16  ;;  %v2745_v45 = vmul.f32 0.015625, %v2739_v42 }
0x104b   :  { %4852 = vrsqrt.f32 %v2845_v19 }
0x104c   :  { %v2846_v44 = vadd.f32 1e-05, %v2842_v41  ;;  %4854 = vrsqrt.f32 %v2747_v22  ;;  %v2749_v31 = vadd.f32 1e-05, %v2745_v45  ;;  %v6085_v45 = vld [vmem:[%s6383_s1] sm:$0xff] }
0x104d   :  { %v2742_v24 = vpop.xlane.xlu1 %2741  ;;  %v2837_v58 = vpop.xlane.xlu0 %2836 }
0x104e   :  { %4856 = vrsqrt.f32 %v2846_v44  ;;  %v2746_v49 = vmul.f32 0.015625, %v2742_v24  ;;  %v2843_v52 = vmul.f32 0.015625, %v2837_v58  ;;  %v6091_v58 = vld [vmem:[%s6383_s1 + $0x10] sm:$0xff] }
0x1050   :  { %v2750_v4 = vadd.f32 1e-05, %v2746_v49  ;;  %v2847_v14 = vadd.f32 1e-05, %v2843_v52  ;;  %v2482_v52 = vmul.f32 0.125, %v6064_v21  ;;  %v4953_v21 = vld [vmem:[%s6383_s1 + $0x8] sm:$0xff] }
0x1051   :  { %v2865_v55 = vpop.permute.xlu1 %2864  ;;  %v2840_v15 = vpop.xlane.xlu0 %2839 }
0x1052   :  { %4858 = vrsqrt.f32 %v2750_v4  ;;  %v2844_v34 = vmul.f32 0.015625, %v2840_v15 }
0x1053   :  { %4860 = vrsqrt.f32 %v2847_v14  ;;  %v2480_v14 = vmul.f32 0.125, %v6066_v26 }
0x1054   :  { %v4851_v30 = vpop.eup %4850  ;;  %4862 = vrsqrt.f32 %v2749_v31  ;;  %v2848_v23 = vadd.f32 1e-05, %v2844_v34 }
0x1055   :  { %v4853_v33 = vpop.eup %4852  ;;  %v2760_v27 = vpop.permute.xlu1 %2759  ;;  %v2756_v59 = vmul.f32 %v4851_v30, %v6014_v18  ;;  %v2484_v15 = vadd.f32 %v4953_v21, %v2480_v14 }
0x1056   :  { %4864 = vrsqrt.f32 %v2848_v23  ;;  %v2853_v53 = vmul.f32 %v4853_v33, %v5969_v1  ;;  %v2858_v43 = vpop.permute.xlu0 %2857  ;;  %v4855_v35 = vpop.eup %4854 }
0x1057   :  { %v2755_v2 = vmul.f32 %v4855_v35, %v6004_v37  ;;  %v2763_v6 = vmul.f32 %v2760_v27, %v2756_v59  ;;  %v2490_v34 = vsel %vm633_vm1, %v2484_v15, -inf }
0x1058   :  { %v4857_v48 = vpop.eup %4856  ;;  %v2860_v62 = vmul.f32 %v2858_v43, %v2853_v53 }
0x1059   :  { %v2854_v5 = vmul.f32 %v4857_v48, %v5957_v13  ;;  %v2767_v60 = vpop.permute.xlu1 %2766  ;;  %v2762_v28 = vmul.f32 %v2760_v27, %v2755_v2 }
0x105a   :  { %v2867_v61 = vadd.f32 %v2865_v55, %v2860_v62  ;;  %v2770_v25 = vadd.f32 %v2767_v60, %v2763_v6 }
0x105b   :  { %v2861_v56 = vmul.f32 %v2858_v43, %v2854_v5  ;;  %v2769_v18 = vadd.f32 %v2767_v60, %v2762_v28 }
0x105c   :  { %v4859_v8 = vpop.eup %4858 }
0x105d   :  { %v4861_v11 = vpop.eup %4860  ;;  %v2868_v7 = vadd.f32 %v2865_v55, %v2861_v56  ;;  %v2758_v36 = vmul.f32 %v4859_v8, %v6031_v12  ;;  %v2871_v19 = vpack.c.bf16 %v2770_v25, %v2769_v18 }
0x105e   :  { %v4863_v54 = vpop.eup %4862  ;;  %v2855_v1 = vmul.f32 %v4861_v11, %v5985_v3 }
0x105f   :  { %v2873_v46 = vpack.c.bf16 %v2868_v7, %v2867_v61  ;;  %v2757_v32 = vmul.f32 %v4863_v54, %v6021_v57  ;;  %v2765_v50 = vmul.f32 %v2760_v27, %v2758_v36  ;;  %v2481_v57 = vmul.f32 0.125, %v6060_v38  ;;  %v6099_v38 = vld [vmem:[%s6383_s1 + $0x18] sm:$0xff] }
0x1060   :  { %v4865_v13 = vpop.eup %4864  ;;  %v2862_v29 = vmul.f32 %v2858_v43, %v2855_v1  ;;  %v2486_v31 = vadd.f32 %v6099_v38, %v2482_v52 }
0x1061   :  { %v2856_v37 = vmul.f32 %v4865_v13, %v5982_v9  ;;  %2883 = vrot.lane.b32.xlu0 %v2873_v46, %s4979_s26  ;;  %v2764_v22 = vmul.f32 %v2760_v27, %v2757_v32  ;;  %v2772_v3 = vadd.f32 %v2767_v60, %v2765_v50  ;;  %v2479_v9 = vmul.f32 0.125, %v6062_v20 }
0x1062   :  { %v2869_v16 = vadd.f32 %v2865_v55, %v2862_v29  ;;  %v2485_v49 = vadd.f32 %v6091_v58, %v2481_v57 }
0x1063   :  { %v2863_v17 = vmul.f32 %v2858_v43, %v2856_v37  ;;  %v2771_v41 = vadd.f32 %v2767_v60, %v2764_v22  ;;  %v2483_v24 = vadd.f32 %v6085_v45, %v2479_v9 }
0x1064   :  { %v2493_v4 = vsel %vm633_vm1, %v2485_v49, -inf }
0x1065   :  { %v2870_v42 = vadd.f32 %v2865_v55, %v2863_v17  ;;  %2877 = vrot.lane.b32.xlu0 %v2871_v19, %s4979_s26  ;;  %v2872_v44 = vpack.c.bf16 %v2772_v3, %v2771_v41  ;;  %v2487_v20 = vsel %vm633_vm1, %v2483_v24, -inf  ;;  %v2496_v55 = vsel %vm633_vm1, %v2486_v31, -inf }
0x1067   :  { %v2874_v12 = vpack.c.bf16 %v2870_v42, %v2869_v16 }
0x1069   :  { %2885 = vrot.lane.b32.xlu1 %v2874_v12, %s4979_s26 }
0x106d   :  { %2879 = vrot.lane.b32.xlu1 %v2872_v44, %s4979_s26 }
0x1084   :  { %2488 = vmax.xlane.f32.xlu0 %v2487_v20 }
0x1088   :  { %2494 = vmax.xlane.f32.xlu0 %v2493_v4 }
0x108c   :  { %2497 = vmax.xlane.f32.xlu0 %v2496_v55 }
0x1091   :  { %2491 = vmax.xlane.f32.xlu1 %v2490_v34  ;;  %v4642_v34 = vld [vmem:[%s6393_s11 + $0x40] sm:$0xff]  }
0x1092   :  { %4437 = vmatprep.subr.bf16.mxu1 %v4642_v34 }
0x10d3   :  { %v2884_v30 = vpop.permute.xlu0 %2883 }
0x10d4   :  { %v2894_v23 = vsel %vm412_vm0, %v2884_v30, 0  ;;  %4499 = vmatprep.subr.msk.bf16.mxu0 %vm412_vm0, %v2884_v30  ;;  %v4643_v30 = vld [vmem:[%s6393_s11 + $0x48] sm:$0xff]  }
0x10d5   :  { %4450 = vmatpush3.bf16.xpose.msra.mxu0 %v2894_v23  ;;  %v4644_v23 = vld [vmem:[%s6393_s11 + $0x50] sm:$0xff]  }
0x10d7   :  { %v2878_v33 = vpop.permute.xlu0 %2877 }
0x10d8   :  { %4453 = vmatprep.mubr.msk.bf16.mxu0 %vm412_vm0, %v2878_v33  ;;  %v4645_v33 = vld [vmem:[%s6393_s11 + $0x58] sm:$0xff]  }
0x10db   :  { %v2886_v26 = vpop.permute.xlu1 %2885 }
0x10dc   :  { %v2897_v27 = vsel %vm412_vm0, %v2886_v26, 0  ;;  %4500 = vmatprep.subr.msk.bf16.mxu0 %vm412_vm0, %v2886_v26 }
0x10dd   :  { %4452 = vmatpush3.bf16.xpose.msra.mxu0 %v2897_v27 }
0x10df   :  { %v2880_v53 = vpop.permute.xlu1 %2879 }
0x10e4   :  { %4454 = vmatmul.mubr.msk.bf16.vlgmr.msra.gmra.mrb[36].mxu0 %vm412_vm0, %v2880_v53 }
0x10e5   :  { %3445 = vmatprep.mubr.bf16.mxu0 %v4978_v39 }
0x1111   :  { %v2489_v43 = vpop.xlane.xlu0 %2488 }
0x1112   :  { %v2499_v35 = vsub.f32 %v2483_v24, %v2489_v43 }
0x1114   :  { %v2503_v59 = vmul.f32 1.442695, %v2499_v35 }
0x1115   :  { %v2495_v48 = vpop.xlane.xlu0 %2494 }
0x1116   :  { %4866 = vpow2.f32 %v2503_v59  ;;  %v2501_v5 = vsub.f32 %v2485_v49, %v2495_v48 }
0x1118   :  { %v2507_v62 = vmul.f32 1.442695, %v2501_v5 }
0x1119   :  { %v2498_v2 = vpop.xlane.xlu0 %2497 }
0x111a   :  { %4868 = vpow2.f32 %v2507_v62  ;;  %v2502_v6 = vsub.f32 %v2486_v31, %v2498_v2 }
0x111c   :  { %v2509_v11 = vmul.f32 1.442695, %v2502_v6 }
0x111e   :  { %v2492_v56 = vpop.xlane.xlu1 %2491 }
0x111f   :  { %v2500_v8 = vsub.f32 %v2484_v15, %v2492_v56 }
0x1120   :  { %v4867_v60 = vpop.eup %4866 }
0x1121   :  { %v2505_v28 = vmul.f32 1.442695, %v2500_v8  ;;  %v2511_v61 = vsel %vm633_vm1, %v4867_v60, 0.0 }
0x1122   :  { %2512 = vadd.xlane.f32.xlu0 %v2511_v61 }
0x1123   :  { %4870 = vpow2.f32 %v2505_v28 }
0x1124   :  { %v4869_v7 = vpop.eup %4868  ;;  %4872 = vpow2.f32 %v2509_v11 }
0x1125   :  { %v2517_v54 = vsel %vm633_vm1, %v4869_v7, 0.0 }
0x1126   :  { %2518 = vadd.xlane.f32.xlu0 %v2517_v54 }
0x112d   :  { %v4871_v1 = vpop.eup %4870 }
0x112e   :  { %v2514_v36 = vsel %vm633_vm1, %v4871_v1, 0.0  ;;  %v4873_v18 = vpop.eup %4872 }
0x112f   :  { %2515 = vadd.xlane.f32.xlu1 %v2514_v36  ;;  %v2520_v25 = vsel %vm633_vm1, %v4873_v18, 0.0 }
0x1133   :  { %2521 = vadd.xlane.f32.xlu1 %v2520_v25 }
0x11af   :  { %v2513_v46 = vpop.xlane.xlu0 %2512 }
0x11b0   :  { %4874 = vrcp.f32 %v2513_v46 }
0x11b3   :  { %v2519_v42 = vpop.xlane.xlu0 %2518 }
0x11b7   :  { %v4455_v13 = vpop.f32.mrb[36].mxu0 }
0x11b8   :  { %v2933_v32 = vpop.f32.mrb[37].mxu0  ;;  %v2950_v37 = vmul.f32 0.125, %v4455_v13 }
0x11b9   :  { %v2948_v29 = vmul.f32 0.125, %v2933_v32  ;;  %v4456_v50 = vpop.f32.mrb[38].mxu0 }
0x11ba   :  { %v2936_v17 = vpop.f32.mrb[39].mxu0  ;;  %v2951_v22 = vmul.f32 0.125, %v4456_v50  ;;  %v2954_v12 = vadd.f32 %v6091_v58, %v2950_v37  ;;  %v4875_v58 = vpop.eup %4874 }
0x11bb   :  { %v2952_v19 = vadd.f32 %v6085_v45, %v2948_v29  ;;  %v2949_v16 = vmul.f32 0.125, %v2936_v17  ;;  %v2527_v20 = vmul.f32 %v4875_v58, %v4867_v60  ;;  %v4649_v58 = vld [vmem:[%s6393_s11 + $0x78] sm:$0xff]  }
0x11bc   :  { %v2516_v3 = vpop.xlane.xlu1 %2515  ;;  %v2955_v9 = vadd.f32 %v6099_v38, %v2951_v22  ;;  %v2962_v45 = vsel %vm633_vm1, %v2954_v12, -inf }
0x11bd   :  { %v2953_v41 = vadd.f32 %v4953_v21, %v2949_v16  ;;  %4876 = vrcp.f32 %v2516_v3  ;;  %v2956_v44 = vsel %vm633_vm1, %v2952_v19, -inf }
0x11be   :  { %2957 = vmax.xlane.f32.xlu0 %v2956_v44  ;;  %4878 = vrcp.f32 %v2519_v42  ;;  %v2965_v49 = vsel %vm633_vm1, %v2955_v9, -inf }
0x11bf   :  { %v2959_v57 = vsel %vm633_vm1, %v2953_v41, -inf }
0x11c0   :  { %2960 = vmax.xlane.f32.xlu1 %v2959_v57  ;;  %v2522_v24 = vpop.xlane.xlu1 %2521 }
0x11c1   :  { %4880 = vrcp.f32 %v2522_v24 }
0x11c2   :  { %2963 = vmax.xlane.f32.xlu0 %v2962_v45  ;;  %v4647_v45 = vld [vmem:[%s6393_s11 + $0x68] sm:$0xff]  }
0x11c4   :  { %2966 = vmax.xlane.f32.xlu1 %v2965_v49  ;;  %v4648_v49 = vld [vmem:[%s6393_s11 + $0x70] sm:$0xff]  }
0x11c7   :  { %v4877_v52 = vpop.eup %4876 }
0x11c8   :  { %v2528_v31 = vmul.f32 %v4877_v52, %v4871_v1  ;;  %v4879_v4 = vpop.eup %4878 }
0x11c9   :  { %v2529_v21 = vmul.f32 %v4879_v4, %v4869_v7 }
0x11ca   :  { %v2531_v14 = vpack.c.bf16 %v2528_v31, %v2527_v20 }
0x11cb   :  { %v4881_v55 = vpop.eup %4880 }
0x11cc   :  { %v2530_v38 = vmul.f32 %v4881_v55, %v4873_v18  ;;  %4433 = vmatprep.mubr.msk.bf16.mxu1 %vm633_vm1, %v2531_v14 }
0x11ce   :  { %v2532_v15 = vpack.c.bf16 %v2530_v38, %v2529_v21 }
0x11d0   :  { %4434 = vmatmul.mubr.msk.bf16.vlgmr.msra.gmra.mrb[36].mxu1 %vm633_vm1, %v2532_v15 }
0x11d1   :  { %4438 = vmatpush3.bf16.msra.mxu1 %v4642_v34 }
0x11d2   :  { %4439 = vmatprep.subr.bf16.mxu1 %v4643_v30 }
0x11d5   :  { %4440 = vmatpush3.bf16.msra.mxu1 %v4643_v30 }
0x11d6   :  { %4441 = vmatprep.subr.bf16.mxu1 %v4644_v23 }
0x11d9   :  { %4442 = vmatpush3.bf16.msra.mxu1 %v4644_v23 }
0x11da   :  { %4443 = vmatprep.subr.bf16.mxu1 %v4645_v33 }
0x11dd   :  { %4444 = vmatpush3.bf16.msra.mxu1 %v4645_v33 }
0x124b   :  { %v2958_v26 = vpop.xlane.xlu0 %2957 }
0x124c   :  { %v2968_v27 = vsub.f32 %v2952_v19, %v2958_v26  ;;  %v4646_v19 = vld [vmem:[%s6393_s11 + $0x60] sm:$0xff]  }
0x124d   :  { %v2961_v53 = vpop.xlane.xlu1 %2960 }
0x124e   :  { %v2969_v35 = vsub.f32 %v2953_v41, %v2961_v53  ;;  %v2972_v48 = vmul.f32 1.442695, %v2968_v27  ;;  %v4658_v27 = vld [vmem:[%s6394_s12 + $0x124] ss:$16 sps:$4 sm:$0xff]   ;;  %v4661_v53 = vld [vmem:[%s6394_s12 + $0x12c] ss:$16 sps:$4 sm:$0xff]  }
0x124f   :  { %v2964_v43 = vpop.xlane.xlu0 %2963 }
0x1250   :  { %v2970_v59 = vsub.f32 %v2954_v12, %v2964_v43  ;;  %v2974_v6 = vmul.f32 1.442695, %v2969_v35  ;;  %v4656_v43 = vld [vmem:[%s6394_s12 + $0x120] ss:$16 sps:$4 sm:$0xff]   ;;  %v4659_v35 = vld [vmem:[%s6394_s12 + $0x128] ss:$16 sps:$4 sm:$0xff]  }
0x1251   :  { %v2967_v5 = vpop.xlane.xlu1 %2966 }
0x1252   :  { %v2976_v62 = vmul.f32 1.442695, %v2970_v59  ;;  %v2971_v2 = vsub.f32 %v2955_v9, %v2967_v5 }
0x1254   :  { %4882 = vpow2.f32 %v2976_v62  ;;  %v2978_v56 = vmul.f32 1.442695, %v2971_v2 }
0x1255   :  { %4884 = vpow2.f32 %v2972_v48 }
0x1256   :  { %4886 = vpow2.f32 %v2978_v56 }
0x1257   :  { %4888 = vpow2.f32 %v2974_v6 }
0x125e   :  { %v4883_v8 = vpop.eup %4882 }
0x125f   :  { %v4885_v60 = vpop.eup %4884  ;;  %v2986_v11 = vsel %vm633_vm1, %v4883_v8, 0.0 }
0x1260   :  { %v4887_v28 = vpop.eup %4886  ;;  %2987 = vadd.xlane.f32.xlu0 %v2986_v11  ;;  %v2980_v54 = vsel %vm633_vm1, %v4885_v60, 0.0 }
0x1261   :  { %v2989_v61 = vsel %vm633_vm1, %v4887_v28, 0.0  ;;  %v4889_v7 = vpop.eup %4888 }
0x1262   :  { %2990 = vadd.xlane.f32.xlu1 %v2989_v61  ;;  %v2983_v1 = vsel %vm633_vm1, %v4889_v7, 0.0 }
0x1264   :  { %2981 = vadd.xlane.f32.xlu0 %v2980_v54 }
0x1266   :  { %2984 = vadd.xlane.f32.xlu1 %v2983_v1 }
0x1277   :  { %3006 = vrot.lane.b32.xlu1 %v5856_v40, %s4979_s26 }
0x127a   :  { %3004 = vrot.lane.b32.xlu0 %v5860_v47, %s4979_s26 }
0x12a3   :  { %v4435_v36 = vpop.f32.mrb[36].mxu1 }
0x12a4   :  { %v2575_v18 = vpop.f32.mrb[37].mxu1 }
0x12a5   :  { %v4436_v25 = vpop.f32.mrb[38].mxu1 }
0x12a6   :  { %v2591_v46 = vpack.c.bf16 %v4436_v25, %v4435_v36  ;;  %v2578_v13 = vpop.f32.mrb[39].mxu1  ;;  %v4667_v25 = vld [vmem:[%s6394_s12 + $0x14c] ss:$16 sps:$4 sm:$0xff]  }
0x12a7   :  { %v2590_v32 = vpack.c.bf16 %v2578_v13, %v2575_v18  ;;  %v4664_v18 = vld [vmem:[%s6394_s12 + $0x144] ss:$16 sps:$4 sm:$0xff]   ;;  %v4665_v13 = vld [vmem:[%s6394_s12 + $0x148] ss:$16 sps:$4 sm:$0xff]  }
0x12a9   :  { %4445 = vmatprep.mubr.msk.bf16.mxu1 %vm412_vm0, %v2590_v32  ;;  %v4670_v32 = vld [vmem:[%s6394_s12 + $0x164] ss:$16 sps:$4 sm:$0xff]  }
0x12aa   :  { %4446 = vmatmul.mubr.msk.bf16.vlgmr.msra.gmra.mrb[40].mxu1 %vm412_vm0, %v2591_v46  ;;  %v4662_v46 = vld [vmem:[%s6394_s12 + $0x140] ss:$16 sps:$4 sm:$0xff]  }
0x12ed   :  { %v2988_v37 = vpop.xlane.xlu0 %2987 }
0x12ef   :  { %v2991_v29 = vpop.xlane.xlu1 %2990 }
0x12f0   :  { %4890 = vrcp.f32 %v2991_v29  ;;  %v4668_v29 = vld [vmem:[%s6394_s12 + $0x160] ss:$16 sps:$4 sm:$0xff]  }
0x12f1   :  { %v2982_v50 = vpop.xlane.xlu0 %2981 }
0x12f2   :  { %4892 = vrcp.f32 %v2982_v50  ;;  %v4671_v50 = vld [vmem:[%s6394_s12 + $0x168] ss:$16 sps:$4 sm:$0xff]  }
0x12f3   :  { %4894 = vrcp.f32 %v2988_v37  ;;  %v2985_v40 = vpop.xlane.xlu1 %2984  ;;  %v4673_v37 = vld [vmem:[%s6394_s12 + $0x16c] ss:$16 sps:$4 sm:$0xff]  }
0x12f4   :  { %4896 = vrcp.f32 %v2985_v40  ;;  %v4676_v40 = vld [vmem:[%s6394_s12 + $0x184] ss:$16 sps:$4 sm:$0xff]  }
0x12f5   :  { %v3005_v17 = vpop.permute.xlu0 %3004 }
0x12f6   :  { %4457 = vmatprep.subr.bf16.mxu1 %v3005_v17 }
0x12f7   :  { %v3007_v47 = vpop.permute.xlu1 %3006  ;;  %4458 = vmatpush3.bf16.msra.mxu1 %v3005_v17  ;;  %v4679_v17 = vld [vmem:[%s6394_s12 + $0x18c] ss:$16 sps:$4 sm:$0xff]  }
0x12f8   :  { %4459 = vmatprep.subr.bf16.mxu1 %v3007_v47 }
0x12fa   :  { %v4891_v22 = vpop.eup %4890 }
0x12fb   :  { %4460 = vmatpush3.bf16.msra.mxu1 %v3007_v47  ;;  %v2999_v12 = vmul.f32 %v4891_v22, %v4887_v28  ;;  %v4674_v47 = vld [vmem:[%s6394_s12 + $0x180] ss:$16 sps:$4 sm:$0xff]   ;;  %v4682_v22 = vld [vmem:[%s6394_s12 + $0x1a4] ss:$16 sps:$4 sm:$0xff]  }
0x12fc   :  { %v4893_v16 = vpop.eup %4892  ;;  %4465 = vmatprep.subr.bf16.mxu1 %v4646_v19 }
0x12fd   :  { %v4895_v42 = vpop.eup %4894  ;;  %v2996_v41 = vmul.f32 %v4893_v16, %v4885_v60  ;;  %v4685_v16 = vld [vmem:[%s6394_s12 + $0x1ac] ss:$16 sps:$4 sm:$0xff]  }
0x12fe   :  { %v4897_v3 = vpop.eup %4896  ;;  %v2998_v9 = vmul.f32 %v4895_v42, %v4883_v8  ;;  %v4680_v42 = vld [vmem:[%s6394_s12 + $0x1a0] ss:$16 sps:$4 sm:$0xff]  }
0x12ff   :  { %v2997_v44 = vmul.f32 %v4897_v3, %v4889_v7  ;;  %v4683_v3 = vld [vmem:[%s6394_s12 + $0x1a8] ss:$16 sps:$4 sm:$0xff]  }
0x1300   :  { %v3001_v24 = vpack.c.bf16 %v2999_v12, %v2998_v9  ;;  %v4688_v12 = vld [vmem:[%s6394_s12 + $0x1c4] ss:$16 sps:$4 sm:$0xff]   ;;  %v4689_v9 = vld [vmem:[%s6394_s12 + $0x1c8] ss:$16 sps:$4 sm:$0xff]  }
0x1301   :  { %v3000_v57 = vpack.c.bf16 %v2997_v44, %v2996_v41  ;;  %v4691_v41 = vld [vmem:[%s6394_s12 + $0x1cc] ss:$16 sps:$4 sm:$0xff]   ;;  %v4686_v44 = vld [vmem:[%s6394_s12 + $0x1c0] ss:$16 sps:$4 sm:$0xff]  }
0x1303   :  { %4461 = vmatprep.mubr.msk.bf16.mxu1 %vm633_vm1, %v3000_v57  ;;  %v4694_v57 = vld [vmem:[%s6394_s12 + $0x1e4] ss:$16 sps:$4 sm:$0xff]  }
0x1304   :  { %4462 = vmatmul.mubr.msk.bf16.vlgmr.msra.gmra.mrb[44].mxu1 %vm633_vm1, %v3001_v24  ;;  %v4697_v24 = vld [vmem:[%s6394_s12 + $0x1ec] ss:$16 sps:$4 sm:$0xff]  }
0x1305   :  { %4466 = vmatpush3.bf16.msra.mxu1 %v4646_v19  ;;  %v4677_v19 = vld [vmem:[%s6394_s12 + $0x188] ss:$16 sps:$4 sm:$0xff]  }
0x1306   :  { %4467 = vmatprep.subr.bf16.mxu1 %v4647_v45 }
0x1309   :  { %4468 = vmatpush3.bf16.msra.mxu1 %v4647_v45  ;;  %v4692_v45 = vld [vmem:[%s6394_s12 + $0x1e0] ss:$16 sps:$4 sm:$0xff]  }
0x130a   :  { %4469 = vmatprep.subr.bf16.mxu1 %v4648_v49 }
0x130d   :  { %4470 = vmatpush3.bf16.msra.mxu1 %v4648_v49  ;;  %v4695_v49 = vld [vmem:[%s6394_s12 + $0x1e8] ss:$16 sps:$4 sm:$0xff]  }
0x130e   :  { %4471 = vmatprep.subr.bf16.mxu1 %v4649_v58 }
0x1311   :  { %4472 = vmatpush3.bf16.msra.mxu1 %v4649_v58 }
0x13d7   :  { %v4463_v52 = vpop.f32.mrb[44].mxu1 }
0x13d8   :  { %v3050_v20 = vpop.f32.mrb[45].mxu1 }
0x13d9   :  { %v4464_v31 = vpop.f32.mrb[46].mxu1 }
0x13da   :  { %v3066_v4 = vpack.c.bf16 %v4464_v31, %v4463_v52  ;;  %v3053_v14 = vpop.f32.mrb[47].mxu1 }
0x13db   :  { %v3065_v55 = vpack.c.bf16 %v3053_v14, %v3050_v20 }
0x13dd   :  { %4473 = vmatprep.mubr.msk.bf16.mxu1 %vm412_vm0, %v3065_v55 }
0x13de   :  { %4474 = vmatmul.mubr.msk.bf16.vlgmr.msra.gmra.mrb[40].mxu1 %vm412_vm0, %v3066_v4 }
0x13df   :  { %3498 = vmatprep.mubr.bf16.mxu1 %v4978_v39 }
0x14b1   :  { %v4475_v21 = vpop.f32.mrb[40].mxu1 }
0x14b2   :  { %v3131_v38 = vpop.f32.mrb[41].mxu1  ;;  %v6180_v26 = vadd.f32 %v4475_v21, %v5724_v10  ;;  %v4655_v10 = vld [vmem:[%s6394_s12 + $0x10c] ss:$16 sps:$4 sm:$0xff]  }
0x14b3   :  { %v6169_v15 = vadd.f32 %v3131_v38, %v5716_v63  ;;  %v4476_v34 = vpop.f32.mrb[42].mxu1  ;;  %v4650_v63 = vld [vmem:[%s6394_s12 + $0x100] ss:$16 sps:$4 sm:$0xff]   ;;  %3466 = vmatprep.subr.bf16.mxu1 %v4655_v10 }
0x14b4   :  { %v3134_v30 = vpop.f32.mrb[43].mxu1  ;;  %v6176_v33 = vadd.f32 %v4476_v34, %v5727_v51  ;;  %v4653_v51 = vld [vmem:[%s6394_s12 + $0x108] ss:$16 sps:$4 sm:$0xff]  }
0x14b5   :  { %v6172_v23 = vadd.f32 %v3134_v30, %v5719_v0  ;;  %3154 = vadd.xlane.f32.xlu1 %v6169_v15  ;;  %v4652_v0 = vld [vmem:[%s6394_s12 + $0x104] ss:$16 sps:$4 sm:$0xff]   ;;  %3467 = vmatpush1.bf16.msra.mxu1 %v4653_v51  ;;  %v4069_v51 = vld [vmem:[%s6386_s4 + $0x1] ss:$0 sm:$0xff] }
0x14b6   :  { %3413 = vmatprep.subr.bf16.mxu0 %v4652_v0  ;;  %3468 = vmatprep.subr.bf16.mxu1 %v4661_v53 }
0x14b7   :  { %3156 = vadd.xlane.f32.xlu0 %v6172_v23  ;;  %3414 = vmatpush1.bf16.msra.mxu0 %v4650_v63 }
0x14b8   :  { %3415 = vmatprep.subr.bf16.mxu0 %v4658_v27 }
0x14b9   :  { %3160 = vadd.xlane.f32.xlu1 %v6176_v33  ;;  %3469 = vmatpush1.bf16.msra.mxu1 %v4659_v35  ;;  %v4070_v35 = vld [vmem:[%s6387_s5 + $0x1] ss:$0 sm:$0xff] }
0x14ba   :  { %3470 = vmatprep.subr.bf16.mxu1 %v4667_v25  ;;  %v4703_v25 = vld [vmem:[%s6395_s13 + $0x90] sm:$0xff]  }
0x14bb   :  { %3158 = vadd.xlane.f32.xlu0 %v6180_v26  ;;  %3416 = vmatpush1.bf16.msra.mxu0 %v4656_v43 }
0x14bc   :  { %3417 = vmatprep.subr.bf16.mxu0 %v4664_v18  ;;  %v4702_v18 = vld [vmem:[%s6395_s13 + $0xd0] sm:$0xff]  }
0x14bd   :  { %3471 = vmatpush1.bf16.msra.mxu1 %v4665_v13  ;;  %v4705_v13 = vld [vmem:[%s6395_s13 + $0x98] sm:$0xff]  }
0x14be   :  { %3472 = vmatprep.subr.bf16.mxu1 %v4673_v37  ;;  %v4707_v37 = vld [vmem:[%s6395_s13 + $0xa0] sm:$0xff]  }
0x14bf   :  { %3418 = vmatpush1.bf16.msra.mxu0 %v4662_v46  ;;  %v4704_v46 = vld [vmem:[%s6395_s13 + $0xd8] sm:$0xff]  }
0x14c0   :  { %3419 = vmatprep.subr.bf16.mxu0 %v4670_v32  ;;  %v4706_v32 = vld [vmem:[%s6395_s13 + $0xe0] sm:$0xff]  }
0x14c1   :  { %3473 = vmatpush1.bf16.msra.mxu1 %v4671_v50  ;;  %v4709_v50 = vld [vmem:[%s6395_s13 + $0xa8] sm:$0xff]  }
0x14c2   :  { %3474 = vmatprep.subr.bf16.mxu1 %v4679_v17  ;;  %v4711_v17 = vld [vmem:[%s6395_s13 + $0xb0] sm:$0xff]  }
0x14c3   :  { %3420 = vmatpush1.bf16.msra.mxu0 %v4668_v29  ;;  %v4708_v29 = vld [vmem:[%s6395_s13 + $0xe8] sm:$0xff]  }
0x14c4   :  { %3421 = vmatprep.subr.bf16.mxu0 %v4676_v40  ;;  %v4710_v40 = vld [vmem:[%s6395_s13 + $0xf0] sm:$0xff]  }
0x14c5   :  { %3475 = vmatpush1.bf16.msra.mxu1 %v4677_v19  ;;  %v4713_v19 = vld [vmem:[%s6395_s13 + $0xb8] sm:$0xff]  }
0x14c6   :  { %3476 = vmatprep.subr.bf16.mxu1 %v4685_v16 }
0x14c7   :  { %3422 = vmatpush1.bf16.msra.mxu0 %v4674_v47  ;;  %v4712_v47 = vld [vmem:[%s6395_s13 + $0xf8] sm:$0xff]  }
0x14c8   :  { %3423 = vmatprep.subr.bf16.mxu0 %v4682_v22 }
0x14c9   :  { %3477 = vmatpush1.bf16.msra.mxu1 %v4683_v3 }
0x14ca   :  { %3478 = vmatprep.subr.bf16.mxu1 %v4691_v41 }
0x14cb   :  { %3424 = vmatpush1.bf16.msra.mxu0 %v4680_v42 }
0x14cc   :  { %3425 = vmatprep.subr.bf16.mxu0 %v4688_v12 }
0x14cd   :  { %3479 = vmatpush1.bf16.msra.mxu1 %v4689_v9 }
0x14ce   :  { %3480 = vmatprep.subr.bf16.mxu1 %v4697_v24 }
0x14cf   :  { %3426 = vmatpush1.bf16.msra.mxu0 %v4686_v44 }
0x14d0   :  { %3427 = vmatprep.subr.bf16.mxu0 %v4694_v57 }
0x14d1   :  { %3481 = vmatpush1.bf16.msra.mxu1 %v4695_v49 }
0x14d3   :  { %3428 = vmatpush1.bf16.msra.mxu0 %v4692_v45 }
0x1542   :  { %v3155_v59 = vpop.xlane.xlu1 %3154 }
0x1543   :  { %v3162_v48 = vmul.f32 0.0078125, %v3155_v59 }
0x1544   :  { %v3157_v5 = vpop.xlane.xlu0 %3156 }
0x1545   :  { %v6209_v62 = vsub.f32 %v6169_v15, %v3162_v48  ;;  %v3163_v2 = vmul.f32 0.0078125, %v3157_v5 }
0x1546   :  { %v3161_v6 = vpop.xlane.xlu1 %3160 }
0x1547   :  { %v6212_v56 = vsub.f32 %v6172_v23, %v3163_v2  ;;  %v3165_v8 = vmul.f32 0.0078125, %v3161_v6  ;;  %v3170_v60 = vmul.f32 %v6209_v62, %v6209_v62 }
0x1548   :  { %v3159_v11 = vpop.xlane.xlu0 %3158 }
0x1549   :  { %v6217_v28 = vsub.f32 %v6176_v33, %v3165_v8  ;;  %v3164_v61 = vmul.f32 0.0078125, %v3159_v11  ;;  %3174 = vadd.xlane.f32.xlu0 %v3170_v60  ;;  %v3171_v7 = vmul.f32 %v6212_v56, %v6212_v56 }
0x154b   :  { %v6222_v54 = vsub.f32 %v6180_v26, %v3164_v61  ;;  %3176 = vadd.xlane.f32.xlu1 %v3171_v7  ;;  %v3173_v1 = vmul.f32 %v6217_v28, %v6217_v28 }
0x154d   :  { %v3172_v36 = vmul.f32 %v6222_v54, %v6222_v54 }
0x154f   :  { %3180 = vadd.xlane.f32.xlu1 %v3173_v1  ;;  %3178 = vadd.xlane.f32.xlu0 %v3172_v36  ;;  %v4700_v36 = vld [vmem:[%s6395_s13 + $0xc8] sm:$0xff]  }
0x15d6   :  { %v3175_v58 = vpop.xlane.xlu0 %3174 }
0x15d7   :  { %v3182_v52 = vmul.f32 0.0078125, %v3175_v58 }
0x15d8   :  { %v3177_v20 = vpop.xlane.xlu1 %3176 }
0x15d9   :  { %v3186_v31 = vadd.f32 1e-05, %v3182_v52  ;;  %v3183_v4 = vmul.f32 0.0078125, %v3177_v20 }
0x15db   :  { %4898 = vrsqrt.f32 %v3186_v31  ;;  %v3187_v14 = vadd.f32 1e-05, %v3183_v4 }
0x15dc   :  { %v3181_v55 = vpop.xlane.xlu1 %3180  ;;  %v3179_v21 = vpop.xlane.xlu0 %3178 }
0x15dd   :  { %4900 = vrsqrt.f32 %v3187_v14  ;;  %v3185_v38 = vmul.f32 0.0078125, %v3181_v55  ;;  %v3184_v34 = vmul.f32 0.0078125, %v3179_v21 }
0x15df   :  { %v3189_v30 = vadd.f32 1e-05, %v3185_v38  ;;  %v3188_v63 = vadd.f32 1e-05, %v3184_v34 }
0x15e1   :  { %4902 = vrsqrt.f32 %v3189_v30 }
0x15e2   :  { %4904 = vrsqrt.f32 %v3188_v63 }
0x15e5   :  { %v4899_v0 = vpop.eup %4898 }
0x15e6   :  { %v3194_v10 = vmul.f32 %v4899_v0, %v6209_v62 }
0x15e7   :  { %v4901_v27 = vpop.eup %4900 }
0x15e8   :  { %v3195_v53 = vmul.f32 %v4901_v27, %v6212_v56  ;;  %v3204_v43 = vmul.f32 %v4069_v51, %v3194_v10 }
0x15ea   :  { %v3205_v59 = vmul.f32 %v4069_v51, %v3195_v53  ;;  %v3214_v2 = vadd.f32 %v4070_v35, %v3204_v43 }
0x15eb   :  { %v4903_v48 = vpop.eup %4902 }
0x15ec   :  { %v4905_v5 = vpop.eup %4904  ;;  %v3215_v6 = vadd.f32 %v4070_v35, %v3205_v59  ;;  %v3197_v8 = vmul.f32 %v4903_v48, %v6217_v28  ;;  %v4698_v28 = vld [vmem:[%s6395_s13 + $0xc0] sm:$0xff]  }
0x15ed   :  { %v3196_v60 = vmul.f32 %v4905_v5, %v6222_v54  ;;  %v4699_v54 = vld [vmem:[%s6395_s13 + $0x80] sm:$0xff]   ;;  %4297 = vmatprep.subr.bf16.mxu0 %v4698_v28 }
0x15ee   :  { %v3218_v11 = vpack.c.bf16 %v3215_v6, %v3214_v2  ;;  %v3207_v61 = vmul.f32 %v4069_v51, %v3197_v8 }
0x15ef   :  { %v3206_v62 = vmul.f32 %v4069_v51, %v3196_v60 }
0x15f0   :  { %3446 = vmatmul.mubr.bf16.vlgmr.msra.gmra.mrb[40].mxu0 %v3218_v11  ;;  %3499 = vmatmul.mubr.bf16.vlgmr.msra.gmra.mrb[48].mxu1 %v3218_v11  ;;  %v3217_v7 = vadd.f32 %v4070_v35, %v3207_v61 }
0x15f1   :  { %3455 = vmatprep.mubr.bf16.mxu0 %v4978_v39  ;;  %3508 = vmatprep.mubr.bf16.mxu1 %v4978_v39  ;;  %v3216_v56 = vadd.f32 %v4070_v35, %v3206_v62  ;;  %v4701_v39 = vld [vmem:[%s6395_s13 + $0x88] sm:$0xff]  }
0x15f2   :  { %4298 = vmatpush3.bf16.msra.mxu0 %v4699_v54 }
0x15f3   :  { %v3219_v1 = vpack.c.bf16 %v3217_v7, %v3216_v56  ;;  %4299 = vmatprep.subr.bf16.mxu0 %v4700_v36 }
0x15f6   :  { %4300 = vmatpush3.bf16.msra.mxu0 %v4701_v39 }
0x15f7   :  { %4301 = vmatprep.subr.bf16.mxu0 %v4702_v18 }
0x15f8   :  { %3456 = vmatmul.mubr.bf16.gmra.mrb[44].mxu0 %v3219_v1  ;;  %3509 = vmatmul.mubr.bf16.gmra.mrb[52].mxu1 %v3219_v1 }
0x15fa   :  { %4302 = vmatpush3.bf16.msra.mxu0 %v4703_v25 }
0x15fb   :  { %4303 = vmatprep.subr.bf16.mxu0 %v4704_v46 }
0x15fe   :  { %4304 = vmatpush3.bf16.msra.mxu0 %v4705_v13 }
0x15ff   :  { %4305 = vmatprep.subr.bf16.mxu0 %v4706_v32 }
0x1602   :  { %4306 = vmatpush3.bf16.msra.mxu0 %v4707_v37 }
0x1603   :  { %4307 = vmatprep.subr.bf16.mxu0 %v4708_v29 }
0x1606   :  { %4308 = vmatpush3.bf16.msra.mxu0 %v4709_v50 }
0x1607   :  { %4309 = vmatprep.subr.bf16.mxu0 %v4710_v40 }
0x160a   :  { %4310 = vmatpush3.bf16.msra.mxu0 %v4711_v17 }
0x160b   :  { %4311 = vmatprep.subr.bf16.mxu0 %v4712_v47 }
0x160e   :  { %4312 = vmatpush3.bf16.msra.mxu0 %v4713_v19 }
0x16c3   :  { %v3447_v22 = vpop.f32.mrb[40].mxu0  ;;  %v3500_v16 = vpop.f32.mrb[48].mxu1 }
0x16c4   :  { %v4135_v42 = vmul.f32 -1.442695, %v3447_v22  ;;  %v3449_v3 = vpop.f32.mrb[41].mxu0  ;;  %v3502_v12 = vpop.f32.mrb[49].mxu1 }
0x16c5   :  { %v4136_v41 = vmul.f32 -1.442695, %v3449_v3  ;;  %v3451_v44 = vpop.f32.mrb[42].mxu0  ;;  %v3504_v9 = vpop.f32.mrb[50].mxu1 }
0x16c6   :  { %4906 = vpow2.f32 %v4135_v42  ;;  %v4137_v57 = vmul.f32 -1.442695, %v3451_v44  ;;  %v3453_v24 = vpop.f32.mrb[43].mxu0  ;;  %v3506_v45 = vpop.f32.mrb[51].mxu1 }
0x16c7   :  { %4908 = vpow2.f32 %v4136_v41  ;;  %v4138_v49 = vmul.f32 -1.442695, %v3453_v24 }
0x16c8   :  { %4910 = vpow2.f32 %v4137_v57 }
0x16c9   :  { %4912 = vpow2.f32 %v4138_v49 }
0x16cb   :  { %v3457_v58 = vpop.f32.mrb[44].mxu0  ;;  %v3510_v52 = vpop.f32.mrb[52].mxu1 }
0x16cc   :  { %v4139_v20 = vmul.f32 -1.442695, %v3457_v58  ;;  %v3459_v31 = vpop.f32.mrb[45].mxu0  ;;  %v3512_v4 = vpop.f32.mrb[53].mxu1 }
0x16cd   :  { %v4140_v14 = vmul.f32 -1.442695, %v3459_v31  ;;  %v3461_v55 = vpop.f32.mrb[46].mxu0  ;;  %v3514_v21 = vpop.f32.mrb[54].mxu1 }
0x16ce   :  { %4914 = vpow2.f32 %v4139_v20  ;;  %v4141_v38 = vmul.f32 -1.442695, %v3461_v55  ;;  %v3463_v34 = vpop.f32.mrb[47].mxu0  ;;  %v3516_v30 = vpop.f32.mrb[55].mxu1 }
0x16cf   :  { %4916 = vpow2.f32 %v4140_v14  ;;  %v4142_v63 = vmul.f32 -1.442695, %v3463_v34 }
0x16d0   :  { %v4907_v0 = vpop.eup %4906  ;;  %4918 = vpow2.f32 %v4141_v38 }
0x16d1   :  { %v4909_v51 = vpop.eup %4908  ;;  %v3543_v10 = vadd.f32 1.0, %v4907_v0  ;;  %4920 = vpow2.f32 %v4142_v63 }
0x16d2   :  { %v4911_v27 = vpop.eup %4910  ;;  %v3544_v53 = vadd.f32 1.0, %v4909_v51 }
0x16d3   :  { %v4913_v43 = vpop.eup %4912  ;;  %4922 = vrcp.f32 %v3543_v10  ;;  %v3545_v35 = vadd.f32 1.0, %v4911_v27 }
0x16d4   :  { %4924 = vrcp.f32 %v3544_v53  ;;  %v3546_v59 = vadd.f32 1.0, %v4913_v43 }
0x16d5   :  { %4926 = vrcp.f32 %v3545_v35 }
0x16d6   :  { %4928 = vrcp.f32 %v3546_v59 }
0x16d8   :  { %v4915_v48 = vpop.eup %4914 }
0x16d9   :  { %v4917_v5 = vpop.eup %4916  ;;  %v3547_v2 = vadd.f32 1.0, %v4915_v48 }
0x16da   :  { %v4919_v6 = vpop.eup %4918  ;;  %v3548_v8 = vadd.f32 1.0, %v4917_v5 }
0x16db   :  { %v4921_v60 = vpop.eup %4920  ;;  %4930 = vrcp.f32 %v3547_v2  ;;  %v3549_v11 = vadd.f32 1.0, %v4919_v6 }
0x16dc   :  { %4932 = vrcp.f32 %v3548_v8  ;;  %v3550_v61 = vadd.f32 1.0, %v4921_v60 }
0x16dd   :  { %v4923_v62 = vpop.eup %4922  ;;  %4934 = vrcp.f32 %v3549_v11 }
0x16de   :  { %v4925_v56 = vpop.eup %4924  ;;  %v3567_v7 = vmul.f32 %v4923_v62, %v3447_v22  ;;  %4936 = vrcp.f32 %v3550_v61 }
0x16df   :  { %v4927_v1 = vpop.eup %4926  ;;  %v3568_v28 = vmul.f32 %v4925_v56, %v3449_v3 }
0x16e0   :  { %v4929_v54 = vpop.eup %4928  ;;  %v3575_v36 = vmul.f32 %v3567_v7, %v3500_v16  ;;  %v3569_v39 = vmul.f32 %v4927_v1, %v3451_v44 }
0x16e1   :  { %v3576_v18 = vmul.f32 %v3568_v28, %v3502_v12  ;;  %v3570_v25 = vmul.f32 %v4929_v54, %v3453_v24 }
0x16e2   :  { %v3577_v46 = vmul.f32 %v3569_v39, %v3504_v9 }
0x16e3   :  { %v3578_v13 = vmul.f32 %v3570_v25, %v3506_v45  ;;  %v4191_v25 = vld [vmem:[%s6396_s14] ss:$0 sm:$0xff]  ;;  %s4980_s14 = smov [#allocation2]  }
0x16e4   :  { %v3583_v32 = vpack.c.bf16 %v3577_v46, %v3575_v36  ;;  %s3844_s28 = sshll.u32 %s4980_s14, 4  ;;  %s3845_s28 = int_to_ptr.vmem [resolvable:$true] %s3844_s28 }
0x16e5   :  { %v4931_v37 = vpop.eup %4930  ;;  %v3584_v29 = vpack.c.bf16 %v3578_v13, %v3576_v18  ;;  %p4959_p1 = scmp.lt.s32.totalorder %s3845_s28, %s3845_s28 }
0x16e6   :  { %v4933_v50 = vpop.eup %4932  ;;  %v3571_v40 = vmul.f32 %v4931_v37, %v3457_v58 }
0x16e7   :  { %v4935_v17 = vpop.eup %4934  ;;  %v3572_v47 = vmul.f32 %v4933_v50, %v3459_v31  ;;  %3748 = vmatprep.mubr.bf16.mxu0 %v3584_v29 }
0x16e8   :  { %v4937_v19 = vpop.eup %4936  ;;  %v3579_v22 = vmul.f32 %v3571_v40, %v3510_v52  ;;  %v3573_v42 = vmul.f32 %v4935_v17, %v3461_v55  ;;  %3749 = vmatmul.mubr.bf16.vlgmr.msra.gmra.mrb[48].mxu0 %v3583_v32  ;;  %v4192_v32 = vld [vmem:[%s6397_s15] ss:$0 sm:$0xff]  ;;  %s4954_s15 = scalar_lea.vmem %s3845_s28, 512 }
0x16e9   :  { %v3580_v3 = vmul.f32 %v3572_v47, %v3512_v4  ;;  %v3574_v41 = vmul.f32 %v4937_v19, %v3463_v34  ;;  %p4955_p0 = scmp.ne.s32.totalorder %s3845_s28, %s4954_s15  ;;  %p4960_p2 = scmp.lt.s32.totalorder %s4954_s15, %s4954_s15 }
0x16ea   :  { %v3581_v16 = vmul.f32 %v3573_v42, %v3514_v21 }
0x16eb   :  { %v3582_v44 = vmul.f32 %v3574_v41, %v3516_v30  ;;  %p4961_p3 = por %p4960_p2, %p4959_p1 }
0x16ec   :  { %v3585_v12 = vpack.c.bf16 %v3581_v16, %v3579_v22 }
0x16ed   :  { %v3586_v57 = vpack.c.bf16 %v3582_v44, %v3580_v3  ;;  %p4962_p4 = pnand %p4961_p3, %p4955_p0 }
0x16ef   :  { %3756 = vmatprep.mubr.bf16.mxu0 %v3586_v57 }
0x16f0   :  { %3757 = vmatmul.mubr.bf16.gmra.mrb[52].mxu0 %v3585_v12 }
0x17bb   :  { %v4313_v9 = vpop.f32.mrb[48].mxu0 }
0x17bc   :  { %v4314_v24 = vpop.f32.mrb[49].mxu0 }
0x17bd   :  { %v4315_v45 = vadd.f32 %v4314_v24, %v4313_v9  ;;  %v4316_v49 = vpop.f32.mrb[50].mxu0 }
0x17be   :  { %v4317_v58 = vpop.f32.mrb[51].mxu0 }
0x17bf   :  { %v3765_v20 = vadd.f32 %v6169_v15, %v4315_v45  ;;  %v4318_v31 = vadd.f32 %v4317_v58, %v4316_v49 }
0x17c1   :  { %v3766_v52 = vadd.f32 %v6172_v23, %v4318_v31  ;;  %3771 = vadd.xlane.f32.xlu0 %v3765_v20 }
0x17c3   :  { %3773 = vadd.xlane.f32.xlu1 %v3766_v52  ;;  %v4319_v4 = vpop.f32.mrb[52].mxu0 }
0x17c4   :  { %v4320_v14 = vpop.f32.mrb[53].mxu0 }
0x17c5   :  { %v4321_v55 = vadd.f32 %v4320_v14, %v4319_v4  ;;  %v4322_v21 = vpop.f32.mrb[54].mxu0 }
0x17c6   :  { %v4323_v38 = vpop.f32.mrb[55].mxu0 }
0x17c7   :  { %v3767_v34 = vadd.f32 %v6180_v26, %v4321_v55  ;;  %v4324_v30 = vadd.f32 %v4323_v38, %v4322_v21 }
0x17c9   :  { %v3768_v63 = vadd.f32 %v6176_v33, %v4324_v30  ;;  %3775 = vadd.xlane.f32.xlu0 %v3767_v34 }
0x17cb   :  { %3777 = vadd.xlane.f32.xlu1 %v3768_v63 }
0x184e   :  { %v3772_v0 = vpop.xlane.xlu0 %3771 }
0x184f   :  { %v3779_v51 = vmul.f32 0.0078125, %v3772_v0 }
0x1850   :  { %v3774_v15 = vpop.xlane.xlu1 %3773 }
0x1851   :  { %v3783_v10 = vsub.f32 %v3765_v20, %v3779_v51  ;;  %v3780_v27 = vmul.f32 0.0078125, %v3774_v15 }
0x1853   :  { %v3784_v23 = vsub.f32 %v3766_v52, %v3780_v27  ;;  %v3787_v53 = vmul.f32 %v3783_v10, %v3783_v10 }
0x1855   :  { %3791 = vadd.xlane.f32.xlu0 %v3787_v53  ;;  %v3788_v43 = vmul.f32 %v3784_v23, %v3784_v23 }
0x1856   :  { %v3776_v35 = vpop.xlane.xlu0 %3775 }
0x1857   :  { %v3781_v59 = vmul.f32 0.0078125, %v3776_v35  ;;  %3793 = vadd.xlane.f32.xlu1 %v3788_v43 }
0x1858   :  { %v3778_v48 = vpop.xlane.xlu1 %3777 }
0x1859   :  { %v3785_v5 = vsub.f32 %v3767_v34, %v3781_v59  ;;  %v3782_v26 = vmul.f32 0.0078125, %v3778_v48 }
0x185b   :  { %v3786_v2 = vsub.f32 %v3768_v63, %v3782_v26  ;;  %v3789_v6 = vmul.f32 %v3785_v5, %v3785_v5 }
0x185d   :  { %3795 = vadd.xlane.f32.xlu0 %v3789_v6  ;;  %v3790_v33 = vmul.f32 %v3786_v2, %v3786_v2 }
0x185f   :  { %3797 = vadd.xlane.f32.xlu1 %v3790_v33 }
0x18e2   :  { %v3792_v8 = vpop.xlane.xlu0 %3791 }
0x18e3   :  { %v3799_v60 = vmul.f32 0.0078125, %v3792_v8 }
0x18e4   :  { %v3794_v11 = vpop.xlane.xlu1 %3793 }
0x18e5   :  { %v3803_v61 = vadd.f32 1e-05, %v3799_v60  ;;  %v3800_v62 = vmul.f32 0.0078125, %v3794_v11 }
0x18e7   :  { %4938 = vrsqrt.f32 %v3803_v61  ;;  %v3804_v56 = vadd.f32 1e-05, %v3800_v62 }
0x18e9   :  { %4940 = vrsqrt.f32 %v3804_v56 }
0x18ea   :  { %v3796_v7 = vpop.xlane.xlu0 %3795 }
0x18eb   :  { %v3801_v1 = vmul.f32 0.0078125, %v3796_v7 }
0x18ec   :  { %v3798_v28 = vpop.xlane.xlu1 %3797 }
0x18ed   :  { %v3805_v54 = vadd.f32 1e-05, %v3801_v1  ;;  %v3802_v36 = vmul.f32 0.0078125, %v3798_v28 }
0x18ef   :  { %4942 = vrsqrt.f32 %v3805_v54  ;;  %v3806_v39 = vadd.f32 1e-05, %v3802_v36 }
0x18f1   :  { %v4939_v18 = vpop.eup %4938  ;;  %4944 = vrsqrt.f32 %v3806_v39 }
0x18f2   :  { %v3811_v46 = vmul.f32 %v4939_v18, %v3783_v10 }
0x18f3   :  { %v4941_v13 = vpop.eup %4940 }
0x18f4   :  { %v3821_v37 = vmul.f32 %v4191_v25, %v3811_v46  ;;  %v3812_v29 = vmul.f32 %v4941_v13, %v3784_v23 }
0x18f6   :  { %v3822_v50 = vmul.f32 %v4191_v25, %v3812_v29  ;;  %v3831_v40 = vadd.f32 %v4192_v32, %v3821_v37 }
0x18f8   :  { %v3832_v17 = vadd.f32 %v4192_v32, %v3822_v50  ;;  %3835 = vst [vmem:[#allocation2] sm:$0xff] %v3831_v40 }
0x18f9   :  { %v4943_v47 = vpop.eup %4942 }
0x18fa   :  { %v3813_v19 = vmul.f32 %v4943_v47, %v3785_v5  ;;  %3836 = vst [vmem:[#allocation2 + $0x8] sm:$0xff] %v3832_v17 }
0x18fb   :  { %v4945_v22 = vpop.eup %4944 }
0x18fc   :  { %v3823_v42 = vmul.f32 %v4191_v25, %v3813_v19  ;;  %v3814_v3 = vmul.f32 %v4945_v22, %v3786_v2 }
0x18fe   :  { %v3833_v41 = vadd.f32 %v4192_v32, %v3823_v42  ;;  %v3824_v16 = vmul.f32 %v4191_v25, %v3814_v3 }
0x1900   :  { %3837 = vst [vmem:[#allocation2 + $0x10] sm:$0xff] %v3833_v41  ;;  %v3834_v44 = vadd.f32 %v4192_v32, %v3824_v16 }
0x1902   :  { %3838 = vst [vmem:[#allocation2 + $0x18] sm:$0xff] %v3834_v44 }
0x1903   :  { %4965 = shalt.err (!%p4962_p4)
}
0x1904   :  { %s4966_s0 = scalar_lea.hbm %s6398_s16, 512 }
0x1905   :  { %p4967_p5 = scmp.ne.s32.totalorder %s6398_s16, %s4966_s0  ;;  %p4970_p6 = scmp.lt.u32.totalorder %s4966_s0, %s6398_s16 }
0x1907   :  { %p4972_p7 = pnand %p4970_p6, %p4967_p5 }
0x1909   :  { %4975 = shalt.err (!%p4972_p7)
}
0x190a   :  { %s4981_s23 = smov 128   ;;  %s4982_s10 = smov 8  }
0x190b   :  { %3850 = dma.vmem_to_hbm [thread:$0]  %s3845_s28, 512, %s6398_s16, [#allocation3], %s4981_s23, %s4981_s23, %s4982_s10  }
0x190c   :  { %4976 = dma.done.wait [#allocation3], 512  }
0x190d   :  { %4977 = vsyncadd [#allocation3], 4294966784 }
0x190e   :  { %3854 = vsyncpa [#allocation3], 1 }

</bundles_post_ra>
